<compile_context>
chip_gen: v6e
topology: v6e:2x2x1
jax: 0.10.0
libtpu: 0.0.40
codegen_flags: <defaults>
</compile_context>

<pallas_src>
import math

import jax
import jax.numpy as jnp
import numpy as np
from jax import lax
from jax.experimental import pallas as pl
from jax.experimental.pallas import tpu as pltpu


def _qkv_attn_kernel(qkv_ref, out_ref):
    # qkv_ref: (Hb, 3*C, T)   out_ref: (Hb, C, T)
    ch = out_ref.shape[1]

    q = qkv_ref[:, 0:ch, :]            # (Hb, C, T)
    k = qkv_ref[:, ch:2 * ch, :]       # (Hb, C, S)
    v = qkv_ref[:, 2 * ch:3 * ch, :]   # (Hb, C, S)

    # Original module scales q and k each by 1/ch**0.25; fold into one pass
    # over q (pure reassociation, halves the VPU prologue work).
    q = q * (1.0 / math.sqrt(ch))

    # Transposed weights: w[h, s, t] = sum_c k[h, c, s] * q[h, c, t].
    # Batched dot_general contracting over C; keeping the result as (S, T)
    # makes the second matmul transpose-free.
    w = lax.dot_general(
        k, q,
        dimension_numbers=(((1,), (1,)), ((0,), (0,))),
        preferred_element_type=jnp.float32)            # (Hb, S, T) f32

    # Softmax over s (axis=-2 here == torch softmax over the last axis of the
    # untransposed (t, s) weights), computed in float32, cast back to the
    # input dtype afterwards (matches torch semantics).
    w = w - jnp.max(w, axis=1, keepdims=True)
    w = jnp.exp(w)
    w = w * pl.reciprocal(jnp.sum(w, axis=1, keepdims=True), approx=True)
    w = w.astype(out_ref.dtype)

    # a[h, c, t] = sum_s v[h, c, s] * w[h, s, t]  — canonical MXU matmul
    # (lhs contracts on its lane dim, rhs on its sublane dim): no transposes.
    a = lax.dot_general(
        v, w,
        dimension_numbers=(((2,), (1,)), ((0,), (0,))),
        preferred_element_type=jnp.float32)            # (Hb, C, T)
    out_ref[...] = a.astype(out_ref.dtype)


def _pick_heads_per_step(bh, ch, length, itemsize):
    """Largest divisor of bh that keeps live VMEM bounded and grid >= 2."""
    # Per-head live VMEM: double-buffered in/out blocks + f32 (S,T) weights
    # + f32 (C,T) accumulator.
    per_head = ((2 * 3 * ch * length + 2 * ch * length) * itemsize
                + (length * length + ch * length) * 4)
    budget = 24 * 1024 * 1024
    hb_cap = max(1, budget // per_head)
    if bh >= 2:
        # keep at least 2 grid steps so both v7x TensorCores get work
        hb_cap = min(hb_cap, bh // 2)
    best = 1
    for hb in range(1, bh + 1):
        if bh % hb == 0 and hb <= hb_cap:
            best = hb
    return best


def qkv_attention_legacy(qkv, n_heads, heads_per_step=None):
    """qkv: [N, H*3*C, T] -> [N, H*C, T], identical to QKVAttentionLegacy.forward."""
    bs, width, length = qkv.shape
    assert width % (3 * n_heads) == 0
    ch = width // (3 * n_heads)
    bh = bs * n_heads

    qkv_flat = qkv.reshape(bh, 3 * ch, length)  # free (contiguous) reshape

    hb = heads_per_step or _pick_heads_per_step(
        bh, ch, length, jnp.dtype(qkv.dtype).itemsize)
    assert bh % hb == 0
    grid = bh // hb

    # NOTE: the (S, T) f32 softmax matrix is materialized per head block; for
    # very large T (>= ~2048 on v7x) a KV-tiled online-softmax variant would
    # be needed.  Fine for UNet attention resolutions (T <= ~1024).
    out_flat = pl.pallas_call(
        _qkv_attn_kernel,
        out_shape=jax.ShapeDtypeStruct((bh, ch, length), qkv.dtype),
        grid_spec=pltpu.PrefetchScalarGridSpec(
            num_scalar_prefetch=0,
            grid=(grid,),
            in_specs=[pl.BlockSpec((hb, 3 * ch, length), lambda b: (b, 0, 0))],
            out_specs=pl.BlockSpec((hb, ch, length), lambda b: (b, 0, 0)),
        ),
        compiler_params=pltpu.CompilerParams(
            dimension_semantics=("parallel",),
            vmem_limit_bytes=64 * 1024 * 1024),
    )(qkv_flat)

    return out_flat.reshape(bs, n_heads * ch, length)


def _reference(qkv, n_heads):
    bs, width, length = qkv.shape
    ch = width // (3 * n_heads)
    x = qkv.reshape(bs * n_heads, 3 * ch, length)
    q, k, v = x[:, :ch], x[:, ch:2 * ch], x[:, 2 * ch:]
    scale = 1.0 / math.sqrt(math.sqrt(ch))
    w = jnp.einsum('bct,bcs->bts', q * scale, k * scale)
    w = jax.nn.softmax(w.astype(jnp.float32), axis=-1).astype(w.dtype)
    a = jnp.einsum('bts,bcs->bct', w, v)
    return a.reshape(bs, -1, length)


if __name__ == "__main__":
    key = jax.random.PRNGKey(0)
    # T = 256 corresponds to 16x16 spatial attention in the UNet; qkv width = H*3*C = 384.
    N, H, C, T = 2, 4, 32, 256
    qkv = jax.random.normal(key, (N, H * 3 * C, T), dtype=jnp.float32)

    out = qkv_attention_legacy(qkv, n_heads=H)
    out = jax.block_until_ready(out)

    ref = _reference(qkv, H)
    # Tolerance accounts for the approx (EUP) reciprocal in the softmax
    # denominator (~1e-4 rel) and the folded single-sided q scaling.
    np.testing.assert_allclose(np.asarray(out), np.asarray(ref),
                               rtol=2e-3, atol=2e-3)
    print("KERNEL_OK")
</pallas_src>

<mosaic_0001>
module attributes {stable_mosaic.version = 11 : i64} {
  func.func @_qkv_attn_kernel(%arg0: i32, %arg1: memref<4x96x256xf32, #tpu.memory_space<vmem>>, %arg2: memref<4x32x256xf32, #tpu.memory_space<vmem>>) attributes {dimension_semantics = [#tpu.dimension_semantics<parallel>], iteration_bounds = array<i64: 2>, scalar_prefetch = 0 : i64, scratch_operands = 0 : i64, tpu.core_type = #tpu.core_type<tc>, window_params = [{transform_indices = @transform_0, window_bounds = array<i64: 4, 96, 256>}, {transform_indices = @transform_1, window_bounds = array<i64: 4, 32, 256>}]} {
    %c0 = arith.constant 0 : index
    %c0_0 = arith.constant 0 : index
    %c0_1 = arith.constant 0 : index
    %0 = vector.load %arg1[%c0, %c0_0, %c0_1] : memref<4x96x256xf32, #tpu.memory_space<vmem>>, vector<4x32x256xf32>
    %c0_2 = arith.constant 0 : index
    %c32 = arith.constant 32 : index
    %c0_3 = arith.constant 0 : index
    %1 = vector.load %arg1[%c0_2, %c32, %c0_3] : memref<4x96x256xf32, #tpu.memory_space<vmem>>, vector<4x32x256xf32>
    %c0_4 = arith.constant 0 : index
    %c64 = arith.constant 64 : index
    %c0_5 = arith.constant 0 : index
    %2 = vector.load %arg1[%c0_4, %c64, %c0_5] : memref<4x96x256xf32, #tpu.memory_space<vmem>>, vector<4x32x256xf32>
    %cst = arith.constant 0.176776692 : f32
    %3 = vector.broadcast %cst : f32 to vector<4x32x256xf32>
    %4 = arith.mulf %0, %3 : vector<4x32x256xf32>
    %cst_6 = arith.constant dense<0.000000e+00> : vector<4x256x256xf32>
    %5 = tpu.matmul %1, %4, %cst_6 {dimension_numbers = #tpu.dot_dimension_numbers<[1], [1], [2], [2], [0, 0, 0, 2, 1, 2], [0], [0]>} : vector<4x32x256xf32>, vector<4x32x256xf32>, vector<4x256x256xf32> -> vector<4x256x256xf32>
    %cst_7 = arith.constant dense<0xFF800000> : vector<4x256xf32>
    %6 = vector.multi_reduction <maximumf>, %5, %cst_7 [1] : vector<4x256x256xf32> to vector<4x256xf32>
    %7 = vector.shape_cast %6 : vector<4x256xf32> to vector<4x1x256xf32>
    %8 = vector.broadcast %7 : vector<4x1x256xf32> to vector<4x256x256xf32>
    %9 = arith.subf %5, %8 : vector<4x256x256xf32>
    %10 = math.exp %9 : vector<4x256x256xf32>
    %cst_8 = arith.constant dense<0.000000e+00> : vector<4x256xf32>
    %11 = vector.multi_reduction <add>, %10, %cst_8 [1] : vector<4x256x256xf32> to vector<4x256xf32>
    %12 = vector.shape_cast %11 : vector<4x256xf32> to vector<4x1x256xf32>
    %13 = tpu.reciprocal %12 {approx = true} : vector<4x1x256xf32> -> vector<4x1x256xf32>
    %14 = vector.broadcast %13 : vector<4x1x256xf32> to vector<4x256x256xf32>
    %15 = arith.mulf %10, %14 : vector<4x256x256xf32>
    %cst_9 = arith.constant dense<0.000000e+00> : vector<4x32x256xf32>
    %16 = tpu.matmul %2, %15, %cst_9 {dimension_numbers = #tpu.dot_dimension_numbers<[2], [1], [1], [2], [0, 0, 0, 1, 1, 2], [0], [0]>} : vector<4x32x256xf32>, vector<4x256x256xf32>, vector<4x32x256xf32> -> vector<4x32x256xf32>
    %c0_10 = arith.constant 0 : index
    %c0_11 = arith.constant 0 : index
    %c0_12 = arith.constant 0 : index
    %17 = vector.load %arg2[%c0_10, %c0_11, %c0_12] : memref<4x32x256xf32, #tpu.memory_space<vmem>>, vector<4x32x256xf32>
    tpu.vector_store %arg2[%c0_10, %c0_11, %c0_12], %16 {strides = array<i32>} : memref<4x32x256xf32, #tpu.memory_space<vmem>>, vector<4x32x256xf32>,
    return
  }
  func.func @transform_0(%arg0: i32) -> (i32, i32, i32) {
    %c0_i32 = arith.constant 0 : i32
    %c0_i32_0 = arith.constant 0 : i32
    %c0_i32_1 = arith.constant 0 : i32
    return %arg0, %c0_i32, %c0_i32_0 : i32, i32, i32
  }
  func.func @transform_1(%arg0: i32) -> (i32, i32, i32) {
    %c0_i32 = arith.constant 0 : i32
    %c0_i32_0 = arith.constant 0 : i32
    %c0_i32_1 = arith.constant 0 : i32
    return %arg0, %c0_i32, %c0_i32_0 : i32, i32, i32
  }
}

</mosaic_0001>

<bundles_post_ra>
// kernel: tpu_custom_call.1
= control target key start
LH: loop header
LB: loop body
LE: loop exit
PB: predicated region body
PF: predicated region fallthrough
CT: control target
= control target key end

     0   :  { %6 = vsyncpa [#allocation3], 0  ;;  %s9064_s0 = inlined_call_operand.hbm [shape: f32[8,96,256], index: 0, kind: input, shape index: {}]   ;;  %s9065_s1 = inlined_call_operand.hbm [shape: f32[8,32,256], index: 1, kind: output, shape index: {}]  }
   0x1   :  { %8 = vsyncpa [#allocation3 + $0x1], 0 }
   0x2   :  { %9 = vsyncpa [#allocation4], 0 }
   0x3   :  { %11 = vsyncpa [#allocation4 + $0x1], 0  ;;  %s4872_s6 = smov 0   ;;  %s4874_s7 = smov 0  }
   0x4   :  { %s4876_s8 = smov 0   ;;  %s4878_s9 = smov 0  }
   0x5 LB: > { %s4893_s10 = sadd.s32 4294967295, %s4853_s9   ;;  %s4035_s11 = sadd.s32 4294967294, %s4853_s9   ;;  %s4853_s9 = sphi %s4878_s9, %s10709_s9   ;;  %s4849_s8 = sphi %s4876_s8, %s10708_s8   ;;  %s4845_s7 = sphi %s4874_s7, %s10707_s7   ;;  %s4841_s6 = sphi %s4872_s6, %s10706_s6  }
   0x6   : > { %s4897_s12 = sadd.s32 1, %s4853_s9   ;;  %s24_s13 = sadd.s32 1, %s4849_s8 }
   0x7   : > { %s21_s14 = ssub.s32 %s4853_s9, %s4897_s12  ;;  %p31_p0 = scmp.ne.s32.totalorder %s4849_s8, %s4845_s7 }
   0x8   : > { %p22_p1 = scmp.eq.s32.totalorder %s21_s14, 0  ;;  %p32_p2 = scmp.eq.s32.totalorder %s4853_s9, 0 }
   0x9   : > { %p37_p3 = scmp.ne.s32.totalorder %s4845_s7, %s4841_s6  ;;  %p38_p4 = scmp.eq.s32.totalorder %s4893_s10, 0 }
   0xa   : > { %s4909_s15 = scalar_select %p22_p1, %s4849_s8, %s24_s13  }
   0xb   : > { %p33_p5 = por %p32_p2, %p31_p0  ;;  %p4911_p6 = por %p38_p4, %p37_p3 }
   0xc   : > { %p61_p7 = scmp.eq.s32.totalorder %s4893_s10, 1  ;;  %p67_p8 = scmp.eq.s32.totalorder %s4035_s11, 1 }
   0xd   : > { %s9569_s16 = scalar_select %p4911_p6, 1, 0 }
   0xe   : > { %p4194_p10 = scmp.lt.s32.totalorder %s4853_s9, 2  ;;  %p4918_p11 = por %p61_p7, %p31_p0 }
   0xf   : > { %p4922_p12 = por %p67_p8, %p37_p3  ;;  %s87_s19 = sand.u32 1, %s4849_s8  }
  0x10   : > { %s9570_s17 = scalar_select %p4918_p11, 1, 0 }
  0x11   : > { %s9571_s18 = scalar_select %p4922_p12, 1, 0 }
  0x12   : > { %s4180_s20 = smul.u32 12288, %s4853_s9  ;;  %p4933_p13 = pnand %p4194_p10, %p33_p5 }
  0x13   : > { %s4179_s21 = smul.u32 768, %s87_s19  ;;  %s4939_s28 = scalar_lea.sflag [#allocation3], %s87_s19 }
  0x14   : > { %s4931_s24 = scalar_lea.hbm %s9064_s0, %s4180_s20  ;;  %p4763_p1 = pneg %p4933_p13 }
  0x15   : > { %s91_s26 = scalar_lea.vmem [#allocation2], %s4179_s21  ;;  %s4761_s29 = scalar_lea.hbm %s4931_s24, 12288 }
  0x16   : > { %s99_s27 = sshll.u32 %s91_s26, 4  ;;  %p4762_p0 = scmp.ne.s32.totalorder %s4931_s24, %s4761_s29  ;;  %s4937_s27 = int_to_ptr.vmem [resolvable:$true] %s99_s27 }
  0x17   : > { %s4766_s3 = scalar_lea.hbm %s9064_s0, 24576  ;;  %p4767_p4 = scmp.lt.s32.totalorder %s4931_s24, %s9064_s0 }
  0x18   : > { %p4764_p2 = pnand %p4763_p1, %p4762_p0  ;;  %p4768_p5 = scmp.lt.s32.totalorder %s4766_s3, %s4761_s29 }
  0x1a   : > { %p4765_p3 = pneg %p4764_p2  ;;  %p4769_p7 = por %p4768_p5, %p4767_p4 }
  0x1c   : > { %p4770_p8 = pnand %p4769_p7, %p4765_p3 }
  0x1e   : > { %4773 = shalt.err (!%p4770_p8)
}
  0x1f   : > { %s4774_s11 = scalar_lea.vmem %s4937_s27, 12288  ;;  %s4855_s13 = smov [#allocation2]  }
  0x20   : > { %p4775_p10 = scmp.ne.s32.totalorder %s4937_s27, %s4774_s11  ;;  %s4779_s14 = sshll.u32 %s4855_s13, 4  ;;  %s4780_s14 = int_to_ptr.vmem [resolvable:$false] %s4779_s14 }
  0x21   : > { %s4781_s19 = scalar_lea.vmem %s4780_s14, 24576  ;;  %p4782_p2 = scmp.lt.s32.totalorder %s4937_s27, %s4780_s14 }
  0x22   : > { %p4777_p9 = pnand %p4775_p10, %p4763_p1  ;;  %p4783_p12 = scmp.lt.s32.totalorder %s4781_s19, %s4774_s11 }
  0x24   : > { %p4778_p0 = pneg %p4777_p9  ;;  %p4784_p11 = por %p4783_p12, %p4782_p2 }
  0x26   : > { %p4785_p6 = pnand %p4784_p11, %p4778_p0 }
  0x28   : > { %4788 = shalt.err (!%p4785_p6)
}
  0x29   : > { %s4856_s20 = smov 256   ;;  %s4857_s21 = smov 16  }
  0x2a   : > { %4189 = dma.hbm_to_vmem [thread:$0]  (!%p4933_p13), %s4931_s24, 12288, %s4937_s27, %s4939_s28, %s4856_s20, %s4856_s20, %s4857_s21  }
  0x2b   : > { %p4041_p9 = scmp.ge.s32.totalorder %s4853_s9, 1  ;;  %p107_p1 = scmp.lt.s32.totalorder %s4853_s9, 3 }
  0x2d   : > { %p108_p3 = pnand %p4041_p9, %p107_p1 }
  0x2f   : > { %111 = sbr.rel (%p108_p3) target bundleno = 1215 (0x4bf), region = 24 }
  0x34   : > { %s4963_s22 = sand.u32 1, %s4845_s7   ;;  %p9573_p6 = scmp.ne.s32.totalorder %s9569_s16, 0 }
  0x35   : > { %s4181_s23 = smul.u32 768, %s4963_s22  ;;  %s114_s26 = scalar_lea.sflag [#allocation3], %s4963_s22 }
  0x37   : > { %s4967_s29 = scalar_lea.vmem [#allocation2], %s4181_s23 }
  0x38   : > { %4832 = dma.done.wait (%p9573_p6), %s114_s26, 12288  }
  0x39   : > { %4834 = vsyncadd (%p9573_p6), %s114_s26, 4294955008  ;;  %v4858_v0 = vmov 0.0   ;;  %v178_v1 = vld [vmem:[%s4967_s29 + $0x100] sm:$0xff]  ;;  %v180_v3 = vld [vmem:[%s4967_s29 + $0x110] sm:$0xff]  ;;  %vm330_vm0 = vcmask 261120   ;;  %s4042_s16 = sshll.u32 %s4963_s22, 8 }
  0x3a   : > { %491 = vmatprep.mubr.f32.mxu0 %v4858_v0  ;;  %908 = vmatprep.mubr.f32.mxu1 %v4858_v0  ;;  %v170_v2 = vld [vmem:[%s4967_s29 + $0x40] sm:$0xff]  ;;  %v172_v4 = vld [vmem:[%s4967_s29 + $0x50] sm:$0xff]  ;;  %v145_v7 = vld [vmem:[%s4967_s29 + $0x38] sm:$0xff]  ;;  %s8980_s24 = scalar_lea.vmem [#allocation5], %s4042_s16  ;;  %s4178_s25 = sshll.u32 %s4893_s10, 12 }
  0x3b   : > { %684 = vxpose.xlu1.b32.start [1/4] (short) %v178_v1, 128  ;;  %266 = vxpose.xlu0.b32.start [1/4] (short) %v170_v2, 128  ;;  %v182_v5 = vld [vmem:[%s4967_s29 + $0x120] sm:$0xff]  ;;  %v153_v8 = vld [vmem:[%s4967_s29 + $0xf8] sm:$0xff]  ;;  %v241_v9 = vmul.f32 0.17677669, %v145_v7  ;;  %v144_v11 = vld [vmem:[%s4967_s29 + $0x30] sm:$0xff]  ;;  %s3962_s27 = sshll.u32 %s8980_s24, 4  ;;  %s9017_s2 = scalar_lea.hbm %s9065_s1, %s4178_s25  ;;  %s9019_s27 = int_to_ptr.vmem [resolvable:$true] %s3962_s27 }
  0x3c   : > { %v174_v6 = vld [vmem:[%s4967_s29 + $0x60] sm:$0xff]  ;;  %v249_v10 = vmul.f32 0.17677669, %v153_v8  ;;  %v152_v12 = vld [vmem:[%s4967_s29 + $0xf0] sm:$0xff]  ;;  %v240_v13 = vmul.f32 0.17677669, %v144_v11 }
  0x3d   : > { %v248_v14 = vmul.f32 0.17677669, %v152_v12  ;;  %v143_v15 = vld [vmem:[%s4967_s29 + $0x28] sm:$0xff]  ;;  %v184_v17 = vld [vmem:[%s4967_s29 + $0x130] sm:$0xff]  ;;  %451 = vmatprep.subr.mxu0 %v241_v9  ;;  %v142_v21 = vld [vmem:[%s4967_s29 + $0x20] sm:$0xff]  ;;  %s3948_s3 = scalar_lea.sflag [#allocation4], %s4963_s22 }
  0x3e   : > { %v151_v16 = vld [vmem:[%s4967_s29 + $0xe8] sm:$0xff]  ;;  %v176_v18 = vld [vmem:[%s4967_s29 + $0x70] sm:$0xff]  ;;  %868 = vmatprep.subr.mxu1 %v249_v10  ;;  %v239_v19 = vmul.f32 0.17677669, %v143_v15  ;;  %v150_v22 = vld [vmem:[%s4967_s29 + $0xe0] sm:$0xff]  ;;  %452 = vmatpush1.msra.mxu0 %v240_v13  ;;  %s4789_s4 = scalar_lea.vmem %s9019_s27, 4096 }
  0x3f   : > { %685 = vxpose.xlu1.b32.cont [2/4] (short) %v180_v3, 128  ;;  %267 = vxpose.xlu0.b32.cont [2/4] (short) %v172_v4, 128  ;;  %v247_v20 = vmul.f32 0.17677669, %v151_v16  ;;  %v238_v23 = vmul.f32 0.17677669, %v142_v21  ;;  %v246_v24 = vmul.f32 0.17677669, %v150_v22  ;;  %p4790_p11 = scmp.ne.s32.totalorder %s9019_s27, %s4789_s4 }
  0x40   : > { %v141_v25 = vld [vmem:[%s4967_s29 + $0x18] sm:$0xff]  ;;  %869 = vmatpush1.msra.mxu1 %v248_v14  ;;  %v140_v29 = vld [vmem:[%s4967_s29 + $0x10] sm:$0xff]  ;;  %453 = vmatprep.subr.mxu0 %v239_v19  ;;  %v139_v33 = vld [vmem:[%s4967_s29 + $0x8] sm:$0xff]  ;;  %p10703_p12 = scmp.ne.s32.totalorder %s9570_s17, 0  ;;  %s4859_s10 = smov [#allocation5]  }
  0x41   : > { %v149_v26 = vld [vmem:[%s4967_s29 + $0xd8] sm:$0xff]  ;;  %v237_v27 = vmul.f32 0.17677669, %v141_v25  ;;  %v148_v30 = vld [vmem:[%s4967_s29 + $0xd0] sm:$0xff]  ;;  %870 = vmatprep.subr.mxu1 %v247_v20  ;;  %v236_v31 = vmul.f32 0.17677669, %v140_v29  ;;  %454 = vmatpush1.msra.mxu0 %v238_v23 }
  0x42   : > { %v245_v28 = vmul.f32 0.17677669, %v149_v26  ;;  %v244_v32 = vmul.f32 0.17677669, %v148_v30  ;;  %v147_v34 = vld [vmem:[%s4967_s29 + $0xc8] sm:$0xff]  ;;  %871 = vmatpush1.msra.mxu1 %v246_v24  ;;  %v138_v37 = vld [vmem:[%s4967_s29] sm:$0xff]  ;;  %p4791_p13 = pnand %p4790_p11, %p10703_p12 }
  0x43   : > { %686 = vxpose.xlu1.b32.cont [3/4] (short) %v182_v5, 128  ;;  %268 = vxpose.xlu0.b32.cont [3/4] (short) %v174_v6, 128  ;;  %v235_v35 = vmul.f32 0.17677669, %v139_v33  ;;  %v243_v36 = vmul.f32 0.17677669, %v147_v34  ;;  %v146_v38 = vld [vmem:[%s4967_s29 + $0xc0] sm:$0xff]  ;;  %v161_v41 = vld [vmem:[%s4967_s29 + $0x1b8] sm:$0xff] }
  0x44   : > { %v234_v39 = vmul.f32 0.17677669, %v138_v37  ;;  %v242_v40 = vmul.f32 0.17677669, %v146_v38  ;;  %v169_v42 = vld [vmem:[%s4967_s29 + $0x278] sm:$0xff]  ;;  %455 = vmatprep.subr.mxu0 %v237_v27  ;;  %872 = vmatprep.subr.mxu1 %v245_v28  ;;  %v179_v45 = vld [vmem:[%s4967_s29 + $0x108] sm:$0xff]  ;;  %p4792_p4 = pneg %p4791_p13 }
  0x45   : > { %v257_v43 = vmul.f32 0.17677669, %v161_v41  ;;  %v265_v44 = vmul.f32 0.17677669, %v169_v42  ;;  %456 = vmatpush1.msra.mxu0 %v236_v31  ;;  %873 = vmatpush1.msra.mxu1 %v244_v32  ;;  %v171_v46 = vld [vmem:[%s4967_s29 + $0x48] sm:$0xff]  ;;  %v181_v47 = vld [vmem:[%s4967_s29 + $0x118] sm:$0xff] }
  0x46   : > { %457 = vmatprep.subr.mxu0 %v235_v35  ;;  %874 = vmatprep.subr.mxu1 %v243_v36  ;;  %v173_v48 = vld [vmem:[%s4967_s29 + $0x58] sm:$0xff]  ;;  %v183_v49 = vld [vmem:[%s4967_s29 + $0x128] sm:$0xff]  ;;  %v160_v53 = vld [vmem:[%s4967_s29 + $0x1b0] sm:$0xff]  ;;  %s4793_s5 = sshll.u32 %s4859_s10, 4  ;;  %s4794_s5 = int_to_ptr.vmem [resolvable:$false] %s4793_s5 }
  0x47   : > { %687 = vxpose.xlu1.b32.end [4/4] (short) %v184_v17, 128  ;;  %269 = vxpose.xlu0.b32.end [4/4] (short) %v176_v18, 128  ;;  %v175_v50 = vld [vmem:[%s4967_s29 + $0x68] sm:$0xff]  ;;  %v185_v51 = vld [vmem:[%s4967_s29 + $0x138] sm:$0xff]  ;;  %v168_v54 = vld [vmem:[%s4967_s29 + $0x270] sm:$0xff]  ;;  %v256_v57 = vmul.f32 0.17677669, %v160_v53  ;;  %s4795_s11 = scalar_lea.vmem %s4794_s5, 8192  ;;  %p4796_p5 = scmp.lt.s32.totalorder %s9019_s27, %s4794_s5 }
  0x48   : > { %458 = vmatpush1.msra.mxu0 %v234_v39  ;;  %875 = vmatpush1.msra.mxu1 %v242_v40  ;;  %v177_v52 = vld [vmem:[%s4967_s29 + $0x78] sm:$0xff]  ;;  %v194_v55 = vld [vmem:[%s4967_s29 + $0x280] sm:$0xff]  ;;  %v264_v58 = vmul.f32 0.17677669, %v168_v54  ;;  %v159_v61 = vld [vmem:[%s4967_s29 + $0x1a8] sm:$0xff]  ;;  %p4797_p7 = scmp.lt.s32.totalorder %s4795_s11, %s4789_s4 }
  0x49   : > { %1285 = vmatprep.subr.mxu0 %v257_v43  ;;  %1702 = vmatprep.subr.mxu1 %v265_v44  ;;  %v186_v56 = vld [vmem:[%s4967_s29 + $0x1c0] sm:$0xff]  ;;  %v167_v62 = vld [vmem:[%s4967_s29 + $0x268] sm:$0xff]  ;;  %v196_v63 = vld [vmem:[%s4967_s29 + $0x290] sm:$0xff]  ;;  %v255_v2 = vmul.f32 0.17677669, %v159_v61 }
  0x4a   : > { %v188_v1 = vld [vmem:[%s4967_s29 + $0x1d0] sm:$0xff]  ;;  %v263_v3 = vmul.f32 0.17677669, %v167_v62  ;;  %v158_v6 = vld [vmem:[%s4967_s29 + $0x1a0] sm:$0xff]  ;;  %v157_v15 = vld [vmem:[%s4967_s29 + $0x198] sm:$0xff]  ;;  %p4798_p8 = por %p4797_p7, %p4796_p5 }
  0x4b   : > { %v166_v7 = vld [vmem:[%s4967_s29 + $0x260] sm:$0xff]  ;;  %v254_v10 = vmul.f32 0.17677669, %v158_v6  ;;  %v200_v14 = vld [vmem:[%s4967_s29 + $0x2b0] sm:$0xff]  ;;  %v165_v16 = vld [vmem:[%s4967_s29 + $0x258] sm:$0xff] }
  0x4c   : > { %v198_v8 = vld [vmem:[%s4967_s29 + $0x2a0] sm:$0xff]  ;;  %v262_v11 = vmul.f32 0.17677669, %v166_v7  ;;  %v192_v17 = vld [vmem:[%s4967_s29 + $0x1f0] sm:$0xff]  ;;  %v253_v20 = vmul.f32 0.17677669, %v157_v15  ;;  %p4799_p10 = pnand %p4798_p8, %p4792_p4 }
  0x4d   : > { %v190_v9 = vld [vmem:[%s4967_s29 + $0x1e0] sm:$0xff]  ;;  %v156_v18 = vld [vmem:[%s4967_s29 + $0x190] sm:$0xff]  ;;  %v261_v21 = vmul.f32 0.17677669, %v165_v16  ;;  %v155_v26 = vld [vmem:[%s4967_s29 + $0x188] sm:$0xff] }
  0x4e   : > { %v164_v19 = vld [vmem:[%s4967_s29 + $0x250] sm:$0xff]  ;;  %v252_v24 = vmul.f32 0.17677669, %v156_v18  ;;  %v163_v27 = vld [vmem:[%s4967_s29 + $0x248] sm:$0xff]  ;;  %v154_v28 = vld [vmem:[%s4967_s29 + $0x180] sm:$0xff] }
  0x4f   : > { %v260_v25 = vmul.f32 0.17677669, %v164_v19  ;;  %v162_v29 = vld [vmem:[%s4967_s29 + $0x240] sm:$0xff]  ;;  %v251_v30 = vmul.f32 0.17677669, %v155_v26  ;;  %v197_v62 = vld [vmem:[%s4967_s29 + $0x298] sm:$0xff] }
  0x50   : > { %v259_v31 = vmul.f32 0.17677669, %v163_v27  ;;  %v250_v34 = vmul.f32 0.17677669, %v154_v28  ;;  %v258_v35 = vmul.f32 0.17677669, %v162_v29 }
  0x51   : > { %v201_v7 = vld [vmem:[%s4967_s29 + $0x2b8] sm:$0xff] }
  0x78   : > { %716 = vxpose.xlu1.b32.start [1/4] (short) %v179_v45, 128  ;;  %298 = vxpose.xlu0.b32.start [1/4] (short) %v171_v46, 128 }
  0x7c   : > { %717 = vxpose.xlu1.b32.cont [2/4] (short) %v181_v47, 128  ;;  %299 = vxpose.xlu0.b32.cont [2/4] (short) %v173_v48, 128 }
  0x80   : > { %718 = vxpose.xlu1.b32.cont [3/4] (short) %v183_v49, 128  ;;  %300 = vxpose.xlu0.b32.cont [3/4] (short) %v175_v50, 128 }
  0x84   : > { %719 = vxpose.xlu1.b32.end [4/4] (short) %v185_v51, 128  ;;  %301 = vxpose.xlu0.b32.end [4/4] (short) %v177_v52, 128 }
  0xb5   : > { %1518 = vxpose.xlu1.b32.start [1/4] (short) %v194_v55, 128  ;;  %1101 = vxpose.xlu0.b32.start [1/4] (short) %v186_v56, 128 }
  0xb7   : > { %v700_v59 = vpop.trf.xlu1  ;;  %v282_v60 = vpop.trf.xlu0 }
  0xb8   : > { %4043 = vmatmul.mubr.msk.f32.vlgmr.msra.gmra.mxu0 %vm330_vm0, %v282_v60  ;;  %4075 = vmatmul.mubr.msk.f32.vlgmr.msra.gmra.mxu1 %vm330_vm0, %v700_v59  ;;  %v187_v59 = vld [vmem:[%s4967_s29 + $0x1c8] sm:$0xff] }
  0xb9   : > { %1286 = vmatpush1.msra.mxu0 %v256_v57  ;;  %1703 = vmatpush1.msra.mxu1 %v264_v58  ;;  %v195_v58 = vld [vmem:[%s4967_s29 + $0x288] sm:$0xff] }
  0xba   : > { %497 = vmatprep.mubr.f32.mxu0 %v4858_v0  ;;  %914 = vmatprep.mubr.f32.mxu1 %v4858_v0 }
  0xbb   : > { %v701_v4 = vpop.trf.xlu1  ;;  %v283_v5 = vpop.trf.xlu0  ;;  %1519 = vxpose.xlu1.b32.cont [2/4] (short) %v196_v63, 128  ;;  %1102 = vxpose.xlu0.b32.cont [2/4] (short) %v188_v1, 128  ;;  %v189_v63 = vld [vmem:[%s4967_s29 + $0x1d8] sm:$0xff] }
  0xbc   : > { %4044 = vmatmul.mubr.msk.f32.gmra.mxu0 %vm330_vm0, %v283_v5  ;;  %4076 = vmatmul.mubr.msk.f32.gmra.mxu1 %vm330_vm0, %v701_v4  ;;  %v191_v4 = vld [vmem:[%s4967_s29 + $0x1e8] sm:$0xff] }
  0xbd   : > { %503 = vmatprep.mubr.f32.mxu0 %v4858_v0  ;;  %920 = vmatprep.mubr.f32.mxu1 %v4858_v0 }
  0xbe   : > { %1287 = vmatprep.subr.mxu0 %v255_v2  ;;  %1704 = vmatprep.subr.mxu1 %v263_v3  ;;  %v199_v3 = vld [vmem:[%s4967_s29 + $0x2a8] sm:$0xff] }
  0xbf   : > { %v702_v12 = vpop.trf.xlu1  ;;  %v284_v13 = vpop.trf.xlu0  ;;  %1520 = vxpose.xlu1.b32.cont [3/4] (short) %v198_v8, 128  ;;  %1103 = vxpose.xlu0.b32.cont [3/4] (short) %v190_v9, 128  ;;  %v193_v8 = vld [vmem:[%s4967_s29 + $0x1f8] sm:$0xff] }
  0xc0   : > { %4045 = vmatmul.mubr.msk.f32.gmra.mxu0 %vm330_vm0, %v284_v13  ;;  %4077 = vmatmul.mubr.msk.f32.gmra.mxu1 %vm330_vm0, %v702_v12 }
  0xc1   : > { %509 = vmatprep.mubr.f32.mxu0 %v4858_v0  ;;  %926 = vmatprep.mubr.f32.mxu1 %v4858_v0 }
  0xc2   : > { %1288 = vmatpush1.msra.mxu0 %v254_v10  ;;  %1705 = vmatpush1.msra.mxu1 %v262_v11 }
  0xc3   : > { %v703_v22 = vpop.trf.xlu1  ;;  %v285_v23 = vpop.trf.xlu0  ;;  %1521 = vxpose.xlu1.b32.end [4/4] (short) %v200_v14, 128  ;;  %1104 = vxpose.xlu0.b32.end [4/4] (short) %v192_v17, 128 }
  0xc4   : > { %4046 = vmatmul.mubr.msk.f32.gmra.mxu0 %vm330_vm0, %v285_v23  ;;  %4078 = vmatmul.mubr.msk.f32.gmra.mxu1 %vm330_vm0, %v703_v22 }
  0xc5   : > { %515 = vmatprep.mubr.f32.mxu0 %v4858_v0  ;;  %932 = vmatprep.mubr.f32.mxu1 %v4858_v0 }
  0xc6   : > { %1289 = vmatprep.subr.mxu0 %v253_v20  ;;  %1706 = vmatprep.subr.mxu1 %v261_v21 }
  0xc7   : > { %v704_v32 = vpop.trf.xlu1  ;;  %v286_v33 = vpop.trf.xlu0  ;;  %1290 = vmatpush1.msra.mxu0 %v252_v24  ;;  %1707 = vmatpush1.msra.mxu1 %v260_v25 }
  0xc8   : > { %4047 = vmatmul.mubr.msk.f32.gmra.mxu0 %vm330_vm0, %v286_v33  ;;  %4079 = vmatmul.mubr.msk.f32.gmra.mxu1 %vm330_vm0, %v704_v32 }
  0xc9   : > { %521 = vmatprep.mubr.f32.mxu0 %v4858_v0  ;;  %938 = vmatprep.mubr.f32.mxu1 %v4858_v0 }
  0xca   : > { %1291 = vmatprep.subr.mxu0 %v251_v30  ;;  %1708 = vmatprep.subr.mxu1 %v259_v31 }
  0xcb   : > { %v705_v36 = vpop.trf.xlu1  ;;  %v287_v37 = vpop.trf.xlu0  ;;  %1292 = vmatpush1.msra.mxu0 %v250_v34  ;;  %1709 = vmatpush1.msra.mxu1 %v258_v35 }
  0xcc   : > { %4048 = vmatmul.mubr.msk.f32.gmra.mxu0 %vm330_vm0, %v287_v37  ;;  %4080 = vmatmul.mubr.msk.f32.gmra.mxu1 %vm330_vm0, %v705_v36 }
  0xcd   : > { %527 = vmatprep.mubr.f32.mxu0 %v4858_v0  ;;  %944 = vmatprep.mubr.f32.mxu1 %v4858_v0 }
  0xcf   : > { %v706_v38 = vpop.trf.xlu1  ;;  %v288_v39 = vpop.trf.xlu0 }
  0xd0   : > { %4049 = vmatmul.mubr.msk.f32.gmra.mxu0 %vm330_vm0, %v288_v39  ;;  %4081 = vmatmul.mubr.msk.f32.gmra.mxu1 %vm330_vm0, %v706_v38 }
  0xd1   : > { %533 = vmatprep.mubr.f32.mxu0 %v4858_v0  ;;  %950 = vmatprep.mubr.f32.mxu1 %v4858_v0 }
  0xd3   : > { %v707_v40 = vpop.trf.xlu1  ;;  %v289_v41 = vpop.trf.xlu0 }
  0xd4   : > { %4050 = vmatmul.mubr.msk.f32.gmra.mxu0 %vm330_vm0, %v289_v41  ;;  %4082 = vmatmul.mubr.msk.f32.gmra.mxu1 %vm330_vm0, %v707_v40 }
  0xd5   : > { %539 = vmatprep.mubr.f32.mxu0 %v4858_v0  ;;  %956 = vmatprep.mubr.f32.mxu1 %v4858_v0 }
  0xd7   : > { %v708_v42 = vpop.trf.xlu1  ;;  %v290_v43 = vpop.trf.xlu0 }
  0xd8   : > { %4051 = vmatmul.mubr.msk.f32.gmra.mxu0 %vm330_vm0, %v290_v43  ;;  %4083 = vmatmul.mubr.msk.f32.gmra.mxu1 %vm330_vm0, %v708_v42 }
  0xd9   : > { %545 = vmatprep.mubr.f32.mxu0 %v4858_v0  ;;  %962 = vmatprep.mubr.f32.mxu1 %v4858_v0 }
  0xdb   : > { %v709_v44 = vpop.trf.xlu1  ;;  %v291_v45 = vpop.trf.xlu0 }
  0xdc   : > { %4052 = vmatmul.mubr.msk.f32.gmra.mxu0 %vm330_vm0, %v291_v45  ;;  %4084 = vmatmul.mubr.msk.f32.gmra.mxu1 %vm330_vm0, %v709_v44 }
  0xdd   : > { %551 = vmatprep.mubr.f32.mxu0 %v4858_v0  ;;  %968 = vmatprep.mubr.f32.mxu1 %v4858_v0 }
  0xdf   : > { %v710_v46 = vpop.trf.xlu1  ;;  %v292_v47 = vpop.trf.xlu0 }
  0xe0   : > { %4053 = vmatmul.mubr.msk.f32.gmra.mxu0 %vm330_vm0, %v292_v47  ;;  %4085 = vmatmul.mubr.msk.f32.gmra.mxu1 %vm330_vm0, %v710_v46 }
  0xe1   : > { %557 = vmatprep.mubr.f32.mxu0 %v4858_v0  ;;  %974 = vmatprep.mubr.f32.mxu1 %v4858_v0 }
  0xe3   : > { %v711_v48 = vpop.trf.xlu1  ;;  %v293_v49 = vpop.trf.xlu0 }
  0xe4   : > { %4054 = vmatmul.mubr.msk.f32.gmra.mxu0 %vm330_vm0, %v293_v49  ;;  %4086 = vmatmul.mubr.msk.f32.gmra.mxu1 %vm330_vm0, %v711_v48 }
  0xe5   : > { %563 = vmatprep.mubr.f32.mxu0 %v4858_v0  ;;  %980 = vmatprep.mubr.f32.mxu1 %v4858_v0 }
  0xe7   : > { %v712_v50 = vpop.trf.xlu1  ;;  %v294_v51 = vpop.trf.xlu0 }
  0xe8   : > { %4055 = vmatmul.mubr.msk.f32.gmra.mxu0 %vm330_vm0, %v294_v51  ;;  %4087 = vmatmul.mubr.msk.f32.gmra.mxu1 %vm330_vm0, %v712_v50 }
  0xe9   : > { %569 = vmatprep.mubr.f32.mxu0 %v4858_v0  ;;  %986 = vmatprep.mubr.f32.mxu1 %v4858_v0 }
  0xeb   : > { %v713_v52 = vpop.trf.xlu1  ;;  %v295_v53 = vpop.trf.xlu0 }
  0xec   : > { %4056 = vmatmul.mubr.msk.f32.gmra.mxu0 %vm330_vm0, %v295_v53  ;;  %4088 = vmatmul.mubr.msk.f32.gmra.mxu1 %vm330_vm0, %v713_v52 }
  0xed   : > { %575 = vmatprep.mubr.f32.mxu0 %v4858_v0  ;;  %992 = vmatprep.mubr.f32.mxu1 %v4858_v0 }
  0xef   : > { %v714_v54 = vpop.trf.xlu1  ;;  %v296_v55 = vpop.trf.xlu0 }
  0xf0   : > { %4057 = vmatmul.mubr.msk.f32.gmra.mxu0 %vm330_vm0, %v296_v55  ;;  %4089 = vmatmul.mubr.msk.f32.gmra.mxu1 %vm330_vm0, %v714_v54 }
  0xf1   : > { %581 = vmatprep.mubr.f32.mxu0 %v4858_v0  ;;  %998 = vmatprep.mubr.f32.mxu1 %v4858_v0 }
  0xf3   : > { %v715_v56 = vpop.trf.xlu1  ;;  %v297_v57 = vpop.trf.xlu0 }
  0xf4   : > { %4058 = vmatmul.mubr.msk.f32.gmra.mxu0 %vm330_vm0, %v297_v57  ;;  %4090 = vmatmul.mubr.msk.f32.gmra.mxu1 %vm330_vm0, %v715_v56 }
  0xf5   : > { %587 = vmatprep.mubr.f32.mxu0 %v4858_v0  ;;  %1004 = vmatprep.mubr.f32.mxu1 %v4858_v0 }
  0xf6   : > { %1550 = vxpose.xlu1.b32.start [1/4] (short) %v195_v58, 128  ;;  %1133 = vxpose.xlu0.b32.start [1/4] (short) %v187_v59, 128 }
  0xf7   : > { %v732_v60 = vpop.trf.xlu1  ;;  %v314_v61 = vpop.trf.xlu0 }
  0xf8   : > { %4059 = vmatmul.mubr.msk.f32.gmra.mxu0 %vm330_vm0, %v314_v61  ;;  %4091 = vmatmul.mubr.msk.f32.gmra.mxu1 %vm330_vm0, %v732_v60 }
  0xf9   : > { %593 = vmatprep.mubr.f32.mxu0 %v4858_v0  ;;  %1010 = vmatprep.mubr.f32.mxu1 %v4858_v0 }
  0xfa   : > { %1551 = vxpose.xlu1.b32.cont [2/4] (short) %v197_v62, 128  ;;  %1134 = vxpose.xlu0.b32.cont [2/4] (short) %v189_v63, 128 }
  0xfb   : > { %v733_v1 = vpop.trf.xlu1  ;;  %v315_v2 = vpop.trf.xlu0 }
  0xfc   : > { %4060 = vmatmul.mubr.msk.f32.gmra.mxu0 %vm330_vm0, %v315_v2  ;;  %4092 = vmatmul.mubr.msk.f32.gmra.mxu1 %vm330_vm0, %v733_v1 }
  0xfd   : > { %599 = vmatprep.mubr.f32.mxu0 %v4858_v0  ;;  %1016 = vmatprep.mubr.f32.mxu1 %v4858_v0 }
  0xfe   : > { %1552 = vxpose.xlu1.b32.cont [3/4] (short) %v199_v3, 128  ;;  %1135 = vxpose.xlu0.b32.cont [3/4] (short) %v191_v4, 128 }
  0xff   : > { %v734_v5 = vpop.trf.xlu1  ;;  %v316_v6 = vpop.trf.xlu0 }
 0x100   : > { %4061 = vmatmul.mubr.msk.f32.gmra.mxu0 %vm330_vm0, %v316_v6  ;;  %4093 = vmatmul.mubr.msk.f32.gmra.mxu1 %vm330_vm0, %v734_v5 }
 0x101   : > { %605 = vmatprep.mubr.f32.mxu0 %v4858_v0  ;;  %1022 = vmatprep.mubr.f32.mxu1 %v4858_v0 }
 0x102   : > { %1553 = vxpose.xlu1.b32.end [4/4] (short) %v201_v7, 128  ;;  %1136 = vxpose.xlu0.b32.end [4/4] (short) %v193_v8, 128 }
 0x103   : > { %v735_v9 = vpop.trf.xlu1  ;;  %v317_v10 = vpop.trf.xlu0 }
 0x104   : > { %4062 = vmatmul.mubr.msk.f32.gmra.mxu0 %vm330_vm0, %v317_v10  ;;  %4094 = vmatmul.mubr.msk.f32.gmra.mxu1 %vm330_vm0, %v735_v9 }
 0x105   : > { %611 = vmatprep.mubr.f32.mxu0 %v4858_v0  ;;  %1028 = vmatprep.mubr.f32.mxu1 %v4858_v0 }
 0x107   : > { %v736_v11 = vpop.trf.xlu1  ;;  %v318_v12 = vpop.trf.xlu0 }
 0x108   : > { %4063 = vmatmul.mubr.msk.f32.gmra.mxu0 %vm330_vm0, %v318_v12  ;;  %4095 = vmatmul.mubr.msk.f32.gmra.mxu1 %vm330_vm0, %v736_v11 }
 0x109   : > { %617 = vmatprep.mubr.f32.mxu0 %v4858_v0  ;;  %1034 = vmatprep.mubr.f32.mxu1 %v4858_v0 }
 0x10b   : > { %v737_v13 = vpop.trf.xlu1  ;;  %v319_v14 = vpop.trf.xlu0 }
 0x10c   : > { %4064 = vmatmul.mubr.msk.f32.gmra.mxu0 %vm330_vm0, %v319_v14  ;;  %4096 = vmatmul.mubr.msk.f32.gmra.mxu1 %vm330_vm0, %v737_v13 }
 0x10d   : > { %623 = vmatprep.mubr.f32.mxu0 %v4858_v0  ;;  %1040 = vmatprep.mubr.f32.mxu1 %v4858_v0 }
 0x10f   : > { %v738_v15 = vpop.trf.xlu1  ;;  %v320_v16 = vpop.trf.xlu0 }
 0x110   : > { %4065 = vmatmul.mubr.msk.f32.gmra.mxu0 %vm330_vm0, %v320_v16  ;;  %4097 = vmatmul.mubr.msk.f32.gmra.mxu1 %vm330_vm0, %v738_v15 }
 0x111   : > { %629 = vmatprep.mubr.f32.mxu0 %v4858_v0  ;;  %1046 = vmatprep.mubr.f32.mxu1 %v4858_v0 }
 0x113   : > { %v739_v17 = vpop.trf.xlu1  ;;  %v321_v18 = vpop.trf.xlu0 }
 0x114   : > { %4066 = vmatmul.mubr.msk.f32.gmra.mxu0 %vm330_vm0, %v321_v18  ;;  %4098 = vmatmul.mubr.msk.f32.gmra.mxu1 %vm330_vm0, %v739_v17 }
 0x115   : > { %635 = vmatprep.mubr.f32.mxu0 %v4858_v0  ;;  %1052 = vmatprep.mubr.f32.mxu1 %v4858_v0 }
 0x117   : > { %v740_v19 = vpop.trf.xlu1  ;;  %v322_v20 = vpop.trf.xlu0 }
 0x118   : > { %4067 = vmatmul.mubr.msk.f32.gmra.mxu0 %vm330_vm0, %v322_v20  ;;  %4099 = vmatmul.mubr.msk.f32.gmra.mxu1 %vm330_vm0, %v740_v19 }
 0x119   : > { %641 = vmatprep.mubr.f32.mxu0 %v4858_v0  ;;  %1058 = vmatprep.mubr.f32.mxu1 %v4858_v0 }
 0x11b   : > { %v741_v21 = vpop.trf.xlu1  ;;  %v323_v22 = vpop.trf.xlu0 }
 0x11c   : > { %4068 = vmatmul.mubr.msk.f32.gmra.mxu0 %vm330_vm0, %v323_v22  ;;  %4100 = vmatmul.mubr.msk.f32.gmra.mxu1 %vm330_vm0, %v741_v21 }
 0x11d   : > { %647 = vmatprep.mubr.f32.mxu0 %v4858_v0  ;;  %1064 = vmatprep.mubr.f32.mxu1 %v4858_v0 }
 0x11f   : > { %v742_v23 = vpop.trf.xlu1  ;;  %v324_v24 = vpop.trf.xlu0 }
 0x120   : > { %4069 = vmatmul.mubr.msk.f32.gmra.mxu0 %vm330_vm0, %v324_v24  ;;  %4101 = vmatmul.mubr.msk.f32.gmra.mxu1 %vm330_vm0, %v742_v23 }
 0x121   : > { %653 = vmatprep.mubr.f32.mxu0 %v4858_v0  ;;  %1070 = vmatprep.mubr.f32.mxu1 %v4858_v0 }
 0x123   : > { %v743_v25 = vpop.trf.xlu1  ;;  %v325_v26 = vpop.trf.xlu0 }
 0x124   : > { %4070 = vmatmul.mubr.msk.f32.gmra.mxu0 %vm330_vm0, %v325_v26  ;;  %4102 = vmatmul.mubr.msk.f32.gmra.mxu1 %vm330_vm0, %v743_v25 }
 0x125   : > { %659 = vmatprep.mubr.f32.mxu0 %v4858_v0  ;;  %1076 = vmatprep.mubr.f32.mxu1 %v4858_v0 }
 0x127   : > { %v744_v27 = vpop.trf.xlu1  ;;  %v326_v28 = vpop.trf.xlu0 }
 0x128   : > { %4071 = vmatmul.mubr.msk.f32.gmra.mxu0 %vm330_vm0, %v326_v28  ;;  %4103 = vmatmul.mubr.msk.f32.gmra.mxu1 %vm330_vm0, %v744_v27 }
 0x129   : > { %665 = vmatprep.mubr.f32.mxu0 %v4858_v0  ;;  %1082 = vmatprep.mubr.f32.mxu1 %v4858_v0 }
 0x12b   : > { %v745_v29 = vpop.trf.xlu1  ;;  %v327_v30 = vpop.trf.xlu0 }
 0x12c   : > { %4072 = vmatmul.mubr.msk.f32.gmra.mxu0 %vm330_vm0, %v327_v30  ;;  %4104 = vmatmul.mubr.msk.f32.gmra.mxu1 %vm330_vm0, %v745_v29 }
 0x12d   : > { %671 = vmatprep.mubr.f32.mxu0 %v4858_v0  ;;  %1088 = vmatprep.mubr.f32.mxu1 %v4858_v0 }
 0x12f   : > { %v746_v31 = vpop.trf.xlu1  ;;  %v328_v32 = vpop.trf.xlu0 }
 0x130   : > { %4073 = vmatmul.mubr.msk.f32.gmra.mxu0 %vm330_vm0, %v328_v32  ;;  %4105 = vmatmul.mubr.msk.f32.gmra.mxu1 %vm330_vm0, %v746_v31 }
 0x131   : > { %677 = vmatprep.mubr.f32.mxu0 %v4858_v0  ;;  %1094 = vmatprep.mubr.f32.mxu1 %v4858_v0 }
 0x133   : > { %v747_v33 = vpop.trf.xlu1  ;;  %v329_v34 = vpop.trf.xlu0 }
 0x134   : > { %4074 = vmatmul.mubr.msk.f32.gmra.mxu0 %vm330_vm0, %v329_v34  ;;  %4106 = vmatmul.mubr.msk.f32.gmra.mxu1 %vm330_vm0, %v747_v33 }
 0x135   : > { %1325 = vmatprep.mubr.f32.mxu0 %v4858_v0  ;;  %1742 = vmatprep.mubr.f32.mxu1 %v4858_v0 }
 0x137   : > { %v1534_v35 = vpop.trf.xlu1  ;;  %v1117_v36 = vpop.trf.xlu0 }
 0x138   : > { %4107 = vmatmul.mubr.msk.f32.vlgmr.msra.gmra.mxu0 %vm330_vm0, %v1117_v36  ;;  %4139 = vmatmul.mubr.msk.f32.vlgmr.msra.gmra.mxu1 %vm330_vm0, %v1534_v35 }
 0x139   : > { %1331 = vmatprep.mubr.f32.mxu0 %v4858_v0  ;;  %1748 = vmatprep.mubr.f32.mxu1 %v4858_v0 }
 0x13b   : > { %v1535_v37 = vpop.trf.xlu1  ;;  %v1118_v38 = vpop.trf.xlu0 }
 0x13c   : > { %4108 = vmatmul.mubr.msk.f32.gmra.mxu0 %vm330_vm0, %v1118_v38  ;;  %4140 = vmatmul.mubr.msk.f32.gmra.mxu1 %vm330_vm0, %v1535_v37 }
 0x13d   : > { %1337 = vmatprep.mubr.f32.mxu0 %v4858_v0  ;;  %1754 = vmatprep.mubr.f32.mxu1 %v4858_v0 }
 0x13f   : > { %v1536_v39 = vpop.trf.xlu1  ;;  %v1119_v40 = vpop.trf.xlu0 }
 0x140   : > { %4109 = vmatmul.mubr.msk.f32.gmra.mxu0 %vm330_vm0, %v1119_v40  ;;  %4141 = vmatmul.mubr.msk.f32.gmra.mxu1 %vm330_vm0, %v1536_v39 }
 0x141   : > { %1343 = vmatprep.mubr.f32.mxu0 %v4858_v0  ;;  %1760 = vmatprep.mubr.f32.mxu1 %v4858_v0 }
 0x143   : > { %v1537_v41 = vpop.trf.xlu1  ;;  %v1120_v42 = vpop.trf.xlu0 }
 0x144   : > { %4110 = vmatmul.mubr.msk.f32.gmra.mxu0 %vm330_vm0, %v1120_v42  ;;  %4142 = vmatmul.mubr.msk.f32.gmra.mxu1 %vm330_vm0, %v1537_v41 }
 0x145   : > { %1349 = vmatprep.mubr.f32.mxu0 %v4858_v0  ;;  %1766 = vmatprep.mubr.f32.mxu1 %v4858_v0 }
 0x147   : > { %v1538_v43 = vpop.trf.xlu1  ;;  %v1121_v44 = vpop.trf.xlu0 }
 0x148   : > { %4111 = vmatmul.mubr.msk.f32.gmra.mxu0 %vm330_vm0, %v1121_v44  ;;  %4143 = vmatmul.mubr.msk.f32.gmra.mxu1 %vm330_vm0, %v1538_v43 }
 0x149   : > { %1355 = vmatprep.mubr.f32.mxu0 %v4858_v0  ;;  %1772 = vmatprep.mubr.f32.mxu1 %v4858_v0 }
 0x14b   : > { %v1539_v45 = vpop.trf.xlu1  ;;  %v1122_v46 = vpop.trf.xlu0 }
 0x14c   : > { %4112 = vmatmul.mubr.msk.f32.gmra.mxu0 %vm330_vm0, %v1122_v46  ;;  %4144 = vmatmul.mubr.msk.f32.gmra.mxu1 %vm330_vm0, %v1539_v45 }
 0x14d   : > { %1361 = vmatprep.mubr.f32.mxu0 %v4858_v0  ;;  %1778 = vmatprep.mubr.f32.mxu1 %v4858_v0 }
 0x14f   : > { %v1540_v47 = vpop.trf.xlu1  ;;  %v1123_v48 = vpop.trf.xlu0 }
 0x150   : > { %4113 = vmatmul.mubr.msk.f32.gmra.mxu0 %vm330_vm0, %v1123_v48  ;;  %4145 = vmatmul.mubr.msk.f32.gmra.mxu1 %vm330_vm0, %v1540_v47 }
 0x151   : > { %1367 = vmatprep.mubr.f32.mxu0 %v4858_v0  ;;  %1784 = vmatprep.mubr.f32.mxu1 %v4858_v0 }
 0x153   : > { %v1541_v49 = vpop.trf.xlu1  ;;  %v1124_v50 = vpop.trf.xlu0 }
 0x154   : > { %4114 = vmatmul.mubr.msk.f32.gmra.mxu0 %vm330_vm0, %v1124_v50  ;;  %4146 = vmatmul.mubr.msk.f32.gmra.mxu1 %vm330_vm0, %v1541_v49 }
 0x155   : > { %1373 = vmatprep.mubr.f32.mxu0 %v4858_v0  ;;  %1790 = vmatprep.mubr.f32.mxu1 %v4858_v0 }
 0x157   : > { %v1542_v51 = vpop.trf.xlu1  ;;  %v1125_v52 = vpop.trf.xlu0 }
 0x158   : > { %4115 = vmatmul.mubr.msk.f32.gmra.mxu0 %vm330_vm0, %v1125_v52  ;;  %4147 = vmatmul.mubr.msk.f32.gmra.mxu1 %vm330_vm0, %v1542_v51 }
 0x159   : > { %1379 = vmatprep.mubr.f32.mxu0 %v4858_v0  ;;  %1796 = vmatprep.mubr.f32.mxu1 %v4858_v0 }
 0x15b   : > { %v1543_v53 = vpop.trf.xlu1  ;;  %v1126_v54 = vpop.trf.xlu0 }
 0x15c   : > { %4116 = vmatmul.mubr.msk.f32.gmra.mxu0 %vm330_vm0, %v1126_v54  ;;  %4148 = vmatmul.mubr.msk.f32.gmra.mxu1 %vm330_vm0, %v1543_v53 }
 0x15d   : > { %1385 = vmatprep.mubr.f32.mxu0 %v4858_v0  ;;  %1802 = vmatprep.mubr.f32.mxu1 %v4858_v0 }
 0x15f   : > { %v1544_v55 = vpop.trf.xlu1  ;;  %v1127_v56 = vpop.trf.xlu0 }
 0x160   : > { %4117 = vmatmul.mubr.msk.f32.gmra.mxu0 %vm330_vm0, %v1127_v56  ;;  %4149 = vmatmul.mubr.msk.f32.gmra.mxu1 %vm330_vm0, %v1544_v55 }
 0x161   : > { %1391 = vmatprep.mubr.f32.mxu0 %v4858_v0  ;;  %1808 = vmatprep.mubr.f32.mxu1 %v4858_v0 }
 0x163   : > { %v1545_v57 = vpop.trf.xlu1  ;;  %v1128_v58 = vpop.trf.xlu0 }
 0x164   : > { %4118 = vmatmul.mubr.msk.f32.gmra.mxu0 %vm330_vm0, %v1128_v58  ;;  %4150 = vmatmul.mubr.msk.f32.gmra.mxu1 %vm330_vm0, %v1545_v57 }
 0x165   : > { %1397 = vmatprep.mubr.f32.mxu0 %v4858_v0  ;;  %1814 = vmatprep.mubr.f32.mxu1 %v4858_v0 }
 0x167   : > { %v1546_v59 = vpop.trf.xlu1  ;;  %v1129_v60 = vpop.trf.xlu0 }
 0x168   : > { %4119 = vmatmul.mubr.msk.f32.gmra.mxu0 %vm330_vm0, %v1129_v60  ;;  %4151 = vmatmul.mubr.msk.f32.gmra.mxu1 %vm330_vm0, %v1546_v59 }
 0x169   : > { %1403 = vmatprep.mubr.f32.mxu0 %v4858_v0  ;;  %1820 = vmatprep.mubr.f32.mxu1 %v4858_v0 }
 0x16b   : > { %v1547_v61 = vpop.trf.xlu1  ;;  %v1130_v62 = vpop.trf.xlu0 }
 0x16c   : > { %4120 = vmatmul.mubr.msk.f32.gmra.mxu0 %vm330_vm0, %v1130_v62  ;;  %4152 = vmatmul.mubr.msk.f32.gmra.mxu1 %vm330_vm0, %v1547_v61 }
 0x16d   : > { %1409 = vmatprep.mubr.f32.mxu0 %v4858_v0  ;;  %1826 = vmatprep.mubr.f32.mxu1 %v4858_v0 }
 0x16f   : > { %v1548_v63 = vpop.trf.xlu1  ;;  %v1131_v1 = vpop.trf.xlu0 }
 0x170   : > { %4121 = vmatmul.mubr.msk.f32.gmra.mxu0 %vm330_vm0, %v1131_v1  ;;  %4153 = vmatmul.mubr.msk.f32.gmra.mxu1 %vm330_vm0, %v1548_v63 }
 0x171   : > { %1415 = vmatprep.mubr.f32.mxu0 %v4858_v0  ;;  %1832 = vmatprep.mubr.f32.mxu1 %v4858_v0 }
 0x173   : > { %v1549_v2 = vpop.trf.xlu1  ;;  %v1132_v3 = vpop.trf.xlu0 }
 0x174   : > { %4122 = vmatmul.mubr.msk.f32.gmra.mxu0 %vm330_vm0, %v1132_v3  ;;  %4154 = vmatmul.mubr.msk.f32.gmra.mxu1 %vm330_vm0, %v1549_v2 }
 0x175   : > { %1421 = vmatprep.mubr.f32.mxu0 %v4858_v0  ;;  %1838 = vmatprep.mubr.f32.mxu1 %v4858_v0 }
 0x177   : > { %v1566_v4 = vpop.trf.xlu1  ;;  %v1149_v5 = vpop.trf.xlu0 }
 0x178   : > { %v5231_v6 = vpop.f32.mrf.mxu0  ;;  %v5233_v7 = vpop.f32.mrf.mxu1  ;;  %4123 = vmatmul.mubr.msk.f32.gmra.mxu0 %vm330_vm0, %v1149_v5  ;;  %4155 = vmatmul.mubr.msk.f32.gmra.mxu1 %vm330_vm0, %v1566_v4 }
 0x179   : > { %9574 = vst [vmem:[#allocation8_spill] sm:$0xff] %v5231_v6  ;;  %9575 = vst [vmem:[#allocation9_spill] sm:$0xff] %v5233_v7  ;;  %1427 = vmatprep.mubr.f32.mxu0 %v4858_v0  ;;  %1844 = vmatprep.mubr.f32.mxu1 %v4858_v0 }
 0x17a   : > { %v5239_v8 = vpop.f32.mrf.mxu0  ;;  %v5241_v9 = vpop.f32.mrf.mxu1 }
 0x17b   : > { %9576 = vst [vmem:[#allocation10_spill] sm:$0xff] %v5239_v8  ;;  %9577 = vst [vmem:[#allocation11_spill] sm:$0xff] %v5241_v9  ;;  %v1567_v10 = vpop.trf.xlu1  ;;  %v1150_v11 = vpop.trf.xlu0 }
 0x17c   : > { %v5243_v12 = vpop.f32.mrf.mxu0  ;;  %v5245_v13 = vpop.f32.mrf.mxu1  ;;  %4124 = vmatmul.mubr.msk.f32.gmra.mxu0 %vm330_vm0, %v1150_v11  ;;  %4156 = vmatmul.mubr.msk.f32.gmra.mxu1 %vm330_vm0, %v1567_v10 }
 0x17d   : > { %9578 = vst [vmem:[#allocation12_spill] sm:$0xff] %v5243_v12  ;;  %9579 = vst [vmem:[#allocation13_spill] sm:$0xff] %v5245_v13  ;;  %1433 = vmatprep.mubr.f32.mxu0 %v4858_v0  ;;  %1850 = vmatprep.mubr.f32.mxu1 %v4858_v0 }
 0x17e   : > { %v5251_v14 = vpop.f32.mrf.mxu0  ;;  %v5253_v15 = vpop.f32.mrf.mxu1 }
 0x17f   : > { %9580 = vst [vmem:[#allocation14_spill] sm:$0xff] %v5251_v14  ;;  %9581 = vst [vmem:[#allocation15_spill] sm:$0xff] %v5253_v15  ;;  %v1568_v16 = vpop.trf.xlu1  ;;  %v1151_v17 = vpop.trf.xlu0 }
 0x180   : > { %v5255_v18 = vpop.f32.mrf.mxu0  ;;  %v5257_v19 = vpop.f32.mrf.mxu1  ;;  %4125 = vmatmul.mubr.msk.f32.gmra.mxu0 %vm330_vm0, %v1151_v17  ;;  %4157 = vmatmul.mubr.msk.f32.gmra.mxu1 %vm330_vm0, %v1568_v16 }
 0x181   : > { %9582 = vst [vmem:[#allocation16_spill] sm:$0xff] %v5255_v18  ;;  %9583 = vst [vmem:[#allocation17_spill] sm:$0xff] %v5257_v19  ;;  %1439 = vmatprep.mubr.f32.mxu0 %v4858_v0  ;;  %1856 = vmatprep.mubr.f32.mxu1 %v4858_v0 }
 0x182   : > { %v5263_v20 = vpop.f32.mrf.mxu0  ;;  %v5265_v21 = vpop.f32.mrf.mxu1 }
 0x183   : > { %9584 = vst [vmem:[#allocation18_spill] sm:$0xff] %v5263_v20  ;;  %9585 = vst [vmem:[#allocation19_spill] sm:$0xff] %v5265_v21  ;;  %v1569_v22 = vpop.trf.xlu1  ;;  %v1152_v23 = vpop.trf.xlu0 }
 0x184   : > { %v5267_v24 = vpop.f32.mrf.mxu0  ;;  %v5269_v25 = vpop.f32.mrf.mxu1  ;;  %4126 = vmatmul.mubr.msk.f32.gmra.mxu0 %vm330_vm0, %v1152_v23  ;;  %4158 = vmatmul.mubr.msk.f32.gmra.mxu1 %vm330_vm0, %v1569_v22 }
 0x185   : > { %9586 = vst [vmem:[#allocation20_spill] sm:$0xff] %v5269_v25  ;;  %1445 = vmatprep.mubr.f32.mxu0 %v4858_v0  ;;  %1862 = vmatprep.mubr.f32.mxu1 %v4858_v0 }
 0x186   : > { %v5275_v26 = vpop.f32.mrf.mxu0  ;;  %v5277_v27 = vpop.f32.mrf.mxu1 }
 0x187   : > { %9587 = vst [vmem:[#allocation21_spill] sm:$0xff] %v5275_v26  ;;  %9588 = vst [vmem:[#allocation22_spill] sm:$0xff] %v5277_v27  ;;  %v1570_v28 = vpop.trf.xlu1  ;;  %v1153_v29 = vpop.trf.xlu0 }
 0x188   : > { %v5279_v30 = vpop.f32.mrf.mxu0  ;;  %v5281_v31 = vpop.f32.mrf.mxu1  ;;  %4127 = vmatmul.mubr.msk.f32.gmra.mxu0 %vm330_vm0, %v1153_v29  ;;  %4159 = vmatmul.mubr.msk.f32.gmra.mxu1 %vm330_vm0, %v1570_v28 }
 0x189   : > { %1451 = vmatprep.mubr.f32.mxu0 %v4858_v0  ;;  %1868 = vmatprep.mubr.f32.mxu1 %v4858_v0 }
 0x18a   : > { %v5287_v32 = vpop.f32.mrf.mxu0  ;;  %v5289_v33 = vpop.f32.mrf.mxu1 }
 0x18b   : > { %9589 = vst [vmem:[#allocation23_spill] sm:$0xff] %v5287_v32  ;;  %9590 = vst [vmem:[#allocation24_spill] sm:$0xff] %v5289_v33  ;;  %v1571_v34 = vpop.trf.xlu1  ;;  %v1154_v35 = vpop.trf.xlu0 }
 0x18c   : > { %v5291_v36 = vpop.f32.mrf.mxu0  ;;  %v5293_v37 = vpop.f32.mrf.mxu1  ;;  %4128 = vmatmul.mubr.msk.f32.gmra.mxu0 %vm330_vm0, %v1154_v35  ;;  %4160 = vmatmul.mubr.msk.f32.gmra.mxu1 %vm330_vm0, %v1571_v34 }
 0x18d   : > { %9591 = vst [vmem:[#allocation25_spill] sm:$0xff] %v5293_v37  ;;  %1457 = vmatprep.mubr.f32.mxu0 %v4858_v0  ;;  %1874 = vmatprep.mubr.f32.mxu1 %v4858_v0 }
 0x18e   : > { %v5299_v38 = vpop.f32.mrf.mxu0  ;;  %v5301_v39 = vpop.f32.mrf.mxu1 }
 0x18f   : > { %9592 = vst [vmem:[#allocation26_spill] sm:$0xff] %v5299_v38  ;;  %9593 = vst [vmem:[#allocation27_spill] sm:$0xff] %v5301_v39  ;;  %v1572_v40 = vpop.trf.xlu1  ;;  %v1155_v41 = vpop.trf.xlu0 }
 0x190   : > { %v5303_v42 = vpop.f32.mrf.mxu0  ;;  %v5305_v43 = vpop.f32.mrf.mxu1  ;;  %4129 = vmatmul.mubr.msk.f32.gmra.mxu0 %vm330_vm0, %v1155_v41  ;;  %4161 = vmatmul.mubr.msk.f32.gmra.mxu1 %vm330_vm0, %v1572_v40 }
 0x191   : > { %9594 = vst [vmem:[#allocation28_spill] sm:$0xff] %v5305_v43  ;;  %1463 = vmatprep.mubr.f32.mxu0 %v4858_v0  ;;  %1880 = vmatprep.mubr.f32.mxu1 %v4858_v0 }
 0x192   : > { %v5311_v44 = vpop.f32.mrf.mxu0  ;;  %v5313_v45 = vpop.f32.mrf.mxu1 }
 0x193   : > { %9595 = vst [vmem:[#allocation29_spill] sm:$0xff] %v5311_v44  ;;  %9596 = vst [vmem:[#allocation30_spill] sm:$0xff] %v5313_v45  ;;  %v1573_v46 = vpop.trf.xlu1  ;;  %v1156_v47 = vpop.trf.xlu0 }
 0x194   : > { %v5315_v48 = vpop.f32.mrf.mxu0  ;;  %v5317_v49 = vpop.f32.mrf.mxu1  ;;  %4130 = vmatmul.mubr.msk.f32.gmra.mxu0 %vm330_vm0, %v1156_v47  ;;  %4162 = vmatmul.mubr.msk.f32.gmra.mxu1 %vm330_vm0, %v1573_v46 }
 0x195   : > { %9597 = vst [vmem:[#allocation31_spill] sm:$0xff] %v5317_v49  ;;  %1469 = vmatprep.mubr.f32.mxu0 %v4858_v0  ;;  %1886 = vmatprep.mubr.f32.mxu1 %v4858_v0 }
 0x196   : > { %v5323_v50 = vpop.f32.mrf.mxu0  ;;  %v5325_v51 = vpop.f32.mrf.mxu1 }
 0x197   : > { %9598 = vst [vmem:[#allocation32_spill] sm:$0xff] %v5323_v50  ;;  %9599 = vst [vmem:[#allocation33_spill] sm:$0xff] %v5325_v51  ;;  %v1574_v52 = vpop.trf.xlu1  ;;  %v1157_v53 = vpop.trf.xlu0 }
 0x198   : > { %v5327_v54 = vpop.f32.mrf.mxu0  ;;  %v5329_v55 = vpop.f32.mrf.mxu1  ;;  %4131 = vmatmul.mubr.msk.f32.gmra.mxu0 %vm330_vm0, %v1157_v53  ;;  %4163 = vmatmul.mubr.msk.f32.gmra.mxu1 %vm330_vm0, %v1574_v52 }
 0x199   : > { %9600 = vst [vmem:[#allocation34_spill] sm:$0xff] %v5329_v55  ;;  %1475 = vmatprep.mubr.f32.mxu0 %v4858_v0  ;;  %1892 = vmatprep.mubr.f32.mxu1 %v4858_v0 }
 0x19a   : > { %v5335_v56 = vpop.f32.mrf.mxu0  ;;  %v5337_v57 = vpop.f32.mrf.mxu1 }
 0x19b   : > { %9601 = vst [vmem:[#allocation35_spill] sm:$0xff] %v5335_v56  ;;  %9602 = vst [vmem:[#allocation36_spill] sm:$0xff] %v5337_v57  ;;  %v1575_v58 = vpop.trf.xlu1  ;;  %v1158_v59 = vpop.trf.xlu0 }
 0x19c   : > { %v5339_v60 = vpop.f32.mrf.mxu0  ;;  %v5341_v61 = vpop.f32.mrf.mxu1  ;;  %4132 = vmatmul.mubr.msk.f32.gmra.mxu0 %vm330_vm0, %v1158_v59  ;;  %4164 = vmatmul.mubr.msk.f32.gmra.mxu1 %vm330_vm0, %v1575_v58 }
 0x19d   : > { %9603 = vst [vmem:[#allocation37_spill] sm:$0xff] %v5341_v61  ;;  %1481 = vmatprep.mubr.f32.mxu0 %v4858_v0  ;;  %1898 = vmatprep.mubr.f32.mxu1 %v4858_v0 }
 0x19e   : > { %v5347_v62 = vpop.f32.mrf.mxu0  ;;  %v5349_v63 = vpop.f32.mrf.mxu1 }
 0x19f   : > { %9604 = vst [vmem:[#allocation38_spill] sm:$0xff] %v5347_v62  ;;  %9605 = vst [vmem:[#allocation39_spill] sm:$0xff] %v5349_v63  ;;  %v1576_v1 = vpop.trf.xlu1  ;;  %v1159_v2 = vpop.trf.xlu0 }
 0x1a0   : > { %v5351_v3 = vpop.f32.mrf.mxu0  ;;  %v5353_v4 = vpop.f32.mrf.mxu1  ;;  %4133 = vmatmul.mubr.msk.f32.gmra.mxu0 %vm330_vm0, %v1159_v2  ;;  %4165 = vmatmul.mubr.msk.f32.gmra.mxu1 %vm330_vm0, %v1576_v1 }
 0x1a1   : > { %9606 = vst [vmem:[#allocation40_spill] sm:$0xff] %v5353_v4  ;;  %1487 = vmatprep.mubr.f32.mxu0 %v4858_v0  ;;  %1904 = vmatprep.mubr.f32.mxu1 %v4858_v0 }
 0x1a2   : > { %v5359_v5 = vpop.f32.mrf.mxu0  ;;  %v5361_v10 = vpop.f32.mrf.mxu1 }
 0x1a3   : > { %9607 = vst [vmem:[#allocation41_spill] sm:$0xff] %v5359_v5  ;;  %9608 = vst [vmem:[#allocation42_spill] sm:$0xff] %v5361_v10  ;;  %v1577_v11 = vpop.trf.xlu1  ;;  %v1160_v16 = vpop.trf.xlu0 }
 0x1a4   : > { %v5363_v17 = vpop.f32.mrf.mxu0  ;;  %v5365_v22 = vpop.f32.mrf.mxu1  ;;  %4134 = vmatmul.mubr.msk.f32.gmra.mxu0 %vm330_vm0, %v1160_v16  ;;  %4166 = vmatmul.mubr.msk.f32.gmra.mxu1 %vm330_vm0, %v1577_v11 }
 0x1a5   : > { %9609 = vst [vmem:[#allocation43_spill] sm:$0xff] %v5365_v22  ;;  %1493 = vmatprep.mubr.f32.mxu0 %v4858_v0  ;;  %1910 = vmatprep.mubr.f32.mxu1 %v4858_v0 }
 0x1a6   : > { %v5371_v23 = vpop.f32.mrf.mxu0  ;;  %v5373_v28 = vpop.f32.mrf.mxu1 }
 0x1a7   : > { %9610 = vst [vmem:[#allocation44_spill] sm:$0xff] %v5371_v23  ;;  %9611 = vst [vmem:[#allocation45_spill] sm:$0xff] %v5373_v28  ;;  %v1578_v29 = vpop.trf.xlu1  ;;  %v1161_v34 = vpop.trf.xlu0 }
 0x1a8   : > { %v5375_v35 = vpop.f32.mrf.mxu0  ;;  %v5377_v40 = vpop.f32.mrf.mxu1  ;;  %4135 = vmatmul.mubr.msk.f32.gmra.mxu0 %vm330_vm0, %v1161_v34  ;;  %4167 = vmatmul.mubr.msk.f32.gmra.mxu1 %vm330_vm0, %v1578_v29 }
 0x1a9   : > { %9612 = vst [vmem:[#allocation46_spill] sm:$0xff] %v5377_v40  ;;  %1499 = vmatprep.mubr.f32.mxu0 %v4858_v0  ;;  %1916 = vmatprep.mubr.f32.mxu1 %v4858_v0 }
 0x1aa   : > { %v5383_v41 = vpop.f32.mrf.mxu0  ;;  %v5385_v46 = vpop.f32.mrf.mxu1 }
 0x1ab   : > { %9613 = vst [vmem:[#allocation47_spill] sm:$0xff] %v5383_v41  ;;  %9614 = vst [vmem:[#allocation48_spill] sm:$0xff] %v5385_v46  ;;  %v1579_v47 = vpop.trf.xlu1  ;;  %v1162_v52 = vpop.trf.xlu0 }
 0x1ac   : > { %v5387_v53 = vpop.f32.mrf.mxu0  ;;  %v5389_v58 = vpop.f32.mrf.mxu1  ;;  %4136 = vmatmul.mubr.msk.f32.gmra.mxu0 %vm330_vm0, %v1162_v52  ;;  %4168 = vmatmul.mubr.msk.f32.gmra.mxu1 %vm330_vm0, %v1579_v47 }
 0x1ad   : > { %9615 = vst [vmem:[#allocation49_spill] sm:$0xff] %v5389_v58  ;;  %1505 = vmatprep.mubr.f32.mxu0 %v4858_v0  ;;  %1922 = vmatprep.mubr.f32.mxu1 %v4858_v0 }
 0x1ae   : > { %v5395_v59 = vpop.f32.mrf.mxu0  ;;  %v5397_v1 = vpop.f32.mrf.mxu1 }
 0x1af   : > { %9616 = vst [vmem:[#allocation50_spill] sm:$0xff] %v5395_v59  ;;  %9617 = vst [vmem:[#allocation51_spill] sm:$0xff] %v5397_v1  ;;  %v1580_v2 = vpop.trf.xlu1  ;;  %v1163_v11 = vpop.trf.xlu0 }
 0x1b0   : > { %v5399_v16 = vpop.f32.mrf.mxu0  ;;  %v5401_v29 = vpop.f32.mrf.mxu1  ;;  %4137 = vmatmul.mubr.msk.f32.gmra.mxu0 %vm330_vm0, %v1163_v11  ;;  %4169 = vmatmul.mubr.msk.f32.gmra.mxu1 %vm330_vm0, %v1580_v2 }
 0x1b1   : > { %9618 = vst [vmem:[#allocation52_spill] sm:$0xff] %v5401_v29  ;;  %1511 = vmatprep.mubr.f32.mxu0 %v4858_v0  ;;  %1928 = vmatprep.mubr.f32.mxu1 %v4858_v0 }
 0x1b2   : > { %v5407_v34 = vpop.f32.mrf.mxu0  ;;  %v5409_v47 = vpop.f32.mrf.mxu1 }
 0x1b3   : > { %9619 = vst [vmem:[#allocation53_spill] sm:$0xff] %v5407_v34  ;;  %9620 = vst [vmem:[#allocation54_spill] sm:$0xff] %v5409_v47  ;;  %v1581_v52 = vpop.trf.xlu1  ;;  %v1164_v1 = vpop.trf.xlu0  ;;  %v1935_v47 = vmax.f32 %v5231_v6, %v5243_v12  ;;  %v2009_v34 = vmax.f32 %v5233_v7, %v5245_v13  ;;  %v2046_v12 = vmax.f32 %v5241_v9, %v5253_v15 }
 0x1b4   : > { %v5411_v59 = vpop.f32.mrf.mxu0  ;;  %v5413_v46 = vpop.f32.mrf.mxu1  ;;  %4138 = vmatmul.mubr.msk.f32.gmra.mxu0 %vm330_vm0, %v1164_v1  ;;  %4170 = vmatmul.mubr.msk.f32.gmra.mxu1 %vm330_vm0, %v1581_v52 }
 0x1b5   : > { %9621 = vst [vmem:[#allocation55_spill] sm:$0xff] %v5411_v59  ;;  %9622 = vst [vmem:[#allocation56_spill] sm:$0xff] %v5413_v46  ;;  %v1936_v1 = vmax.f32 %v1935_v47, %v5255_v18  ;;  %v2010_v52 = vmax.f32 %v2009_v34, %v5257_v19  ;;  %v2047_v47 = vmax.f32 %v2046_v12, %v5265_v21 }
 0x1b6   : > { %v5417_v11 = vpop.f32.mrf.mxu0  ;;  %v5419_v2 = vpop.f32.mrf.mxu1 }
 0x1b7   : > { %9623 = vst [vmem:[#allocation57_spill] sm:$0xff] %v5417_v11  ;;  %9624 = vst [vmem:[#allocation58_spill] sm:$0xff] %v5419_v2  ;;  %v1937_v13 = vmax.f32 %v1936_v1, %v5267_v24  ;;  %v2011_v7 = vmax.f32 %v2010_v52, %v5269_v25  ;;  %v2048_v52 = vmax.f32 %v2047_v47, %v5277_v27 }
 0x1b8   : > { %v5421_v29 = vpop.f32.mrf.mxu0  ;;  %v5423_v0 = vpop.f32.mrf.mxu1 }
 0x1b9   : > { %9625 = vst [vmem:[#allocation59_spill] sm:$0xff] %v5423_v0  ;;  %v1972_v0 = vmax.f32 %v5239_v8, %v5251_v14  ;;  %v1938_v19 = vmax.f32 %v1937_v13, %v5279_v30  ;;  %v2012_v18 = vmax.f32 %v2011_v7, %v5281_v31  ;;  %v2049_v7 = vmax.f32 %v2048_v52, %v5289_v33 }
 0x1ba   : > { %v5429_v59 = vpop.f32.mrf.mxu0  ;;  %v5431_v46 = vpop.f32.mrf.mxu1 }
 0x1bb   : > { %9626 = vst [vmem:[#allocation60_spill] sm:$0xff] %v5429_v59  ;;  %9627 = vst [vmem:[#allocation61_spill] sm:$0xff] %v5431_v46  ;;  %v1973_v34 = vmax.f32 %v1972_v0, %v5263_v20  ;;  %v1939_v15 = vmax.f32 %v1938_v19, %v5291_v36  ;;  %v2013_v9 = vmax.f32 %v2012_v18, %v5293_v37 }
 0x1bc   : > { %v5435_v11 = vpop.f32.mrf.mxu0  ;;  %v5437_v2 = vpop.f32.mrf.mxu1  ;;  %v2050_v18 = vmax.f32 %v2049_v7, %v5301_v39 }
 0x1bd   : > { %v1974_v1 = vmax.f32 %v1973_v34, %v5275_v26  ;;  %v1940_v13 = vmax.f32 %v1939_v15, %v5303_v42  ;;  %v2014_v21 = vmax.f32 %v2013_v9, %v5305_v43 }
 0x1be   : > { %v5445_v6 = vpop.f32.mrf.mxu0  ;;  %v5447_v46 = vpop.f32.mrf.mxu1  ;;  %v2051_v9 = vmax.f32 %v2050_v18, %v5313_v45 }
 0x1bf   : > { %9628 = vst [vmem:[#allocation62_spill] sm:$0xff] %v5445_v6  ;;  %9629 = vst [vmem:[#allocation63_spill] sm:$0xff] %v5447_v46  ;;  %v1975_v12 = vmax.f32 %v1974_v1, %v5287_v32  ;;  %v1941_v47 = vmax.f32 %v1940_v13, %v5315_v48  ;;  %v2015_v27 = vmax.f32 %v2014_v21, %v5317_v49 }
 0x1c0   : > { %v5453_v14 = vpop.f32.mrf.mxu0  ;;  %v5455_v8 = vpop.f32.mrf.mxu1  ;;  %v2052_v21 = vmax.f32 %v2051_v9, %v5325_v51 }
 0x1c1   : > { %v1976_v19 = vmax.f32 %v1975_v12, %v5299_v38  ;;  %v1942_v52 = vmax.f32 %v1941_v47, %v5327_v54  ;;  %v2016_v33 = vmax.f32 %v2015_v27, %v5329_v55 }
 0x1c2   : > { %v5461_v25 = vpop.f32.mrf.mxu0  ;;  %v5463_v0 = vpop.f32.mrf.mxu1  ;;  %v2053_v27 = vmax.f32 %v2052_v21, %v5337_v57 }
 0x1c3   : > { %9630 = vst [vmem:[#allocation64_spill] sm:$0xff] %v5461_v25  ;;  %9631 = vst [vmem:[#allocation65_spill] sm:$0xff] %v5463_v0  ;;  %v1977_v15 = vmax.f32 %v1976_v19, %v5311_v44  ;;  %v1943_v13 = vmax.f32 %v1942_v52, %v5339_v60  ;;  %v2017_v39 = vmax.f32 %v2016_v33, %v5341_v61 }
 0x1c4   : > { %v5469_v20 = vpop.f32.mrf.mxu0  ;;  %v5471_v34 = vpop.f32.mrf.mxu1  ;;  %v2054_v33 = vmax.f32 %v2053_v27, %v5349_v63 }
 0x1c5   : > { %v1978_v7 = vmax.f32 %v1977_v15, %v5323_v50  ;;  %v1944_v47 = vmax.f32 %v1943_v13, %v5351_v3  ;;  %v2018_v45 = vmax.f32 %v2017_v39, %v5353_v4  ;;  %v9645_v4 = vld [vmem:[#allocation56_spill] sm:$0xff] }
 0x1c6   : > { %v5477_v26 = vpop.f32.mrf.mxu0  ;;  %v5479_v1 = vpop.f32.mrf.mxu1  ;;  %v2055_v39 = vmax.f32 %v2054_v33, %v5361_v10 }
 0x1c7   : > { %9632 = vst [vmem:[#allocation66_spill] sm:$0xff] %v5477_v26  ;;  %9633 = vst [vmem:[#allocation67_spill] sm:$0xff] %v5479_v1  ;;  %v1979_v18 = vmax.f32 %v1978_v7, %v5335_v56  ;;  %v1945_v52 = vmax.f32 %v1944_v47, %v5363_v17  ;;  %v2019_v51 = vmax.f32 %v2018_v45, %v5365_v22 }
 0x1c8   : > { %v5485_v32 = vpop.f32.mrf.mxu0  ;;  %v5487_v12 = vpop.f32.mrf.mxu1  ;;  %v2056_v45 = vmax.f32 %v2055_v39, %v5373_v28  ;;  %v9642_v39 = vld [vmem:[#allocation50_spill] sm:$0xff]  ;;  %v9643_v28 = vld [vmem:[#allocation51_spill] sm:$0xff] }
 0x1c9   : > { %v1980_v9 = vmax.f32 %v1979_v18, %v5347_v62  ;;  %v1946_v13 = vmax.f32 %v1945_v52, %v5375_v35  ;;  %v2020_v57 = vmax.f32 %v2019_v51, %v5377_v40  ;;  %v9640_v52 = vld [vmem:[#allocation48_spill] sm:$0xff] }
 0x1ca   : > { %v5493_v38 = vpop.f32.mrf.mxu0  ;;  %v5495_v19 = vpop.f32.mrf.mxu1  ;;  %v2057_v51 = vmax.f32 %v2056_v45, %v9640_v52  ;;  %v9648_v45 = vld [vmem:[#allocation53_spill] sm:$0xff]  ;;  %v9649_v52 = vld [vmem:[#allocation54_spill] sm:$0xff] }
 0x1cb   : > { %9634 = vst [vmem:[#allocation68_spill] sm:$0xff] %v5493_v38  ;;  %9635 = vst [vmem:[#allocation69_spill] sm:$0xff] %v5495_v19  ;;  %v1981_v21 = vmax.f32 %v1980_v9, %v5359_v5  ;;  %v1947_v47 = vmax.f32 %v1946_v13, %v5387_v53  ;;  %v2021_v63 = vmax.f32 %v2020_v57, %v5389_v58  ;;  %v9641_v5 = vld [vmem:[#allocation52_spill] sm:$0xff] }
 0x1cc   : > { %v5501_v44 = vpop.f32.mrf.mxu0  ;;  %v5503_v15 = vpop.f32.mrf.mxu1  ;;  %v2058_v57 = vmax.f32 %v2057_v51, %v9643_v28  ;;  %v9651_v51 = vld [vmem:[#allocation57_spill] sm:$0xff]  ;;  %v9652_v28 = vld [vmem:[#allocation58_spill] sm:$0xff] }
 0x1cd   : > { %v1982_v27 = vmax.f32 %v1981_v21, %v5371_v23  ;;  %v1948_v10 = vmax.f32 %v1947_v47, %v5399_v16  ;;  %v2022_v40 = vmax.f32 %v2021_v63, %v9641_v5  ;;  %v9644_v23 = vld [vmem:[#allocation55_spill] sm:$0xff] }
 0x1ce   : > { %v5509_v50 = vpop.f32.mrf.mxu0  ;;  %v5511_v7 = vpop.f32.mrf.mxu1  ;;  %v2059_v63 = vmax.f32 %v2058_v57, %v9649_v52  ;;  %v9650_v5 = vld [vmem:[#allocation59_spill] sm:$0xff]  ;;  %v9655_v57 = vld [vmem:[#allocation61_spill] sm:$0xff] }
 0x1cf   : > { %9636 = vst [vmem:[#allocation70_spill] sm:$0xff] %v5509_v50  ;;  %9637 = vst [vmem:[#allocation71_spill] sm:$0xff] %v5511_v7  ;;  %v1983_v33 = vmax.f32 %v1982_v27, %v5383_v41  ;;  %v1949_v58 = vmax.f32 %v1948_v10, %v9644_v23  ;;  %v2023_v61 = vmax.f32 %v2022_v40, %v9645_v4 }
 0x1d0   : > { %v5517_v56 = vpop.f32.mrf.mxu0  ;;  %v5519_v18 = vpop.f32.mrf.mxu1  ;;  %v2060_v40 = vmax.f32 %v2059_v63, %v9652_v28 }
 0x1d1   : > { %v1984_v13 = vmax.f32 %v1983_v33, %v9642_v39  ;;  %v1950_v41 = vmax.f32 %v1949_v58, %v5421_v29  ;;  %v2024_v49 = vmax.f32 %v2023_v61, %v9650_v5 }
 0x1d2   : > { %v5525_v62 = vpop.f32.mrf.mxu0  ;;  %v5527_v9 = vpop.f32.mrf.mxu1  ;;  %v2061_v61 = vmax.f32 %v2060_v40, %v9655_v57 }
 0x1d3   : > { %9638 = vst [vmem:[#allocation72_spill] sm:$0xff] %v5525_v62  ;;  %9639 = vst [vmem:[#allocation73_spill] sm:$0xff] %v5527_v9  ;;  %v1985_v47 = vmax.f32 %v1984_v13, %v9648_v45  ;;  %v1951_v39 = vmax.f32 %v1950_v41, %v5435_v11  ;;  %v2025_v4 = vmax.f32 %v2024_v49, %v5437_v2 }
 0x1d4   : > { %v5533_v22 = vpop.f32.mrf.mxu0  ;;  %v5535_v21 = vpop.f32.mrf.mxu1  ;;  %v2062_v49 = vmax.f32 %v2061_v61, %v5447_v46 }
 0x1d5   : > { %v1986_v10 = vmax.f32 %v1985_v47, %v9651_v51  ;;  %v1952_v52 = vmax.f32 %v1951_v39, %v5453_v14  ;;  %v2026_v45 = vmax.f32 %v2025_v4, %v5455_v8 }
 0x1d6   : > { %v5541_v55 = vpop.f32.mrf.mxu0  ;;  %v5543_v27 = vpop.f32.mrf.mxu1  ;;  %v2063_v4 = vmax.f32 %v2062_v49, %v5463_v0 }
 0x1d7   : > { %9646 = vst [vmem:[#allocation55_spill] sm:$0xff] %v5541_v55  ;;  %9647 = vst [vmem:[#allocation74_spill] sm:$0xff] %v5543_v27  ;;  %v1987_v58 = vmax.f32 %v1986_v10, %v5429_v59  ;;  %v1953_v63 = vmax.f32 %v1952_v52, %v5469_v20  ;;  %v2027_v28 = vmax.f32 %v2026_v45, %v5471_v34 }
 0x1d8   : > { %v5549_v43 = vpop.f32.mrf.mxu0  ;;  %v5551_v33 = vpop.f32.mrf.mxu1  ;;  %v2064_v45 = vmax.f32 %v2063_v4, %v5479_v1 }
 0x1d9   : > { %v1988_v41 = vmax.f32 %v1987_v58, %v5445_v6  ;;  %v1954_v40 = vmax.f32 %v1953_v63, %v5485_v32  ;;  %v2028_v57 = vmax.f32 %v2027_v28, %v5487_v12 }
 0x1da   : > { %v5557_v37 = vpop.f32.mrf.mxu0  ;;  %v5559_v13 = vpop.f32.mrf.mxu1  ;;  %v2065_v28 = vmax.f32 %v2064_v45, %v5495_v19 }
 0x1db   : > { %9653 = vst [vmem:[#allocation75_spill] sm:$0xff] %v5557_v37  ;;  %9654 = vst [vmem:[#allocation76_spill] sm:$0xff] %v5559_v13  ;;  %v1989_v39 = vmax.f32 %v1988_v41, %v5461_v25  ;;  %v1955_v61 = vmax.f32 %v1954_v40, %v5501_v44  ;;  %v2029_v46 = vmax.f32 %v2028_v57, %v5503_v15 }
 0x1dc   : > { %v5565_v5 = vpop.f32.mrf.mxu0  ;;  %v5567_v47 = vpop.f32.mrf.mxu1  ;;  %v2066_v57 = vmax.f32 %v2065_v28, %v5511_v7 }
 0x1dd   : > { %v1990_v52 = vmax.f32 %v1989_v39, %v5477_v26  ;;  %v1956_v63 = vmax.f32 %v1955_v61, %v5517_v56  ;;  %v2030_v0 = vmax.f32 %v2029_v46, %v5519_v18 }
 0x1de   : > { %v5573_v51 = vpop.f32.mrf.mxu0  ;;  %v5575_v10 = vpop.f32.mrf.mxu1  ;;  %v2067_v46 = vmax.f32 %v2066_v57, %v5527_v9 }
 0x1df   : > { %9656 = vst [vmem:[#allocation77_spill] sm:$0xff] %v5573_v51  ;;  %9657 = vst [vmem:[#allocation78_spill] sm:$0xff] %v5575_v10  ;;  %v1991_v49 = vmax.f32 %v1990_v52, %v5493_v38  ;;  %v1957_v40 = vmax.f32 %v1956_v63, %v5533_v22  ;;  %v2031_v1 = vmax.f32 %v2030_v0, %v5535_v21 }
 0x1e0   : > { %v5581_v59 = vpop.f32.mrf.mxu0  ;;  %v5583_v58 = vpop.f32.mrf.mxu1  ;;  %v2068_v0 = vmax.f32 %v2067_v46, %v5543_v27 }
 0x1e1   : > { %v1992_v4 = vmax.f32 %v1991_v49, %v5509_v50  ;;  %v1958_v61 = vmax.f32 %v1957_v40, %v5549_v43  ;;  %v2032_v19 = vmax.f32 %v2031_v1, %v5551_v33 }
 0x1e2   : > { %v5589_v6 = vpop.f32.mrf.mxu0  ;;  %v5591_v41 = vpop.f32.mrf.mxu1  ;;  %v2069_v1 = vmax.f32 %v2068_v0, %v5559_v13 }
 0x1e3   : > { %9658 = vst [vmem:[#allocation79_spill] sm:$0xff] %v5589_v6  ;;  %9659 = vst [vmem:[#allocation80_spill] sm:$0xff] %v5591_v41  ;;  %v1993_v45 = vmax.f32 %v1992_v4, %v5525_v62  ;;  %v1959_v63 = vmax.f32 %v1958_v61, %v5565_v5  ;;  %v2033_v7 = vmax.f32 %v2032_v19, %v5567_v47 }
 0x1e4   : > { %v5597_v25 = vpop.f32.mrf.mxu0  ;;  %v5599_v39 = vpop.f32.mrf.mxu1  ;;  %v2070_v19 = vmax.f32 %v2069_v1, %v5575_v10 }
 0x1e5   : > { %9660 = vst [vmem:[#allocation81_spill] sm:$0xff] %v5599_v39  ;;  %v1994_v28 = vmax.f32 %v1993_v45, %v5541_v55  ;;  %v1960_v40 = vmax.f32 %v1959_v63, %v5581_v59  ;;  %v2034_v9 = vmax.f32 %v2033_v7, %v5583_v58 }
 0x1e6   : > { %v5605_v26 = vpop.f32.mrf.mxu0  ;;  %v5607_v52 = vpop.f32.mrf.mxu1  ;;  %v2071_v7 = vmax.f32 %v2070_v19, %v5591_v41 }
 0x1e7   : > { %9661 = vst [vmem:[#allocation82_spill] sm:$0xff] %v5605_v26  ;;  %9662 = vst [vmem:[#allocation83_spill] sm:$0xff] %v5607_v52  ;;  %v1995_v57 = vmax.f32 %v1994_v28, %v5557_v37  ;;  %v1961_v61 = vmax.f32 %v1960_v40, %v5597_v25  ;;  %v2035_v27 = vmax.f32 %v2034_v9, %v5599_v39 }
 0x1e8   : > { %v5613_v38 = vpop.f32.mrf.mxu0  ;;  %v5615_v49 = vpop.f32.mrf.mxu1  ;;  %v2072_v9 = vmax.f32 %v2071_v7, %v5607_v52 }
 0x1e9   : > { %9663 = vst [vmem:[#allocation84_spill] sm:$0xff] %v5615_v49  ;;  %v1996_v46 = vmax.f32 %v1995_v57, %v5573_v51  ;;  %v1962_v63 = vmax.f32 %v1961_v61, %v5613_v38  ;;  %v2036_v13 = vmax.f32 %v2035_v27, %v5615_v49 }
 0x1ea   : > { %v5621_v50 = vpop.f32.mrf.mxu0  ;;  %v5623_v4 = vpop.f32.mrf.mxu1 }
 0x1eb   : > { %9664 = vst [vmem:[#allocation85_spill] sm:$0xff] %v5621_v50  ;;  %9665 = vst [vmem:[#allocation86_spill] sm:$0xff] %v5623_v4  ;;  %v1997_v0 = vmax.f32 %v1996_v46, %v5589_v6  ;;  %v2073_v27 = vmax.f32 %v2072_v9, %v5623_v4 }
 0x1ec   : > { %v5629_v62 = vpop.f32.mrf.mxu0  ;;  %v5631_v45 = vpop.f32.mrf.mxu1 }
 0x1ed   : > { %9666 = vst [vmem:[#allocation87_spill] sm:$0xff] %v5631_v45  ;;  %v1998_v1 = vmax.f32 %v1997_v0, %v5605_v26  ;;  %v1963_v40 = vmax.f32 %v1962_v63, %v5629_v62  ;;  %v2037_v10 = vmax.f32 %v2036_v13, %v5631_v45 }
 0x1ee   : > { %v5637_v55 = vpop.f32.mrf.mxu0  ;;  %v5639_v28 = vpop.f32.mrf.mxu1 }
 0x1ef   : > { %9667 = vst [vmem:[#allocation88_spill] sm:$0xff] %v5637_v55  ;;  %9668 = vst [vmem:[#allocation89_spill] sm:$0xff] %v5639_v28  ;;  %v1999_v19 = vmax.f32 %v1998_v1, %v5621_v50  ;;  %v2074_v13 = vmax.f32 %v2073_v27, %v5639_v28 }
 0x1f0   : > { %v5645_v37 = vpop.f32.mrf.mxu0  ;;  %v5647_v57 = vpop.f32.mrf.mxu1 }
 0x1f1   : > { %9669 = vst [vmem:[#allocation90_spill] sm:$0xff] %v5647_v57  ;;  %v1964_v61 = vmax.f32 %v1963_v40, %v5645_v37  ;;  %v2038_v41 = vmax.f32 %v2037_v10, %v5647_v57  ;;  %v2000_v7 = vmax.f32 %v1999_v19, %v5637_v55 }
 0x1f2   : > { %v5653_v51 = vpop.f32.mrf.mxu0  ;;  %v5655_v46 = vpop.f32.mrf.mxu1 }
 0x1f3   : > { %9670 = vst [vmem:[#allocation91_spill] sm:$0xff] %v5653_v51  ;;  %9671 = vst [vmem:[#allocation92_spill] sm:$0xff] %v5655_v46  ;;  %v2001_v9 = vmax.f32 %v2000_v7, %v5653_v51  ;;  %v2075_v10 = vmax.f32 %v2074_v13, %v5655_v46 }
 0x1f4   : > { %v5661_v6 = vpop.f32.mrf.mxu0  ;;  %v5663_v0 = vpop.f32.mrf.mxu1 }
 0x1f5   : > { %9672 = vst [vmem:[#allocation93_spill] sm:$0xff] %v5663_v0  ;;  %v1965_v63 = vmax.f32 %v1964_v61, %v5661_v6  ;;  %v2039_v52 = vmax.f32 %v2038_v41, %v5663_v0 }
 0x1f6   : > { %v5669_v26 = vpop.f32.mrf.mxu0  ;;  %v5671_v1 = vpop.f32.mrf.mxu1 }
 0x1f7   : > { %9673 = vst [vmem:[#allocation94_spill] sm:$0xff] %v5669_v26  ;;  %9674 = vst [vmem:[#allocation95_spill] sm:$0xff] %v5671_v1  ;;  %v1966_v40 = vrot.slane %v1965_v63, 4  ;;  %v2040_v50 = vrot.slane %v2039_v52, 4  ;;  %v2002_v57 = vmax.f32 %v2001_v9, %v5669_v26  ;;  %v2076_v19 = vmax.f32 %v2075_v10, %v5671_v1 }
 0x1f8   : > { %v5677_v0 = vpop.f32.mrf.mxu0  ;;  %v5679_v45 = vpop.f32.mrf.mxu1 }
 0x1f9   : > { %v1967_v4 = vmax.f32 %v1965_v63, %v1966_v40  ;;  %v2041_v61 = vmax.f32 %v2039_v52, %v2040_v50  ;;  %v2003_v55 = vrot.slane %v2002_v57, 4  ;;  %v2077_v41 = vrot.slane %v2076_v19, 4  ;;  %9675 = vst [vmem:[#allocation96_spill] sm:$0xff] %v5677_v0  ;;  %9676 = vst [vmem:[#allocation97_spill] sm:$0xff] %v5679_v45  ;;  %v9869_v45 = vld [vmem:[#allocation72_spill] sm:$0xff] }
 0x1fa   : > { %v5681_v7 = vpop.f32.mrf.mxu0  ;;  %v5683_v13 = vpop.f32.mrf.mxu1 }
 0x1fb   : > { %v1968_v27 = vrot.slane %v1967_v4, 2  ;;  %9677 = vst [vmem:[#allocation98_spill] sm:$0xff] %v5681_v7  ;;  %9678 = vst [vmem:[#allocation99_spill] sm:$0xff] %v5683_v13  ;;  %v2042_v63 = vrot.slane %v2041_v61, 2  ;;  %v2004_v40 = vmax.f32 %v2002_v57, %v2003_v55  ;;  %v2078_v46 = vmax.f32 %v2076_v19, %v2077_v41  ;;  %v9685_v55 = vld [vmem:[#allocation8_spill] sm:$0xff] }
 0x1fc   : > { %v5685_v9 = vpop.f32.mrf.mxu0  ;;  %v5687_v10 = vpop.f32.mrf.mxu1  ;;  %v9686_v19 = vld [vmem:[#allocation12_spill] sm:$0xff] }
 0x1fd   : > { %v1969_v28 = vmax.f32 %v1967_v4, %v1968_v27  ;;  %9679 = vst [vmem:[#allocation100_spill] sm:$0xff] %v5685_v9  ;;  %9680 = vst [vmem:[#allocation101_spill] sm:$0xff] %v5687_v10  ;;  %v2043_v27 = vmax.f32 %v2041_v61, %v2042_v63  ;;  %v2005_v1 = vrot.slane %v2004_v40, 2  ;;  %v2079_v26 = vrot.slane %v2078_v46, 2 }
 0x1fe   : > { %v5691_v50 = vpop.f32.mrf.mxu0  ;;  %v5693_v52 = vpop.f32.mrf.mxu1  ;;  %v9890_v9 = vld [vmem:[#allocation94_spill] sm:$0xff] }
 0x1ff   : > { %v1970_v49 = vrot.slane %v1969_v28, 1  ;;  %9681 = vst [vmem:[#allocation102_spill] sm:$0xff] %v5691_v50  ;;  %9682 = vst [vmem:[#allocation103_spill] sm:$0xff] %v5693_v52  ;;  %v2044_v61 = vrot.slane %v2043_v27, 1  ;;  %v5709_v63 = vmax.f32 %v2004_v40, %v2005_v1  ;;  %v5711_v50 = vmax.f32 %v2078_v46, %v2079_v26 }
 0x200   : > { %v5695_v51 = vpop.f32.mrf.mxu0  ;;  %v5697_v7 = vpop.f32.mrf.mxu1 }
 0x201   : > { %v5689_v4 = vmax.f32 %v1969_v28, %v1970_v49  ;;  %9683 = vst [vmem:[#allocation104_spill] sm:$0xff] %v5695_v51  ;;  %9684 = vst [vmem:[#allocation105_spill] sm:$0xff] %v5697_v7  ;;  %v9689_v28 = vld [vmem:[#allocation16_spill] sm:$0xff]  ;;  %v5725_v26 = vmax.f32 %v2043_v27, %v2044_v61 }
 0x202   : > { %v5703_v13 = vpop.f32.mrf.mxu0  ;;  %v5705_v49 = vpop.f32.mrf.mxu1 }
 0x203   : > { %v2231_v57 = vsub.f32 %v9685_v55, %v5689_v4  ;;  %v2233_v41 = vsub.f32 %v9686_v19, %v5689_v4  ;;  %9687 = vst [vmem:[#allocation8_spill] sm:$0xff] %v5703_v13  ;;  %9688 = vst [vmem:[#allocation12_spill] sm:$0xff] %v5705_v49  ;;  %v2235_v52 = vsub.f32 %v9689_v28, %v5689_v4 }
 0x204   : > { %v5713_v51 = vpop.f32.mrf.mxu0  ;;  %v5715_v7 = vpop.f32.mrf.mxu1  ;;  %v2237_v55 = vsub.f32 %v5267_v24, %v5689_v4  ;;  %v2239_v28 = vsub.f32 %v5279_v30, %v5689_v4  ;;  %v2245_v27 = vsub.f32 %v5315_v48, %v5689_v4  ;;  %v2247_v61 = vsub.f32 %v5327_v54, %v5689_v4 }
 0x205   : > { %9690 = vst [vmem:[#allocation16_spill] sm:$0xff] %v5713_v51  ;;  %9691 = vst [vmem:[#allocation106_spill] sm:$0xff] %v5715_v7  ;;  %v2487_v19 = vmul.f32 1.442695, %v2231_v57  ;;  %v2491_v39 = vmul.f32 1.442695, %v2233_v41  ;;  %v2241_v57 = vsub.f32 %v5291_v36, %v5689_v4  ;;  %v2253_v48 = vsub.f32 %v5363_v17, %v5689_v4 }
 0x206   : > { %v5719_v13 = vpop.f32.mrf.mxu0  ;;  %v5721_v49 = vpop.f32.mrf.mxu1  ;;  %v2495_v1 = vmul.f32 1.442695, %v2235_v52  ;;  %v2499_v41 = vmul.f32 1.442695, %v2237_v55  ;;  %v2243_v52 = vsub.f32 %v5303_v42, %v5689_v4  ;;  %v2251_v55 = vsub.f32 %v5351_v3, %v5689_v4  ;;  %v9877_v51 = vld [vmem:[#allocation79_spill] sm:$0xff] }
 0x207   : > { %9692 = vst [vmem:[#allocation107_spill] sm:$0xff] %v5719_v13  ;;  %9693 = vst [vmem:[#allocation108_spill] sm:$0xff] %v5721_v49  ;;  %4233 = vpow2.f32 %v2487_v19  ;;  %v2503_v42 = vmul.f32 1.442695, %v2239_v28  ;;  %v2255_v54 = vsub.f32 %v5375_v35, %v5689_v4  ;;  %v2257_v19 = vsub.f32 %v5387_v53, %v5689_v4 }
 0x208   : > { %v5729_v7 = vpop.f32.mrf.mxu0  ;;  %v5731_v24 = vpop.f32.mrf.mxu1  ;;  %4235 = vpow2.f32 %v2491_v39  ;;  %v2249_v39 = vsub.f32 %v5339_v60, %v5689_v4  ;;  %v2259_v30 = vsub.f32 %v5399_v16, %v5689_v4  ;;  %v2261_v3 = vsub.f32 %v9644_v23, %v5689_v4 }
 0x209   : > { %9694 = vst [vmem:[#allocation109_spill] sm:$0xff] %v5729_v7  ;;  %9695 = vst [vmem:[#allocation110_spill] sm:$0xff] %v5731_v24  ;;  %4237 = vpow2.f32 %v2495_v1  ;;  %v2263_v28 = vsub.f32 %v5421_v29, %v5689_v4  ;;  %v2507_v17 = vmul.f32 1.442695, %v2241_v57  ;;  %v2265_v35 = vsub.f32 %v5435_v11, %v5689_v4 }
 0x20a   : > { %v5745_v40 = vpop.f32.mrf.mxu0  ;;  %v5747_v36 = vpop.f32.mrf.mxu1  ;;  %4239 = vpow2.f32 %v2499_v41  ;;  %v2267_v53 = vsub.f32 %v5453_v14, %v5689_v4  ;;  %v2269_v16 = vsub.f32 %v5469_v20, %v5689_v4  ;;  %v2271_v1 = vsub.f32 %v5485_v32, %v5689_v4 }
 0x20b   : > { %9696 = vst [vmem:[#allocation111_spill] sm:$0xff] %v5745_v40  ;;  %9697 = vst [vmem:[#allocation112_spill] sm:$0xff] %v5747_v36  ;;  %v2273_v29 = vsub.f32 %v5501_v44, %v5689_v4  ;;  %v2275_v57 = vsub.f32 %v5517_v56, %v5689_v4  ;;  %4241 = vpow2.f32 %v2503_v42  ;;  %v2511_v11 = vmul.f32 1.442695, %v2243_v52  ;;  %v9707_v40 = vld [vmem:[#allocation13_spill] sm:$0xff] }
 0x20c   : > { %v5761_v46 = vpop.f32.mrf.mxu0  ;;  %v5763_v60 = vpop.f32.mrf.mxu1  ;;  %v2277_v14 = vsub.f32 %v5533_v22, %v5689_v4  ;;  %v2279_v20 = vsub.f32 %v5549_v43, %v5689_v4  ;;  %v2281_v32 = vsub.f32 %v5565_v5, %v5689_v4  ;;  %v2283_v41 = vsub.f32 %v5581_v59, %v5689_v4 }
 0x20d   : > { %9698 = vst [vmem:[#allocation113_spill] sm:$0xff] %v5761_v46  ;;  %9699 = vst [vmem:[#allocation114_spill] sm:$0xff] %v5763_v60  ;;  %v2285_v56 = vsub.f32 %v5597_v25, %v5689_v4  ;;  %v2287_v52 = vsub.f32 %v5613_v38, %v5689_v4  ;;  %4243 = vpow2.f32 %v2507_v17  ;;  %v2515_v22 = vmul.f32 1.442695, %v2245_v27  ;;  %v9706_v38 = vld [vmem:[#allocation9_spill] sm:$0xff] }
 0x20e   : > { %v5777_v36 = vpop.f32.mrf.mxu0  ;;  %v5779_v23 = vpop.f32.mrf.mxu1  ;;  %v2289_v43 = vsub.f32 %v5629_v62, %v5689_v4  ;;  %v2291_v5 = vsub.f32 %v5645_v37, %v5689_v4  ;;  %v2293_v59 = vsub.f32 %v5661_v6, %v5689_v4  ;;  %v2519_v42 = vmul.f32 1.442695, %v2247_v61  ;;  %v9853_v46 = vld [vmem:[#allocation53_spill] sm:$0xff] }
 0x20f   : > { %9700 = vst [vmem:[#allocation115_spill] sm:$0xff] %v5777_v36  ;;  %9701 = vst [vmem:[#allocation116_spill] sm:$0xff] %v5779_v23  ;;  %4245 = vpow2.f32 %v2511_v11  ;;  %v2523_v25 = vmul.f32 1.442695, %v2249_v39  ;;  %v2527_v36 = vmul.f32 1.442695, %v2251_v55 }
 0x210   : > { %v5793_v23 = vpop.f32.mrf.mxu0  ;;  %v5795_v44 = vpop.f32.mrf.mxu1  ;;  %v2531_v17 = vmul.f32 1.442695, %v2253_v48  ;;  %v2535_v60 = vmul.f32 1.442695, %v2255_v54  ;;  %v2539_v62 = vmul.f32 1.442695, %v2257_v19  ;;  %4247 = vpow2.f32 %v2515_v22 }
 0x211   : > { %9702 = vst [vmem:[#allocation117_spill] sm:$0xff] %v5793_v23  ;;  %9703 = vst [vmem:[#allocation118_spill] sm:$0xff] %v5795_v44  ;;  %v2543_v61 = vmul.f32 1.442695, %v2259_v30  ;;  %v2547_v11 = vmul.f32 1.442695, %v2261_v3  ;;  %4249 = vpow2.f32 %v2519_v42 }
 0x212   : > { %v5807_v49 = vpop.f32.mrf.mxu0  ;;  %v5809_v44 = vpop.f32.mrf.mxu1  ;;  %v2551_v39 = vmul.f32 1.442695, %v2263_v28  ;;  %v2555_v27 = vmul.f32 1.442695, %v2265_v35  ;;  %v2559_v48 = vmul.f32 1.442695, %v2267_v53  ;;  %4251 = vpow2.f32 %v2523_v25 }
 0x213   : > { %9704 = vst [vmem:[#allocation119_spill] sm:$0xff] %v5807_v49  ;;  %9705 = vst [vmem:[#allocation120_spill] sm:$0xff] %v5809_v44  ;;  %v2563_v54 = vmul.f32 1.442695, %v2269_v16  ;;  %v2567_v37 = vmul.f32 1.442695, %v2271_v1  ;;  %4253 = vpow2.f32 %v2527_v36 }
 0x214   : > { %v5815_v24 = vpop.f32.mrf.mxu0  ;;  %v5817_v6 = vpop.f32.mrf.mxu1  ;;  %v5827_v49 = vmul.f32 1.442695, %v2273_v29  ;;  %v5833_v3 = vmul.f32 1.442695, %v2275_v57  ;;  %v5835_v28 = vmul.f32 1.442695, %v2277_v14  ;;  %4255 = vpow2.f32 %v2531_v17 }
 0x215   : > { %9708 = vst [vmem:[#allocation9_spill] sm:$0xff] %v5815_v24  ;;  %9709 = vst [vmem:[#allocation13_spill] sm:$0xff] %v5817_v6  ;;  %v5819_v4 = vpop.eup %4233  ;;  %v5837_v35 = vmul.f32 1.442695, %v2279_v20  ;;  %v5843_v1 = vmul.f32 1.442695, %v2281_v32  ;;  %4257 = vpow2.f32 %v2535_v60 }
 0x216   : > { %9710 = vst [vmem:[#allocation121_spill] sm:$0xff] %v5819_v4  ;;  %v5821_v55 = vpop.eup %4235  ;;  %v5823_v19 = vpop.f32.mrf.mxu0  ;;  %v5845_v29 = vmul.f32 1.442695, %v2283_v41  ;;  %v5850_v36 = vmul.f32 1.442695, %v2285_v56  ;;  %4259 = vpow2.f32 %v2539_v62  ;;  %v9721_v60 = vld [vmem:[#allocation17_spill] sm:$0xff] }
 0x217   : > { %9711 = vst [vmem:[#allocation122_spill] sm:$0xff] %v5821_v55  ;;  %9712 = vst [vmem:[#allocation123_spill] sm:$0xff] %v5823_v19  ;;  %v5825_v44 = vpop.f32.mrf.mxu1  ;;  %v2999_v22 = vadd.f32 %v5821_v55, %v5819_v4  ;;  %v5831_v30 = vpop.eup %4237  ;;  %v5852_v57 = vmul.f32 1.442695, %v2287_v52  ;;  %v5854_v14 = vmul.f32 1.442695, %v2289_v43  ;;  %4261 = vpow2.f32 %v2543_v61 }
 0x218   : > { %9713 = vst [vmem:[#allocation124_spill] sm:$0xff] %v5825_v44  ;;  %9714 = vst [vmem:[#allocation125_spill] sm:$0xff] %v5831_v30  ;;  %v5839_v53 = vpop.f32.mrf.mxu0  ;;  %v5848_v25 = vpop.eup %4239  ;;  %v5860_v32 = vmul.f32 1.442695, %v2291_v5  ;;  %v5862_v41 = vmul.f32 1.442695, %v2293_v59  ;;  %4263 = vpow2.f32 %v2547_v11 }
 0x219   : > { %9715 = vst [vmem:[#allocation126_spill] sm:$0xff] %v5839_v53  ;;  %v5841_v16 = vpop.f32.mrf.mxu1  ;;  %v3000_v42 = vadd.f32 %v5831_v30, %v2999_v22  ;;  %9717 = vst [vmem:[#allocation128_spill] sm:$0xff] %v5848_v25  ;;  %v5865_v22 = vpop.eup %4241  ;;  %v9722_v52 = vld [vmem:[#allocation20_spill] sm:$0xff]  ;;  %v9725_v62 = vld [vmem:[#allocation25_spill] sm:$0xff]  ;;  %4265 = vpow2.f32 %v2551_v39 }
 0x21a   : > { %9716 = vst [vmem:[#allocation127_spill] sm:$0xff] %v5841_v16  ;;  %v5856_v20 = vpop.f32.mrf.mxu0  ;;  %9720 = vst [vmem:[#allocation131_spill] sm:$0xff] %v5865_v22  ;;  %v9726_v61 = vld [vmem:[#allocation28_spill] sm:$0xff]  ;;  %v5882_v56 = vpop.eup %4243  ;;  %v9728_v43 = vld [vmem:[#allocation31_spill] sm:$0xff]  ;;  %4267 = vpow2.f32 %v2555_v27 }
 0x21b   : > { %9718 = vst [vmem:[#allocation129_spill] sm:$0xff] %v5856_v20  ;;  %v5858_v4 = vpop.f32.mrf.mxu1  ;;  %v3001_v17 = vadd.f32 %v5848_v25, %v3000_v42  ;;  %9727 = vst [vmem:[#allocation25_spill] sm:$0xff] %v5882_v56  ;;  %v9729_v55 = vld [vmem:[#allocation34_spill] sm:$0xff]  ;;  %v9733_v25 = vld [vmem:[#allocation40_spill] sm:$0xff]  ;;  %4269 = vpow2.f32 %v2559_v48 }
 0x21c   : > { %9719 = vst [vmem:[#allocation130_spill] sm:$0xff] %v5858_v4  ;;  %v5873_v30 = vpop.f32.mrf.mxu0  ;;  %v9734_v39 = vld [vmem:[#allocation43_spill] sm:$0xff]  ;;  %v5899_v4 = vpop.eup %4245  ;;  %v9736_v44 = vld [vmem:[#allocation46_spill] sm:$0xff]  ;;  %v9737_v11 = vld [vmem:[#allocation49_spill] sm:$0xff]  ;;  %4271 = vpow2.f32 %v2563_v54 }
 0x21d   : > { %9723 = vst [vmem:[#allocation17_spill] sm:$0xff] %v5873_v30  ;;  %v5875_v5 = vpop.f32.mrf.mxu1  ;;  %v3002_v59 = vadd.f32 %v5865_v22, %v3001_v17  ;;  %9735 = vst [vmem:[#allocation34_spill] sm:$0xff] %v5899_v4  ;;  %v9741_v16 = vld [vmem:[#allocation56_spill] sm:$0xff]  ;;  %v9742_v48 = vld [vmem:[#allocation59_spill] sm:$0xff]  ;;  %v5916_v19 = vpop.eup %4247  ;;  %4273 = vpow2.f32 %v2567_v37 }
 0x21e   : > { %9724 = vst [vmem:[#allocation20_spill] sm:$0xff] %v5875_v5  ;;  %v9730_v5 = vld [vmem:[#allocation37_spill] sm:$0xff]  ;;  %v5890_v20 = vpop.f32.mrf.mxu0  ;;  %9743 = vst [vmem:[#allocation43_spill] sm:$0xff] %v5916_v19  ;;  %4275 = vpow2.f32 %v5827_v49  ;;  %v9748_v49 = vsub.f32 %v9706_v38, %v5725_v26  ;;  %v9759_v38 = vsub.f32 %v9721_v60, %v5725_v26 }
 0x21f   : > { %9731 = vst [vmem:[#allocation28_spill] sm:$0xff] %v5890_v20  ;;  %v5892_v17 = vpop.f32.mrf.mxu1  ;;  %v3003_v42 = vadd.f32 %v5882_v56, %v3002_v59  ;;  %v5928_v56 = vpop.eup %4249  ;;  %4277 = vpow2.f32 %v5833_v3  ;;  %v9763_v53 = vld [vmem:[#allocation93_spill] sm:$0xff] }
 0x220   : > { %9732 = vst [vmem:[#allocation31_spill] sm:$0xff] %v5892_v17  ;;  %v9738_v17 = vld [vmem:[#allocation52_spill] sm:$0xff]  ;;  %v5907_v6 = vpop.f32.mrf.mxu0  ;;  %v5936_v27 = vpop.eup %4251  ;;  %4279 = vpow2.f32 %v5835_v28  ;;  %v9754_v28 = vld [vmem:[#allocation81_spill] sm:$0xff] }
 0x221   : > { %9739 = vst [vmem:[#allocation37_spill] sm:$0xff] %v5907_v6  ;;  %v5909_v59 = vpop.f32.mrf.mxu1  ;;  %v3004_v22 = vadd.f32 %v5899_v4, %v3003_v42  ;;  %9746 = vst [vmem:[#allocation52_spill] sm:$0xff] %v5928_v56  ;;  %v9752_v4 = vsub.f32 %v9707_v40, %v5725_v26  ;;  %4281 = vpow2.f32 %v5837_v35  ;;  %v9768_v6 = vsub.f32 %v5281_v31, %v5725_v26 }
 0x222   : > { %9740 = vst [vmem:[#allocation40_spill] sm:$0xff] %v5909_v59  ;;  %v5924_v59 = vpop.f32.mrf.mxu0  ;;  %9747 = vst [vmem:[#allocation56_spill] sm:$0xff] %v5936_v27  ;;  %4283 = vpow2.f32 %v5843_v1 }
 0x223   : > { %9744 = vst [vmem:[#allocation46_spill] sm:$0xff] %v5924_v59  ;;  %v5926_v42 = vpop.f32.mrf.mxu1  ;;  %v3005_v30 = vadd.f32 %v5916_v19, %v3004_v22  ;;  %v2615_v22 = vmul.f32 1.442695, %v9748_v49  ;;  %v2619_v20 = vmul.f32 1.442695, %v9752_v4  ;;  %v9758_v4 = vld [vmem:[#allocation84_spill] sm:$0xff] }
 0x224   : > { %9745 = vst [vmem:[#allocation49_spill] sm:$0xff] %v5926_v42  ;;  %v5946_v19 = vpop.f32.mrf.mxu0  ;;  %v5950_v42 = vpop.eup %4253  ;;  %v2623_v49 = vmul.f32 1.442695, %v9759_v38  ;;  %v9767_v38 = vsub.f32 %v9722_v52, %v5725_v26  ;;  %v2631_v24 = vmul.f32 1.442695, %v9768_v6  ;;  %v9772_v52 = vsub.f32 %v9728_v43, %v5725_v26 }
 0x225   : > { %9749 = vst [vmem:[#allocation59_spill] sm:$0xff] %v5946_v19  ;;  %v5948_v37 = vpop.f32.mrf.mxu1  ;;  %9751 = vst [vmem:[#allocation133_spill] sm:$0xff] %v5950_v42  ;;  %v3006_v3 = vadd.f32 %v5928_v56, %v3005_v30  ;;  %v5959_v59 = vpop.eup %4255  ;;  %v9761_v30 = vld [vmem:[#allocation87_spill] sm:$0xff]  ;;  %4285 = vpow2.f32 %v2615_v22  ;;  %v9770_v22 = vsub.f32 %v9725_v62, %v5725_v26  ;;  %v9776_v62 = vsub.f32 %v9729_v55, %v5725_v26 }
 0x226   : > { %9750 = vst [vmem:[#allocation132_spill] sm:$0xff] %v5948_v37  ;;  %9753 = vst [vmem:[#allocation134_spill] sm:$0xff] %v5959_v59  ;;  %v5968_v56 = vpop.f32.mrf.mxu0  ;;  %v5972_v37 = vpop.eup %4257  ;;  %4287 = vpow2.f32 %v2619_v20 }
 0x227   : > { %9755 = vst [vmem:[#allocation81_spill] sm:$0xff] %v5968_v56  ;;  %v5970_v54 = vpop.f32.mrf.mxu1  ;;  %9757 = vst [vmem:[#allocation136_spill] sm:$0xff] %v5972_v37  ;;  %v3007_v40 = vadd.f32 %v5936_v27, %v3006_v3  ;;  %v5981_v19 = vpop.eup %4259  ;;  %v2627_v56 = vmul.f32 1.442695, %v9767_v38  ;;  %4289 = vpow2.f32 %v5845_v29  ;;  %v2635_v1 = vmul.f32 1.442695, %v9770_v22 }
 0x228   : > { %9756 = vst [vmem:[#allocation135_spill] sm:$0xff] %v5970_v54  ;;  %9760 = vst [vmem:[#allocation84_spill] sm:$0xff] %v5981_v19  ;;  %v9762_v54 = vld [vmem:[#allocation90_spill] sm:$0xff]  ;;  %v5989_v3 = vpop.f32.mrf.mxu0  ;;  %v5993_v35 = vpop.eup %4261  ;;  %v6014_v38 = vmul.f32 1.442695, %v9772_v52  ;;  %4291 = vpow2.f32 %v2623_v49  ;;  %v9779_v52 = vsub.f32 %v9733_v25, %v5725_v26  ;;  %v9780_v49 = vsub.f32 %v9734_v39, %v5725_v26 }
 0x229   : > { %9764 = vst [vmem:[#allocation87_spill] sm:$0xff] %v5989_v3  ;;  %v5991_v27 = vpop.f32.mrf.mxu1  ;;  %9766 = vst [vmem:[#allocation93_spill] sm:$0xff] %v5993_v35  ;;  %v3008_v60 = vadd.f32 %v5950_v42, %v3007_v40  ;;  %v6002_v23 = vpop.eup %4263  ;;  %v9771_v40 = vsub.f32 %v9726_v61, %v5725_v26  ;;  %v6026_v22 = vmul.f32 1.442695, %v9776_v62  ;;  %v9777_v61 = vsub.f32 %v9730_v5, %v5725_v26 }
 0x22a   : > { %9765 = vst [vmem:[#allocation90_spill] sm:$0xff] %v5991_v27  ;;  %9769 = vst [vmem:[#allocation137_spill] sm:$0xff] %v6002_v23  ;;  %v6016_v42 = vpop.f32.mrf.mxu0  ;;  %v6020_v6 = vpop.eup %4265  ;;  %4293 = vpow2.f32 %v5850_v36  ;;  %v6044_v55 = vmul.f32 1.442695, %v9780_v49  ;;  %v9786_v49 = vsub.f32 %v9738_v17, %v5725_v26 }
 0x22b   : > { %v2639_v20 = vmul.f32 1.442695, %v9771_v40  ;;  %9773 = vst [vmem:[#allocation138_spill] sm:$0xff] %v6016_v42  ;;  %v6018_v31 = vpop.f32.mrf.mxu1  ;;  %9775 = vst [vmem:[#allocation140_spill] sm:$0xff] %v6020_v6  ;;  %v3009_v29 = vadd.f32 %v5959_v59, %v3008_v60  ;;  %v6031_v43 = vmul.f32 1.442695, %v9777_v61  ;;  %v6033_v40 = vpop.eup %4267  ;;  %v9781_v60 = vsub.f32 %v9736_v44, %v5725_v26 }
 0x22c   : > { %9774 = vst [vmem:[#allocation139_spill] sm:$0xff] %v6018_v31  ;;  %9778 = vst [vmem:[#allocation141_spill] sm:$0xff] %v6033_v40  ;;  %v6039_v31 = vmul.f32 1.442695, %v9779_v52  ;;  %v6051_v62 = vpop.f32.mrf.mxu0  ;;  %v6055_v36 = vpop.eup %4269  ;;  %4295 = vpow2.f32 %v2627_v56  ;;  %v9785_v52 = vsub.f32 %v9737_v11, %v5725_v26  ;;  %v6066_v44 = vmul.f32 1.442695, %v9786_v49 }
 0x22d   : > { %v6049_v5 = vmul.f32 1.442695, %v9781_v60  ;;  %9782 = vst [vmem:[#allocation142_spill] sm:$0xff] %v6051_v62  ;;  %v6053_v61 = vpop.f32.mrf.mxu1  ;;  %9784 = vst [vmem:[#allocation144_spill] sm:$0xff] %v6055_v36  ;;  %v3010_v25 = vadd.f32 %v5972_v37, %v3009_v29  ;;  %v6068_v60 = vpop.eup %4271  ;;  %4297 = vpow2.f32 %v5852_v57  ;;  %v9788_v59 = vsub.f32 %v9741_v16, %v5725_v26  ;;  %v9835_v42 = vld [vmem:[#allocation23_spill] sm:$0xff]  ;;  %v9849_v62 = vld [vmem:[#allocation44_spill] sm:$0xff] }
 0x22e   : > { %9783 = vst [vmem:[#allocation143_spill] sm:$0xff] %v6053_v61  ;;  %v6061_v39 = vmul.f32 1.442695, %v9785_v52  ;;  %9787 = vst [vmem:[#allocation145_spill] sm:$0xff] %v6068_v60  ;;  %v9789_v56 = vsub.f32 %v9742_v48, %v5725_v26  ;;  %v9790_v29 = vsub.f32 %v5437_v2, %v5725_v26  ;;  %v6086_v52 = vpop.f32.mrf.mxu0  ;;  %v6090_v57 = vpop.eup %4273  ;;  %4299 = vpow2.f32 %v2631_v24 }
 0x22f   : > { %v6074_v61 = vmul.f32 1.442695, %v9788_v59  ;;  %9791 = vst [vmem:[#allocation146_spill] sm:$0xff] %v6086_v52  ;;  %v6088_v49 = vpop.f32.mrf.mxu1  ;;  %9793 = vst [vmem:[#allocation148_spill] sm:$0xff] %v6090_v57  ;;  %v3011_v16 = vadd.f32 %v5981_v19, %v3010_v25  ;;  %v9794_v59 = vsub.f32 %v5455_v8, %v5725_v26  ;;  %4301 = vpow2.f32 %v5854_v14  ;;  %v9833_v52 = vld [vmem:[#allocation21_spill] sm:$0xff] }
 0x230   : > { %v6079_v11 = vmul.f32 1.442695, %v9789_v56  ;;  %v6084_v17 = vmul.f32 1.442695, %v9790_v29  ;;  %9792 = vst [vmem:[#allocation147_spill] sm:$0xff] %v6088_v49  ;;  %v9795_v56 = vsub.f32 %v5471_v34, %v5725_v26  ;;  %v6103_v29 = vpop.eup %4275  ;;  %v9797_v37 = vsub.f32 %v5487_v12, %v5725_v26 }
 0x231   : > { %v6096_v48 = vmul.f32 1.442695, %v9794_v59  ;;  %9796 = vst [vmem:[#allocation149_spill] sm:$0xff] %v6103_v29  ;;  %v9798_v24 = vsub.f32 %v5503_v15, %v5725_v26  ;;  %v9799_v25 = vsub.f32 %v5519_v18, %v5725_v26  ;;  %v6121_v59 = vpop.f32.mrf.mxu0  ;;  %v6125_v14 = vpop.eup %4277  ;;  %v3012_v12 = vadd.f32 %v5993_v35, %v3011_v16 }
 0x232   : > { %v6101_v2 = vmul.f32 1.442695, %v9795_v56  ;;  %v6109_v49 = vmul.f32 1.442695, %v9797_v37  ;;  %9800 = vst [vmem:[#allocation150_spill] sm:$0xff] %v6121_v59  ;;  %v6123_v56 = vpop.f32.mrf.mxu1  ;;  %9802 = vst [vmem:[#allocation152_spill] sm:$0xff] %v6125_v14  ;;  %4303 = vpow2.f32 %v2635_v1  ;;  %v9803_v37 = vsub.f32 %v5535_v21, %v5725_v26 }
 0x233   : > { %v6114_v8 = vmul.f32 1.442695, %v9798_v24  ;;  %v6119_v34 = vmul.f32 1.442695, %v9799_v25  ;;  %9801 = vst [vmem:[#allocation151_spill] sm:$0xff] %v6123_v56  ;;  %v9804_v24 = vsub.f32 %v5551_v33, %v5725_v26  ;;  %v6138_v25 = vpop.eup %4279  ;;  %4305 = vpow2.f32 %v5860_v32 }
 0x234   : > { %v6131_v15 = vmul.f32 1.442695, %v9803_v37  ;;  %9805 = vst [vmem:[#allocation153_spill] sm:$0xff] %v6138_v25  ;;  %v9806_v19 = vsub.f32 %v5567_v47, %v5725_v26  ;;  %v9807_v1 = vsub.f32 %v5583_v58, %v5725_v26  ;;  %v9808_v16 = vrot.slane %v5709_v63, 1  ;;  %v6156_v37 = vpop.f32.mrf.mxu0  ;;  %v6160_v32 = vpop.eup %4281 }
 0x235   : > { %v6136_v18 = vmul.f32 1.442695, %v9804_v24  ;;  %9809 = vst [vmem:[#allocation154_spill] sm:$0xff] %v6156_v37  ;;  %v6158_v24 = vpop.f32.mrf.mxu1  ;;  %9811 = vst [vmem:[#allocation156_spill] sm:$0xff] %v6160_v32  ;;  %v3013_v47 = vadd.f32 %v6002_v23, %v3012_v12  ;;  %4307 = vpow2.f32 %v2639_v20  ;;  %v9816_v20 = vsub.f32 %v9762_v54, %v5725_v26  ;;  %v9861_v23 = vld [vmem:[#allocation64_spill] sm:$0xff] }
 0x236   : > { %v6144_v56 = vmul.f32 1.442695, %v9806_v19  ;;  %v6149_v21 = vmul.f32 1.442695, %v9807_v1  ;;  %v6154_v33 = vmax.f32 %v5709_v63, %v9808_v16  ;;  %9810 = vst [vmem:[#allocation155_spill] sm:$0xff] %v6158_v24  ;;  %v9812_v19 = vsub.f32 %v9754_v28, %v5725_v26  ;;  %v6173_v63 = vpop.eup %4283 }
 0x237   : > { %v9813_v1 = vsub.f32 %v9758_v4, %v5725_v26  ;;  %9814 = vst [vmem:[#allocation157_spill] sm:$0xff] %v6173_v63  ;;  %4309 = vpow2.f32 %v5862_v41  ;;  %v9815_v16 = vsub.f32 %v9761_v30, %v5725_v26  ;;  %v6184_v28 = vmul.f32 1.442695, %v9816_v20  ;;  %v6195_v41 = vpop.eup %4285 }
 0x238   : > { %v6166_v58 = vmul.f32 1.442695, %v9812_v19  ;;  %v9817_v12 = vsub.f32 %v9763_v53, %v5725_v26  ;;  %v6191_v19 = vpop.f32.mrf.mxu0  ;;  %9820 = vst [vmem:[#allocation160_spill] sm:$0xff] %v6195_v41  ;;  %v3014_v30 = vadd.f32 %v6020_v6, %v3013_v47  ;;  %4311 = vpow2.f32 %v6014_v38  ;;  %v6206_v53 = vpop.eup %4287  ;;  %v9827_v47 = vld [vmem:[#allocation18_spill] sm:$0xff] }
 0x239   : > { %v6171_v35 = vmul.f32 1.442695, %v9813_v1  ;;  %v6179_v24 = vmul.f32 1.442695, %v9815_v16  ;;  %9818 = vst [vmem:[#allocation158_spill] sm:$0xff] %v6191_v19  ;;  %v6193_v1 = vpop.f32.mrf.mxu1  ;;  %v9821_v16 = vrot.slane %v5711_v50, 1  ;;  %4313 = vpow2.f32 %v6026_v22 }
 0x23a   : > { %v6189_v4 = vmul.f32 1.442695, %v9817_v12  ;;  %9819 = vst [vmem:[#allocation159_spill] sm:$0xff] %v6193_v1  ;;  %9824 = vst [vmem:[#allocation161_spill] sm:$0xff] %v6206_v53  ;;  %v9825_v12 = vld [vmem:[#allocation10_spill] sm:$0xff]  ;;  %v6216_v27 = vpop.f32.mrf.mxu0  ;;  %v3015_v26 = vadd.f32 %v6033_v40, %v3014_v30  ;;  %v3073_v37 = vadd.f32 %v6206_v53, %v6195_v41  ;;  %4315 = vpow2.f32 %v6031_v43  ;;  %v9837_v30 = vld [vmem:[#allocation29_spill] sm:$0xff] }
 0x23b   : > { %v6202_v54 = vmax.f32 %v5711_v50, %v9821_v16  ;;  %v9826_v1 = vld [vmem:[#allocation14_spill] sm:$0xff]  ;;  %9830 = vst [vmem:[#allocation10_spill] sm:$0xff] %v6216_v27  ;;  %v6218_v50 = vpop.f32.mrf.mxu1  ;;  %v6220_v16 = vpop.eup %4289  ;;  %4317 = vpow2.f32 %v6039_v31  ;;  %v9841_v27 = vld [vmem:[#allocation32_spill] sm:$0xff]  ;;  %v9843_v40 = vld [vmem:[#allocation35_spill] sm:$0xff] }
 0x23c   : > { %9831 = vst [vmem:[#allocation14_spill] sm:$0xff] %v6218_v50  ;;  %9832 = vst [vmem:[#allocation18_spill] sm:$0xff] %v6220_v16  ;;  %v6228_v6 = vpop.eup %4291  ;;  %v9836_v50 = vld [vmem:[#allocation26_spill] sm:$0xff]  ;;  %v6237_v22 = vpop.f32.mrf.mxu0  ;;  %v3016_v59 = vadd.f32 %v6055_v36, %v3015_v26  ;;  %4319 = vpow2.f32 %v6044_v55  ;;  %v9845_v19 = vld [vmem:[#allocation41_spill] sm:$0xff] }
 0x23d   : > { %9834 = vst [vmem:[#allocation21_spill] sm:$0xff] %v6228_v6  ;;  %9838 = vst [vmem:[#allocation23_spill] sm:$0xff] %v6237_v22  ;;  %v6239_v3 = vpop.f32.mrf.mxu1  ;;  %v6241_v41 = vpop.eup %4293  ;;  %v3074_v43 = vadd.f32 %v6228_v6, %v3073_v37  ;;  %4321 = vpow2.f32 %v6049_v5  ;;  %v9851_v26 = vld [vmem:[#allocation47_spill] sm:$0xff]  ;;  %v9857_v22 = vld [vmem:[#allocation57_spill] sm:$0xff] }
 0x23e   : > { %9839 = vst [vmem:[#allocation26_spill] sm:$0xff] %v6239_v3  ;;  %9840 = vst [vmem:[#allocation29_spill] sm:$0xff] %v6241_v41  ;;  %v6248_v38 = vpop.eup %4295  ;;  %v9844_v3 = vld [vmem:[#allocation38_spill] sm:$0xff]  ;;  %v6257_v36 = vpop.f32.mrf.mxu0  ;;  %v3017_v53 = vadd.f32 %v6068_v60, %v3016_v59  ;;  %4323 = vpow2.f32 %v6061_v39  ;;  %v9859_v59 = vld [vmem:[#allocation60_spill] sm:$0xff] }
 0x23f   : > { %9842 = vst [vmem:[#allocation32_spill] sm:$0xff] %v6248_v38  ;;  %9846 = vst [vmem:[#allocation35_spill] sm:$0xff] %v6257_v36  ;;  %v6259_v31 = vpop.f32.mrf.mxu1  ;;  %v6261_v37 = vpop.eup %4297  ;;  %v3075_v55 = vadd.f32 %v6248_v38, %v3074_v43  ;;  %4325 = vpow2.f32 %v6066_v44  ;;  %v9865_v36 = vld [vmem:[#allocation66_spill] sm:$0xff] }
 0x240   : > { %9847 = vst [vmem:[#allocation38_spill] sm:$0xff] %v6259_v31  ;;  %9848 = vst [vmem:[#allocation41_spill] sm:$0xff] %v6261_v37  ;;  %v6268_v13 = vpop.eup %4299  ;;  %v9852_v31 = vld [vmem:[#allocation50_spill] sm:$0xff]  ;;  %v6277_v60 = vpop.f32.mrf.mxu0  ;;  %v3018_v6 = vadd.f32 %v6090_v57, %v3017_v53  ;;  %4327 = vpow2.f32 %v6074_v61  ;;  %v9867_v53 = vld [vmem:[#allocation68_spill] sm:$0xff] }
 0x241   : > { %9850 = vst [vmem:[#allocation44_spill] sm:$0xff] %v6268_v13  ;;  %9854 = vst [vmem:[#allocation47_spill] sm:$0xff] %v6277_v60  ;;  %v6279_v5 = vpop.f32.mrf.mxu1  ;;  %v6281_v43 = vpop.eup %4301  ;;  %v3076_v39 = vadd.f32 %v6268_v13, %v3075_v55  ;;  %4329 = vpow2.f32 %v6079_v11  ;;  %v9873_v60 = vld [vmem:[#allocation55_spill] sm:$0xff] }
 0x242   : > { %9855 = vst [vmem:[#allocation50_spill] sm:$0xff] %v6279_v5  ;;  %9856 = vst [vmem:[#allocation53_spill] sm:$0xff] %v6281_v43  ;;  %v6288_v20 = vpop.eup %4303  ;;  %v9860_v5 = vld [vmem:[#allocation62_spill] sm:$0xff]  ;;  %v6297_v57 = vpop.f32.mrf.mxu0  ;;  %v3019_v38 = vadd.f32 %v6103_v29, %v3018_v6  ;;  %4331 = vpow2.f32 %v6084_v17  ;;  %v9875_v6 = vld [vmem:[#allocation75_spill] sm:$0xff] }
 0x243   : > { %9858 = vst [vmem:[#allocation57_spill] sm:$0xff] %v6288_v20  ;;  %9862 = vst [vmem:[#allocation60_spill] sm:$0xff] %v6297_v57  ;;  %v6299_v44 = vpop.f32.mrf.mxu1  ;;  %v6301_v55 = vpop.eup %4305  ;;  %v3077_v61 = vadd.f32 %v6288_v20, %v3076_v39  ;;  %4333 = vpow2.f32 %v6096_v48  ;;  %v9879_v20 = vld [vmem:[#allocation82_spill] sm:$0xff] }
 0x244   : > { %9863 = vst [vmem:[#allocation62_spill] sm:$0xff] %v6299_v44  ;;  %9864 = vst [vmem:[#allocation64_spill] sm:$0xff] %v6301_v55  ;;  %v6308_v10 = vpop.eup %4307  ;;  %v9868_v44 = vld [vmem:[#allocation70_spill] sm:$0xff]  ;;  %v6317_v29 = vpop.f32.mrf.mxu0  ;;  %v3020_v13 = vadd.f32 %v6125_v14, %v3019_v38  ;;  %4335 = vpow2.f32 %v6101_v2  ;;  %v9887_v38 = vsub.f32 %v9826_v1, %v6154_v33 }
 0x245   : > { %9866 = vst [vmem:[#allocation66_spill] sm:$0xff] %v6308_v10  ;;  %9870 = vst [vmem:[#allocation68_spill] sm:$0xff] %v6317_v29  ;;  %v6319_v11 = vpop.f32.mrf.mxu1  ;;  %v6321_v39 = vpop.eup %4309  ;;  %v3078_v17 = vadd.f32 %v6308_v10, %v3077_v61  ;;  %4337 = vpow2.f32 %v6109_v49  ;;  %v9882_v29 = vld [vmem:[#allocation85_spill] sm:$0xff] }
 0x246   : > { %9871 = vst [vmem:[#allocation70_spill] sm:$0xff] %v6319_v11  ;;  %9872 = vst [vmem:[#allocation72_spill] sm:$0xff] %v6321_v39  ;;  %v6328_v7 = vpop.eup %4311  ;;  %v9876_v11 = vld [vmem:[#allocation77_spill] sm:$0xff]  ;;  %v6337_v14 = vpop.f32.mrf.mxu0  ;;  %v3021_v48 = vadd.f32 %v6138_v25, %v3020_v13  ;;  %4339 = vpow2.f32 %v6114_v8  ;;  %v9884_v13 = vsub.f32 %v9825_v12, %v6154_v33  ;;  %v9889_v12 = vld [vmem:[#allocation91_spill] sm:$0xff] }
 0x247   : > { %9874 = vst [vmem:[#allocation55_spill] sm:$0xff] %v6328_v7  ;;  %9878 = vst [vmem:[#allocation75_spill] sm:$0xff] %v6337_v14  ;;  %v3079_v61 = vadd.f32 %v6328_v7, %v3078_v17  ;;  %v6344_v10 = vpop.f32.mrf.mxu1  ;;  %v6346_v57 = vpop.eup %4313  ;;  %v9883_v14 = vld [vmem:[#allocation88_spill] sm:$0xff]  ;;  %4341 = vpow2.f32 %v6119_v34  ;;  %v2493_v7 = vmul.f32 1.442695, %v9887_v38  ;;  %v9894_v38 = vsub.f32 %v9833_v52, %v6154_v33 }
 0x248   : > { %9880 = vst [vmem:[#allocation77_spill] sm:$0xff] %v6344_v10  ;;  %9881 = vst [vmem:[#allocation79_spill] sm:$0xff] %v6346_v57  ;;  %v2489_v49 = vmul.f32 1.442695, %v9884_v13  ;;  %v6356_v17 = vpop.f32.mrf.mxu0  ;;  %v6358_v25 = vpop.eup %4315  ;;  %v3022_v2 = vadd.f32 %v6160_v32, %v3021_v48  ;;  %4343 = vpow2.f32 %v6131_v15  ;;  %v9891_v48 = vsub.f32 %v9827_v47, %v6154_v33 }
 0x249   : > { %9885 = vst [vmem:[#allocation82_spill] sm:$0xff] %v6356_v17  ;;  %9886 = vst [vmem:[#allocation85_spill] sm:$0xff] %v6358_v25  ;;  %v3080_v8 = vadd.f32 %v6346_v57, %v3079_v61  ;;  %v6366_v10 = vpop.eup %4317  ;;  %4345 = vpow2.f32 %v6136_v18  ;;  %v2501_v13 = vmul.f32 1.442695, %v9894_v38  ;;  %v6386_v57 = vpop.f32.mrf.mxu1  ;;  %v9897_v47 = vsub.f32 %v9835_v42, %v6154_v33 }
 0x24a   : > { %9888 = vst [vmem:[#allocation88_spill] sm:$0xff] %v6366_v10  ;;  %v2497_v34 = vmul.f32 1.442695, %v9891_v48  ;;  %v6376_v32 = vpop.f32.mrf.mxu0  ;;  %v6378_v61 = vpop.eup %4319  ;;  %v3023_v1 = vadd.f32 %v6173_v63, %v3022_v2  ;;  %9895 = vst [vmem:[#allocation162_spill] sm:$0xff] %v6386_v57  ;;  %4347 = vpow2.f32 %v2489_v49  ;;  %v9898_v2 = vsub.f32 %v9836_v50, %v6154_v33  ;;  %v9987_v57 = vld [vmem:[#allocation76_spill] sm:$0xff] }
 0x24b   : > { %9892 = vst [vmem:[#allocation91_spill] sm:$0xff] %v6376_v32  ;;  %9893 = vst [vmem:[#allocation94_spill] sm:$0xff] %v6378_v61  ;;  %v3081_v15 = vadd.f32 %v6358_v25, %v3080_v8  ;;  %v6388_v17 = vpop.eup %4321  ;;  %v2505_v48 = vmul.f32 1.442695, %v9897_v47  ;;  %v9899_v18 = vsub.f32 %v9837_v30, %v6154_v33  ;;  %4349 = vpow2.f32 %v2493_v7 }
 0x24c   : > { %9896 = vst [vmem:[#allocation163_spill] sm:$0xff] %v6388_v17  ;;  %v2509_v63 = vmul.f32 1.442695, %v9898_v2  ;;  %v6399_v25 = vpop.eup %4323  ;;  %v3024_v52 = vadd.f32 %v6220_v16, %v3023_v1  ;;  %v9901_v49 = vsub.f32 %v9841_v27, %v6154_v33  ;;  %4351 = vpow2.f32 %v6144_v56 }
 0x24d   : > { %v2513_v8 = vmul.f32 1.442695, %v9899_v18  ;;  %9900 = vst [vmem:[#allocation164_spill] sm:$0xff] %v6399_v25  ;;  %v3082_v38 = vadd.f32 %v6366_v10, %v3081_v15  ;;  %v6408_v47 = vpop.eup %4325  ;;  %v9903_v50 = vsub.f32 %v9843_v40, %v6154_v33  ;;  %v9904_v1 = vsub.f32 %v9844_v3, %v6154_v33  ;;  %v6426_v15 = vpop.f32.mrf.mxu0  ;;  %v9947_v10 = vld [vmem:[#allocation19_spill] sm:$0xff] }
 0x24e   : > { %v6406_v42 = vmul.f32 1.442695, %v9901_v49  ;;  %9902 = vst [vmem:[#allocation165_spill] sm:$0xff] %v6408_v47  ;;  %v9905_v7 = vsub.f32 %v9845_v19, %v6154_v33  ;;  %9906 = vst [vmem:[#allocation166_spill] sm:$0xff] %v6426_v15  ;;  %v6428_v18 = vpop.eup %4327  ;;  %v3025_v56 = vadd.f32 %v6241_v41, %v3024_v52  ;;  %4353 = vpow2.f32 %v2497_v34 }
 0x24f   : > { %v6414_v30 = vmul.f32 1.442695, %v9903_v50  ;;  %v6419_v2 = vmul.f32 1.442695, %v9904_v1  ;;  %9907 = vst [vmem:[#allocation167_spill] sm:$0xff] %v6428_v18  ;;  %v3083_v40 = vadd.f32 %v6378_v61, %v3082_v38  ;;  %v9908_v49 = vsub.f32 %v9849_v62, %v6154_v33  ;;  %v6437_v50 = vpop.f32.mrf.mxu1  ;;  %v6439_v1 = vpop.eup %4329 }
 0x250   : > { %v6424_v27 = vmul.f32 1.442695, %v9905_v7  ;;  %9909 = vst [vmem:[#allocation168_spill] sm:$0xff] %v6437_v50  ;;  %9910 = vst [vmem:[#allocation169_spill] sm:$0xff] %v6439_v1  ;;  %4355 = vpow2.f32 %v6149_v21  ;;  %v9911_v19 = vsub.f32 %v9851_v26, %v6154_v33  ;;  %v9912_v52 = vsub.f32 %v9852_v31, %v6154_v33  ;;  %v9967_v50 = vld [vmem:[#allocation48_spill] sm:$0xff] }
 0x251   : > { %v6435_v3 = vmul.f32 1.442695, %v9908_v49  ;;  %v9913_v62 = vsub.f32 %v9853_v46, %v6154_v33  ;;  %v6457_v49 = vpop.eup %4331  ;;  %v3026_v16 = vadd.f32 %v6261_v37, %v3025_v56  ;;  %v3084_v21 = vadd.f32 %v6388_v17, %v3083_v40  ;;  %v6484_v40 = vpop.f32.mrf.mxu0 }
 0x252   : > { %v6445_v7 = vmul.f32 1.442695, %v9911_v19  ;;  %v6450_v34 = vmul.f32 1.442695, %v9912_v52  ;;  %9914 = vst [vmem:[#allocation170_spill] sm:$0xff] %v6457_v49  ;;  %4357 = vpow2.f32 %v2501_v13  ;;  %v9915_v26 = vsub.f32 %v9857_v22, %v6154_v33  ;;  %v6466_v31 = vpop.eup %4333  ;;  %9920 = vst [vmem:[#allocation172_spill] sm:$0xff] %v6484_v40 }
 0x253   : > { %v6455_v38 = vmul.f32 1.442695, %v9913_v62  ;;  %9916 = vst [vmem:[#allocation171_spill] sm:$0xff] %v6466_v31  ;;  %4359 = vpow2.f32 %v6166_v58  ;;  %v9917_v46 = vsub.f32 %v9859_v59, %v6154_v33  ;;  %v9918_v56 = vsub.f32 %v9860_v5, %v6154_v33  ;;  %v9974_v40 = vld [vmem:[#allocation63_spill] sm:$0xff] }
 0x254   : > { %v6464_v19 = vmul.f32 1.442695, %v9915_v26  ;;  %v9919_v13 = vsub.f32 %v9861_v23, %v6154_v33  ;;  %v6486_v26 = vpop.eup %4335  ;;  %v3027_v58 = vadd.f32 %v6281_v43, %v3026_v16  ;;  %v3085_v59 = vadd.f32 %v6399_v25, %v3084_v21  ;;  %v9954_v25 = vld [vmem:[#allocation27_spill] sm:$0xff] }
 0x255   : > { %v6472_v52 = vmul.f32 1.442695, %v9917_v46  ;;  %v6477_v62 = vmul.f32 1.442695, %v9918_v56  ;;  %9921 = vst [vmem:[#allocation173_spill] sm:$0xff] %v6486_v26  ;;  %4361 = vpow2.f32 %v2505_v48  ;;  %v9922_v46 = vsub.f32 %v9865_v36, %v6154_v33  ;;  %v6495_v56 = vpop.f32.mrf.mxu1  ;;  %v6497_v41 = vpop.eup %4337 }
 0x256   : > { %v6482_v22 = vmul.f32 1.442695, %v9919_v13  ;;  %9923 = vst [vmem:[#allocation174_spill] sm:$0xff] %v6495_v56  ;;  %9924 = vst [vmem:[#allocation175_spill] sm:$0xff] %v6497_v41  ;;  %4363 = vpow2.f32 %v6171_v35  ;;  %v9925_v23 = vsub.f32 %v9867_v53, %v6154_v33  ;;  %v9926_v16 = vsub.f32 %v9868_v44, %v6154_v33  ;;  %v9980_v56 = vld [vmem:[#allocation67_spill] sm:$0xff] }
 0x257   : > { %v6493_v5 = vmul.f32 1.442695, %v9922_v46  ;;  %v9927_v36 = vsub.f32 %v9869_v45, %v6154_v33  ;;  %v6515_v46 = vpop.eup %4339  ;;  %v3028_v37 = vadd.f32 %v6301_v55, %v3027_v58  ;;  %v3086_v35 = vadd.f32 %v6408_v47, %v3085_v59  ;;  %v6542_v59 = vpop.f32.mrf.mxu0 }
 0x258   : > { %v6503_v13 = vmul.f32 1.442695, %v9925_v23  ;;  %v6508_v48 = vmul.f32 1.442695, %v9926_v16  ;;  %9928 = vst [vmem:[#allocation176_spill] sm:$0xff] %v6515_v46  ;;  %4365 = vpow2.f32 %v2509_v63  ;;  %v9929_v53 = vsub.f32 %v9873_v60, %v6154_v33  ;;  %v6524_v44 = vpop.eup %4341  ;;  %9934 = vst [vmem:[#allocation178_spill] sm:$0xff] %v6542_v59 }
 0x259   : > { %v6513_v21 = vmul.f32 1.442695, %v9927_v36  ;;  %9930 = vst [vmem:[#allocation177_spill] sm:$0xff] %v6524_v44  ;;  %4367 = vpow2.f32 %v6179_v24  ;;  %v9931_v45 = vsub.f32 %v9875_v6, %v6154_v33  ;;  %v9932_v58 = vsub.f32 %v9876_v11, %v6154_v33  ;;  %v9994_v59 = vld [vmem:[#allocation83_spill] sm:$0xff] }
 0x25a   : > { %v6522_v23 = vmul.f32 1.442695, %v9929_v53  ;;  %v9933_v63 = vsub.f32 %v9877_v51, %v6154_v33  ;;  %v6544_v53 = vpop.eup %4343  ;;  %v3029_v24 = vadd.f32 %v6321_v39, %v3028_v37  ;;  %v3087_v6 = vadd.f32 %v6428_v18, %v3086_v35  ;;  %v9952_v39 = vld [vmem:[#allocation22_spill] sm:$0xff]  ;;  %v9966_v18 = vld [vmem:[#allocation45_spill] sm:$0xff] }
 0x25b   : > { %v6530_v16 = vmul.f32 1.442695, %v9931_v45  ;;  %v6535_v36 = vmul.f32 1.442695, %v9932_v58  ;;  %9935 = vst [vmem:[#allocation179_spill] sm:$0xff] %v6544_v53  ;;  %4369 = vpow2.f32 %v2513_v8  ;;  %v9936_v45 = vsub.f32 %v9879_v20, %v6154_v33  ;;  %v6553_v58 = vpop.f32.mrf.mxu1  ;;  %v6555_v43 = vpop.eup %4345 }
 0x25c   : > { %v6540_v60 = vmul.f32 1.442695, %v9933_v63  ;;  %9937 = vst [vmem:[#allocation180_spill] sm:$0xff] %v6553_v58  ;;  %9938 = vst [vmem:[#allocation181_spill] sm:$0xff] %v6555_v43  ;;  %4371 = vpow2.f32 %v6184_v28  ;;  %v9939_v51 = vsub.f32 %v9882_v29, %v6154_v33  ;;  %v9940_v37 = vsub.f32 %v9883_v14, %v6154_v33  ;;  %v9961_v58 = vld [vmem:[#allocation42_spill] sm:$0xff] }
 0x25d   : > { %v6551_v11 = vmul.f32 1.442695, %v9936_v45  ;;  %v9941_v20 = vsub.f32 %v9889_v12, %v6154_v33  ;;  %v6573_v45 = vpop.eup %4347  ;;  %v3030_v55 = vrot.slane %v3029_v24, 4  ;;  %v3088_v28 = vadd.f32 %v6439_v1, %v3087_v6  ;;  %v9945_v12 = vld [vmem:[#allocation11_spill] sm:$0xff]  ;;  %v6591_v1 = vpop.f32.mrf.mxu0  ;;  %v9953_v6 = vld [vmem:[#allocation24_spill] sm:$0xff] }
 0x25e   : > { %v6561_v63 = vmul.f32 1.442695, %v9939_v51  ;;  %v6566_v8 = vmul.f32 1.442695, %v9940_v37  ;;  %9942 = vst [vmem:[#allocation182_spill] sm:$0xff] %v6573_v45  ;;  %4373 = vpow2.f32 %v6406_v42  ;;  %v9943_v29 = vsub.f32 %v9890_v9, %v6154_v33  ;;  %v6582_v14 = vpop.eup %4349  ;;  %9948 = vst [vmem:[#allocation11_spill] sm:$0xff] %v6591_v1 }
 0x25f   : > { %v6571_v35 = vmul.f32 1.442695, %v9941_v20  ;;  %9944 = vst [vmem:[#allocation183_spill] sm:$0xff] %v6582_v14  ;;  %4375 = vpow2.f32 %v6189_v4  ;;  %v9946_v20 = vld [vmem:[#allocation15_spill] sm:$0xff]  ;;  %v6593_v42 = vpop.eup %4351  ;;  %v3031_v9 = vadd.f32 %v3030_v55, %v3029_v24  ;;  %v3089_v33 = vadd.f32 %v6457_v49, %v3088_v28  ;;  %v9955_v24 = vld [vmem:[#allocation30_spill] sm:$0xff]  ;;  %v9959_v55 = vld [vmem:[#allocation36_spill] sm:$0xff] }
 0x260   : > { %v6580_v51 = vmul.f32 1.442695, %v9943_v29  ;;  %9949 = vst [vmem:[#allocation15_spill] sm:$0xff] %v6593_v42  ;;  %4377 = vpow2.f32 %v6414_v30  ;;  %v3036_v4 = vadd.f32 %v6582_v14, %v6573_v45  ;;  %v6599_v29 = vpop.f32.mrf.mxu1  ;;  %v6601_v37 = vpop.eup %4353  ;;  %v9957_v14 = vld [vmem:[#allocation33_spill] sm:$0xff]  ;;  %v9960_v28 = vld [vmem:[#allocation39_spill] sm:$0xff] }
 0x261   : > { %9950 = vst [vmem:[#allocation19_spill] sm:$0xff] %v6599_v29  ;;  %9951 = vst [vmem:[#allocation184_spill] sm:$0xff] %v6601_v37  ;;  %v6611_v30 = vpop.eup %4355  ;;  %v3090_v49 = vadd.f32 %v6466_v31, %v3089_v33  ;;  %4379 = vpow2.f32 %v6419_v2  ;;  %v6627_v31 = vpop.f32.mrf.mxu0  ;;  %v9968_v29 = vld [vmem:[#allocation51_spill] sm:$0xff]  ;;  %v9973_v1 = vld [vmem:[#allocation61_spill] sm:$0xff] }
 0x262   : > { %9956 = vst [vmem:[#allocation22_spill] sm:$0xff] %v6611_v30  ;;  %v3037_v45 = vadd.f32 %v6601_v37, %v3036_v4  ;;  %v6618_v47 = vpop.eup %4357  ;;  %4381 = vpow2.f32 %v6424_v27  ;;  %9962 = vst [vmem:[#allocation27_spill] sm:$0xff] %v6627_v31  ;;  %v3032_v4 = vrot.slane %v3031_v9, 2  ;;  %v6634_v37 = vpop.f32.mrf.mxu1 }
 0x263   : > { %9958 = vst [vmem:[#allocation24_spill] sm:$0xff] %v6618_v47  ;;  %v6629_v2 = vpop.eup %4359  ;;  %v3091_v61 = vadd.f32 %v6486_v26, %v3090_v49  ;;  %4383 = vpow2.f32 %v6435_v3  ;;  %9964 = vst [vmem:[#allocation33_spill] sm:$0xff] %v6634_v37 }
 0x264   : > { %9963 = vst [vmem:[#allocation30_spill] sm:$0xff] %v6629_v2  ;;  %v3038_v27 = vadd.f32 %v6618_v47, %v3037_v45  ;;  %v6636_v17 = vpop.eup %4361  ;;  %4385 = vpow2.f32 %v6445_v7  ;;  %v9970_v45 = vld [vmem:[#allocation54_spill] sm:$0xff]  ;;  %v3033_v26 = vadd.f32 %v3032_v4, %v3031_v9  ;;  %v6669_v32 = vpop.f32.mrf.mxu1  ;;  %v9982_v9 = vld [vmem:[#allocation71_spill] sm:$0xff]  ;;  %v10001_v4 = vsub.f32 %v9946_v20, %v6202_v54 }
 0x265   : > { %9965 = vst [vmem:[#allocation36_spill] sm:$0xff] %v6636_v17  ;;  %v6645_v49 = vpop.eup %4363  ;;  %4387 = vpow2.f32 %v6450_v34  ;;  %v9971_v7 = vld [vmem:[#allocation58_spill] sm:$0xff]  ;;  %v9975_v34 = vld [vmem:[#allocation65_spill] sm:$0xff]  ;;  %v3092_v47 = vadd.f32 %v6497_v41, %v3091_v61  ;;  %9978 = vst [vmem:[#allocation51_spill] sm:$0xff] %v6669_v32 }
 0x266   : > { %9969 = vst [vmem:[#allocation39_spill] sm:$0xff] %v6645_v49  ;;  %v3039_v3 = vadd.f32 %v6636_v17, %v3038_v27  ;;  %v6653_v37 = vpop.eup %4365  ;;  %4389 = vpow2.f32 %v6455_v38  ;;  %v6662_v27 = vpop.f32.mrf.mxu0  ;;  %v3034_v41 = vrot.slane %v3033_v26, 1 }
 0x267   : > { %9972 = vst [vmem:[#allocation42_spill] sm:$0xff] %v6653_v37  ;;  %9976 = vst [vmem:[#allocation45_spill] sm:$0xff] %v6662_v27  ;;  %v6664_v17 = vpop.eup %4367  ;;  %4391 = vpow2.f32 %v6464_v19  ;;  %v9981_v27 = vld [vmem:[#allocation69_spill] sm:$0xff] }
 0x268   : > { %9977 = vst [vmem:[#allocation48_spill] sm:$0xff] %v6664_v17  ;;  %v3040_v38 = vadd.f32 %v6653_v37, %v3039_v3  ;;  %v6671_v33 = vpop.eup %4369  ;;  %4393 = vpow2.f32 %v6472_v52  ;;  %v9984_v3 = vld [vmem:[#allocation73_spill] sm:$0xff]  ;;  %v9985_v52 = vld [vmem:[#allocation74_spill] sm:$0xff]  ;;  %v3093_v37 = vadd.f32 %v6515_v46, %v3092_v47  ;;  %v9998_v46 = vsub.f32 %v9945_v12, %v6202_v54 }
 0x269   : > { %9979 = vst [vmem:[#allocation54_spill] sm:$0xff] %v6671_v33  ;;  %v6680_v61 = vpop.eup %4371  ;;  %4395 = vpow2.f32 %v6477_v62 }
 0x26a   : > { %9983 = vst [vmem:[#allocation58_spill] sm:$0xff] %v6680_v61  ;;  %v3041_v19 = vadd.f32 %v6671_v33, %v3040_v38  ;;  %4397 = vpow2.f32 %v6482_v22  ;;  %v6697_v38 = vpop.f32.mrf.mxu0  ;;  %v6704_v61 = vpop.f32.mrf.mxu1  ;;  %v3094_v12 = vadd.f32 %v6524_v44, %v3093_v37 }
 0x26b   : > { %v6688_v32 = vpop.eup %4373  ;;  %9990 = vst [vmem:[#allocation63_spill] sm:$0xff] %v6697_v38  ;;  %4399 = vpow2.f32 %v6493_v5  ;;  %9992 = vst [vmem:[#allocation67_spill] sm:$0xff] %v6704_v61  ;;  %v9995_v38 = vld [vmem:[#allocation86_spill] sm:$0xff] }
 0x26c   : > { %9986 = vst [vmem:[#allocation61_spill] sm:$0xff] %v6688_v32  ;;  %v6699_v33 = vpop.eup %4375  ;;  %v3042_v22 = vadd.f32 %v6688_v32, %v3041_v19  ;;  %4401 = vpow2.f32 %v6503_v13  ;;  %v2617_v13 = vmul.f32 1.442695, %v9998_v46  ;;  %v6733_v19 = vpop.f32.mrf.mxu0  ;;  %v3035_v46 = vadd.f32 %v3034_v41, %v3033_v26 }
 0x26d   : > { %9991 = vst [vmem:[#allocation65_spill] sm:$0xff] %v6699_v33  ;;  %v6706_v31 = vpop.eup %4377  ;;  %v9996_v33 = vld [vmem:[#allocation89_spill] sm:$0xff]  ;;  %4403 = vpow2.f32 %v6508_v48  ;;  %v2621_v48 = vmul.f32 1.442695, %v10001_v4  ;;  %v6740_v15 = vpop.f32.mrf.mxu1  ;;  %v10006_v4 = vsub.f32 %v9953_v6, %v6202_v54  ;;  %v10007_v26 = vsub.f32 %v9954_v25, %v6202_v54 }
 0x26e   : > { %9993 = vst [vmem:[#allocation69_spill] sm:$0xff] %v6706_v31  ;;  %v3043_v47 = vadd.f32 %v6706_v31, %v3042_v22  ;;  %v6722_v32 = vpop.eup %4379  ;;  %4405 = vpow2.f32 %v6513_v21  ;;  %v10002_v22 = vsub.f32 %v9947_v10, %v6202_v54  ;;  %v10005_v10 = vsub.f32 %v9952_v39, %v6202_v54 }
 0x26f   : > { %9999 = vst [vmem:[#allocation71_spill] sm:$0xff] %v6722_v32  ;;  %v6735_v61 = vpop.eup %4381  ;;  %4407 = vpow2.f32 %v6522_v23  ;;  %v2633_v41 = vmul.f32 1.442695, %v10006_v4  ;;  %v2637_v23 = vmul.f32 1.442695, %v10007_v26  ;;  %v10010_v39 = vsub.f32 %v9957_v14, %v6202_v54  ;;  %v6782_v14 = vpop.f32.mrf.mxu0 }
 0x270   : > { %v2625_v31 = vmul.f32 1.442695, %v10002_v22  ;;  %10003 = vst [vmem:[#allocation73_spill] sm:$0xff] %v6735_v61  ;;  %v3044_v21 = vadd.f32 %v6722_v32, %v3043_v47  ;;  %v6742_v62 = vpop.eup %4383  ;;  %4409 = vpow2.f32 %v6530_v16  ;;  %v2629_v20 = vmul.f32 1.442695, %v10005_v10  ;;  %v6792_v44 = vpop.f32.mrf.mxu1 }
 0x271   : > { %10004 = vst [vmem:[#allocation74_spill] sm:$0xff] %v6742_v62  ;;  %v6754_v37 = vpop.eup %4385  ;;  %4411 = vpow2.f32 %v2617_v13  ;;  %v10009_v16 = vsub.f32 %v9955_v24, %v6202_v54  ;;  %v6763_v10 = vmul.f32 1.442695, %v10010_v39  ;;  %v10012_v25 = vsub.f32 %v9959_v55, %v6202_v54  ;;  %v10016_v39 = vld [vmem:[#allocation104_spill] sm:$0xff]  ;;  %10019 = vst [vmem:[#allocation89_spill] sm:$0xff] %v6792_v44  ;;  %v10045_v44 = vld [vmem:[#allocation113_spill] sm:$0xff] }
 0x272   : > { %10008 = vst [vmem:[#allocation76_spill] sm:$0xff] %v6754_v37  ;;  %v3045_v47 = vadd.f32 %v6735_v61, %v3044_v21  ;;  %v6765_v6 = vpop.eup %4387  ;;  %4413 = vpow2.f32 %v2621_v48  ;;  %v10013_v13 = vsub.f32 %v9960_v28, %v6202_v54  ;;  %v10014_v24 = vsub.f32 %v9961_v58, %v6202_v54  ;;  %v10026_v61 = vld [vmem:[#allocation16_spill] sm:$0xff] }
 0x273   : > { %v2641_v22 = vmul.f32 1.442695, %v10009_v16  ;;  %10011 = vst [vmem:[#allocation83_spill] sm:$0xff] %v6765_v6  ;;  %v6770_v4 = vmul.f32 1.442695, %v10012_v25  ;;  %v6784_v16 = vpop.eup %4389  ;;  %4415 = vrcp.f32 %v3035_v46  ;;  %v3095_v48 = vadd.f32 %v6544_v53, %v3094_v12  ;;  %v10017_v25 = vld [vmem:[#allocation100_spill] sm:$0xff] }
 0x274   : > { %v6775_v21 = vmul.f32 1.442695, %v10013_v13  ;;  %v6780_v26 = vmul.f32 1.442695, %v10014_v24  ;;  %10015 = vst [vmem:[#allocation86_spill] sm:$0xff] %v6784_v16  ;;  %v3046_v55 = vadd.f32 %v6742_v62, %v3045_v47  ;;  %v10018_v28 = vmax.f32 %v5677_v0, %v10017_v25  ;;  %v6794_v32 = vpop.eup %4391  ;;  %v10035_v25 = vld [vmem:[#allocation105_spill] sm:$0xff] }
 0x275   : > { %10020 = vst [vmem:[#allocation185_spill] sm:$0xff] %v6794_v32  ;;  %4417 = vpow2.f32 %v2625_v31  ;;  %v10021_v58 = vsub.f32 %v9966_v18, %v6202_v54  ;;  %v10022_v46 = vsub.f32 %v9967_v50, %v6202_v54  ;;  %v10023_v47 = vsub.f32 %v9968_v29, %v6202_v54  ;;  %v10036_v0 = vld [vmem:[#allocation97_spill] sm:$0xff] }
 0x276   : > { %v2084_v13 = vmax.f32 %v10018_v28, %v10016_v39  ;;  %v6811_v28 = vpop.eup %4393  ;;  %4419 = vpow2.f32 %v6535_v36  ;;  %v3047_v31 = vadd.f32 %v6754_v37, %v3046_v55  ;;  %v10025_v18 = vsub.f32 %v9970_v45, %v6202_v54  ;;  %v10037_v62 = vld [vmem:[#allocation101_spill] sm:$0xff]  ;;  %v10040_v37 = vld [vmem:[#allocation98_spill] sm:$0xff] }
 0x277   : > { %v6799_v24 = vmul.f32 1.442695, %v10021_v58  ;;  %v6804_v12 = vmul.f32 1.442695, %v10022_v46  ;;  %v6809_v53 = vmul.f32 1.442695, %v10023_v47  ;;  %v6821_v46 = vpop.eup %4395  ;;  %4421 = vpow2.f32 %v2629_v20 }
 0x278   : > { %10024 = vst [vmem:[#allocation186_spill] sm:$0xff] %v6811_v28  ;;  %v6818_v58 = vmul.f32 1.442695, %v10025_v18  ;;  %v2085_v50 = vmax.f32 %v2084_v13, %v10026_v61  ;;  %10027 = vst [vmem:[#allocation187_spill] sm:$0xff] %v6821_v46  ;;  %v10028_v29 = vsub.f32 %v9971_v7, %v6202_v54  ;;  %v10029_v36 = vsub.f32 %v9973_v1, %v6202_v54  ;;  %v6838_v18 = vpop.f32.mrf.mxu0  ;;  %v6840_v13 = vpop.eup %4397 }
 0x279   : > { %v10030_v45 = vsub.f32 %v9974_v40, %v6202_v54  ;;  %10031 = vst [vmem:[#allocation188_spill] sm:$0xff] %v6840_v13  ;;  %v3096_v20 = vadd.f32 %v6555_v43, %v3095_v48  ;;  %4423 = vpow2.f32 %v6540_v60  ;;  %v3048_v7 = vadd.f32 %v6765_v6, %v3047_v31  ;;  %v6846_v1 = vpop.f32.mrf.mxu1  ;;  %v10039_v60 = vld [vmem:[#allocation8_spill] sm:$0xff]  ;;  %v10041_v31 = vld [vmem:[#allocation102_spill] sm:$0xff] }
 0x27a   : > { %v6826_v47 = vmul.f32 1.442695, %v10028_v29  ;;  %v6831_v39 = vmul.f32 1.442695, %v10029_v36  ;;  %v10032_v29 = vld [vmem:[#allocation109_spill] sm:$0xff]  ;;  %v6848_v36 = vpop.eup %4399  ;;  %4425 = vpow2.f32 %v2633_v41  ;;  %v10034_v40 = vsub.f32 %v9975_v34, %v6202_v54 }
 0x27b   : > { %v6836_v55 = vmul.f32 1.442695, %v10030_v45  ;;  %v2086_v61 = vmax.f32 %v2085_v50, %v10032_v29  ;;  %10033 = vst [vmem:[#allocation189_spill] sm:$0xff] %v6848_v36  ;;  %v10038_v48 = vmax.f32 %v10036_v0, %v10037_v62  ;;  %v10042_v6 = vmax.f32 %v10040_v37, %v10041_v31  ;;  %v6863_v29 = vpop.eup %4401  ;;  %v6894_v0 = vpop.f32.mrf.mxu1 }
 0x27c   : > { %v6853_v45 = vmul.f32 1.442695, %v10034_v40  ;;  %10043 = vst [vmem:[#allocation190_spill] sm:$0xff] %v6863_v29  ;;  %4427 = vpow2.f32 %v6551_v11  ;;  %v3049_v41 = vadd.f32 %v6784_v16, %v3048_v7  ;;  %v10044_v34 = vsub.f32 %v9980_v56, %v6202_v54  ;;  %v6873_v62 = vpop.eup %4403  ;;  %v10049_v11 = vld [vmem:[#allocation107_spill] sm:$0xff]  ;;  %v6882_v7 = vpop.f32.mrf.mxu0  ;;  %10053 = vst [vmem:[#allocation193_spill] sm:$0xff] %v6894_v0 }
 0x27d   : > { %v2158_v43 = vmax.f32 %v10038_v48, %v10035_v25  ;;  %v2121_v50 = vmax.f32 %v10042_v6, %v10039_v60  ;;  %v2087_v5 = vmax.f32 %v2086_v61, %v10045_v44  ;;  %10046 = vst [vmem:[#allocation191_spill] sm:$0xff] %v6873_v62  ;;  %4429 = vpow2.f32 %v2637_v23  ;;  %v10048_v60 = vld [vmem:[#allocation106_spill] sm:$0xff]  ;;  %v6884_v25 = vpop.eup %4405 }
 0x27e   : > { %v6870_v40 = vmul.f32 1.442695, %v10044_v34  ;;  %v10047_v48 = vsub.f32 %v9981_v27, %v6202_v54  ;;  %10050 = vst [vmem:[#allocation192_spill] sm:$0xff] %v6884_v25  ;;  %v3097_v56 = vadd.f32 %v6593_v42, %v3096_v20  ;;  %v3050_v61 = vadd.f32 %v6794_v32, %v3049_v41  ;;  %v10052_v27 = vld [vmem:[#allocation117_spill] sm:$0xff]  ;;  %v10056_v20 = vld [vmem:[#allocation110_spill] sm:$0xff]  ;;  %v10057_v41 = vld [vmem:[#allocation111_spill] sm:$0xff] }
 0x27f   : > { %v2159_v31 = vmax.f32 %v2158_v43, %v10048_v60  ;;  %v2122_v37 = vmax.f32 %v2121_v50, %v10049_v11  ;;  %v10051_v23 = vsub.f32 %v9982_v9, %v6202_v54  ;;  %v6896_v43 = vpop.eup %4407  ;;  %4431 = vpow2.f32 %v2641_v22  ;;  %v10063_v32 = vld [vmem:[#allocation9_spill] sm:$0xff] }
 0x280   : > { %v6878_v6 = vmul.f32 1.442695, %v10047_v48  ;;  %v2088_v48 = vmax.f32 %v2087_v5, %v10052_v27  ;;  %10054 = vst [vmem:[#allocation194_spill] sm:$0xff] %v6896_v43  ;;  %v10055_v50 = vsub.f32 %v9984_v3, %v6202_v54  ;;  %v6905_v44 = vpop.eup %4409  ;;  %4433 = vpow2.f32 %v6561_v63  ;;  %v10059_v5 = vld [vmem:[#allocation12_spill] sm:$0xff]  ;;  %v10061_v27 = vld [vmem:[#allocation103_spill] sm:$0xff] }
 0x281   : > { %v6891_v34 = vmul.f32 1.442695, %v10051_v23  ;;  %v2160_v42 = vmax.f32 %v2159_v31, %v10056_v20  ;;  %v2123_v60 = vmax.f32 %v2122_v37, %v10057_v41  ;;  %10058 = vst [vmem:[#allocation195_spill] sm:$0xff] %v6905_v44  ;;  %v3051_v9 = vadd.f32 %v6811_v28, %v3050_v61  ;;  %v10060_v23 = vld [vmem:[#allocation99_spill] sm:$0xff]  ;;  %v6914_v3 = vpop.eup %4411  ;;  %v6924_v28 = vpop.f32.mrf.mxu0 }
 0x282   : > { %v6901_v11 = vmul.f32 1.442695, %v10055_v50  ;;  %v10062_v16 = vmax.f32 %v10060_v23, %v10061_v27  ;;  %v2089_v0 = vmax.f32 %v2088_v48, %v10063_v32  ;;  %10064 = vst [vmem:[#allocation196_spill] sm:$0xff] %v6914_v3  ;;  %4435 = vpow2.f32 %v6763_v10  ;;  %v10066_v50 = vld [vmem:[#allocation114_spill] sm:$0xff]  ;;  %v10067_v41 = vld [vmem:[#allocation115_spill] sm:$0xff]  ;;  %v6926_v20 = vpop.eup %4413  ;;  %v6932_v32 = vpop.f32.mrf.mxu1 }
 0x283   : > { %v10065_v37 = vsub.f32 %v9985_v52, %v6202_v54  ;;  %v2161_v63 = vmax.f32 %v2160_v42, %v10066_v50  ;;  %v2124_v61 = vmax.f32 %v2123_v60, %v10067_v41  ;;  %10068 = vst [vmem:[#allocation197_spill] sm:$0xff] %v6926_v20  ;;  %v3052_v48 = vadd.f32 %v6821_v46, %v3051_v9  ;;  %v10070_v10 = vld [vmem:[#allocation126_spill] sm:$0xff]  ;;  %v6934_v52 = vpop.eup %4415  ;;  %v10073_v41 = vld [vmem:[#allocation119_spill] sm:$0xff]  ;;  %v10076_v46 = vld [vmem:[#allocation112_spill] sm:$0xff] }
 0x284   : > { %v2195_v22 = vmax.f32 %v10062_v16, %v10059_v5  ;;  %v3098_v16 = vadd.f32 %v6611_v30, %v3097_v56  ;;  %v10069_v5 = vld [vmem:[#allocation108_spill] sm:$0xff]  ;;  %v2090_v23 = vmax.f32 %v2089_v0, %v10070_v10  ;;  %10071 = vst [vmem:[#allocation198_spill] sm:$0xff] %v6934_v52  ;;  %4437 = vpow2.f32 %v6770_v4  ;;  %v10072_v60 = vld [vmem:[#allocation118_spill] sm:$0xff]  ;;  %v6941_v56 = vpop.eup %4417 }
 0x285   : > { %v6920_v31 = vmul.f32 1.442695, %v10065_v37  ;;  %v3110_v42 = vadd.f32 %v6926_v20, %v6914_v3  ;;  %v2162_v37 = vmax.f32 %v2161_v63, %v10072_v60  ;;  %v2125_v50 = vmax.f32 %v2124_v61, %v10073_v41  ;;  %10074 = vst [vmem:[#allocation199_spill] sm:$0xff] %v6941_v56  ;;  %v6951_v10 = vpop.eup %4419  ;;  %v10079_v61 = vld [vmem:[#allocation13_spill] sm:$0xff]  ;;  %v10080_v20 = vld [vmem:[#allocation123_spill] sm:$0xff] }
 0x286   : > { %v2196_v27 = vmax.f32 %v2195_v22, %v10069_v5  ;;  %v3053_v9 = vadd.f32 %v6840_v13, %v3052_v48  ;;  %v10075_v0 = vsub.f32 %v9987_v57, %v6202_v54  ;;  %v10077_v5 = vld [vmem:[#allocation17_spill] sm:$0xff]  ;;  %10078 = vst [vmem:[#allocation200_spill] sm:$0xff] %v6951_v10  ;;  %4439 = vpow2.f32 %v6775_v21  ;;  %v6957_v48 = vpop.f32.mrf.mxu0  ;;  %v6959_v13 = vpop.eup %4421 }
 0x287   : > { %v2091_v4 = vmax.f32 %v2090_v23, %v10077_v5  ;;  %v3111_v63 = vadd.f32 %v6941_v56, %v3110_v42  ;;  %v2163_v3 = vmax.f32 %v2162_v37, %v10079_v61  ;;  %v2126_v41 = vmax.f32 %v2125_v50, %v10080_v20  ;;  %10081 = vst [vmem:[#allocation201_spill] sm:$0xff] %v6959_v13  ;;  %v6965_v5 = vpop.f32.mrf.mxu1  ;;  %v6967_v21 = vpop.eup %4423  ;;  %v10086_v42 = vld [vmem:[#allocation127_spill] sm:$0xff]  ;;  %v10087_v56 = vld [vmem:[#allocation129_spill] sm:$0xff] }
 0x288   : > { %v6947_v22 = vmul.f32 1.442695, %v10075_v0  ;;  %v2197_v30 = vmax.f32 %v2196_v27, %v10076_v46  ;;  %v3099_v57 = vadd.f32 %v6629_v2, %v3098_v16  ;;  %v3054_v27 = vadd.f32 %v6848_v36, %v3053_v9  ;;  %v10082_v0 = vld [vmem:[#allocation116_spill] sm:$0xff]  ;;  %v10083_v46 = vld [vmem:[#allocation37_spill] sm:$0xff]  ;;  %10085 = vst [vmem:[#allocation202_spill] sm:$0xff] %v6967_v21  ;;  %v6973_v61 = vpop.eup %4425 }
 0x289   : > { %v2092_v60 = vmax.f32 %v2091_v4, %v10083_v46  ;;  %10084 = vst [vmem:[#allocation37_spill] sm:$0xff] %v6965_v5  ;;  %4441 = vpow2.f32 %v6780_v26  ;;  %v3112_v50 = vadd.f32 %v6959_v13, %v3111_v63  ;;  %v2164_v37 = vmax.f32 %v2163_v3, %v10086_v42  ;;  %10088 = vst [vmem:[#allocation203_spill] sm:$0xff] %v6973_v61  ;;  %v10089_v16 = vld [vmem:[#allocation120_spill] sm:$0xff]  ;;  %v10090_v4 = vld [vmem:[#allocation59_spill] sm:$0xff]  ;;  %v6979_v2 = vpop.eup %4427  ;;  %v6993_v42 = vpop.f32.mrf.mxu1 }
 0x28a   : > { %v2198_v23 = vmax.f32 %v2197_v30, %v10082_v0  ;;  %v2127_v20 = vmax.f32 %v2126_v41, %v10087_v56  ;;  %4443 = vpow2.f32 %v6566_v8  ;;  %v3055_v30 = vadd.f32 %v6863_v29, %v3054_v27  ;;  %10091 = vst [vmem:[#allocation59_spill] sm:$0xff] %v6979_v2  ;;  %v10092_v63 = vld [vmem:[#allocation20_spill] sm:$0xff]  ;;  %v6985_v0 = vpop.f32.mrf.mxu0  ;;  %v6987_v56 = vpop.eup %4429  ;;  %v10096_v29 = vld [vmem:[#allocation87_spill] sm:$0xff] }
 0x28b   : > { %v2093_v36 = vmax.f32 %v2092_v60, %v10090_v4  ;;  %4445 = vpow2.f32 %v6799_v24  ;;  %v3113_v26 = vadd.f32 %v6973_v61, %v3112_v50  ;;  %v2165_v3 = vmax.f32 %v2164_v37, %v10092_v63  ;;  %v10093_v13 = vld [vmem:[#allocation28_spill] sm:$0xff]  ;;  %10094 = vst [vmem:[#allocation204_spill] sm:$0xff] %v6987_v56  ;;  %v10098_v37 = vld [vmem:[#allocation46_spill] sm:$0xff] }
 0x28c   : > { %v2199_v9 = vmax.f32 %v2198_v23, %v10089_v16  ;;  %v2128_v41 = vmax.f32 %v2127_v20, %v10093_v13  ;;  %v3100_v8 = vadd.f32 %v6645_v49, %v3099_v57  ;;  %v3056_v27 = vadd.f32 %v6873_v62, %v3055_v30  ;;  %v10095_v23 = vld [vmem:[#allocation124_spill] sm:$0xff]  ;;  %v6999_v13 = vpop.eup %4431  ;;  %v10100_v30 = vld [vmem:[#allocation130_spill] sm:$0xff] }
 0x28d   : > { %v2094_v16 = vmax.f32 %v2093_v36, %v10096_v29  ;;  %4447 = vpow2.f32 %v6804_v12  ;;  %v3114_v24 = vadd.f32 %v6987_v56, %v3113_v26  ;;  %v10097_v50 = vld [vmem:[#allocation40_spill] sm:$0xff]  ;;  %10099 = vst [vmem:[#allocation87_spill] sm:$0xff] %v6999_v13  ;;  %v10101_v62 = vld [vmem:[#allocation142_spill] sm:$0xff]  ;;  %v7005_v49 = vpop.eup %4433  ;;  %v10104_v56 = vld [vmem:[#allocation81_spill] sm:$0xff] }
 0x28e   : > { %v2200_v60 = vmax.f32 %v2199_v9, %v10095_v23  ;;  %v2166_v20 = vmax.f32 %v2165_v3, %v10097_v50  ;;  %v2129_v61 = vmax.f32 %v2128_v41, %v10098_v37  ;;  %4449 = vpow2.f32 %v6571_v35  ;;  %10102 = vst [vmem:[#allocation142_spill] sm:$0xff] %v7005_v49  ;;  %v10103_v26 = vld [vmem:[#allocation132_spill] sm:$0xff]  ;;  %v7011_v23 = vpop.f32.mrf.mxu0  ;;  %v7019_v50 = vpop.f32.mrf.mxu1 }
 0x28f   : > { %v3057_v57 = vadd.f32 %v6884_v25, %v3056_v27  ;;  %v2095_v36 = vmax.f32 %v2094_v16, %v10101_v62  ;;  %4451 = vpow2.f32 %v6809_v53  ;;  %v3115_v12 = vadd.f32 %v6999_v13, %v3114_v24  ;;  %v7013_v37 = vpop.eup %4435  ;;  %v10107_v25 = vld [vmem:[#allocation150_spill] sm:$0xff] }
 0x290   : > { %v2201_v9 = vmax.f32 %v2200_v60, %v10100_v30  ;;  %v2167_v3 = vmax.f32 %v2166_v20, %v10103_v26  ;;  %v2130_v41 = vmax.f32 %v2129_v61, %v10104_v56  ;;  %10105 = vst [vmem:[#allocation205_spill] sm:$0xff] %v7013_v37  ;;  %v3101_v35 = vadd.f32 %v6664_v17, %v3100_v8  ;;  %v10106_v60 = vld [vmem:[#allocation31_spill] sm:$0xff]  ;;  %v10109_v24 = vld [vmem:[#allocation90_spill] sm:$0xff] }
 0x291   : > { %v3058_v27 = vadd.f32 %v6896_v43, %v3057_v57  ;;  %v2096_v30 = vmax.f32 %v2095_v36, %v10107_v25  ;;  %10108 = vst [vmem:[#allocation150_spill] sm:$0xff] %v7019_v50  ;;  %4453 = vpow2.f32 %v6818_v58  ;;  %v3116_v53 = vadd.f32 %v7013_v37, %v3115_v12  ;;  %v10110_v20 = vld [vmem:[#allocation138_spill] sm:$0xff]  ;;  %v7025_v56 = vpop.eup %4437  ;;  %v10112_v57 = vld [vmem:[#allocation49_spill] sm:$0xff]  ;;  %v10114_v17 = vld [vmem:[#allocation143_spill] sm:$0xff] }
 0x292   : > { %v2202_v16 = vmax.f32 %v2201_v9, %v10106_v60  ;;  %v2168_v61 = vmax.f32 %v2167_v3, %v10109_v24  ;;  %v2131_v13 = vmax.f32 %v2130_v41, %v10110_v20  ;;  %10111 = vst [vmem:[#allocation206_spill] sm:$0xff] %v7025_v56  ;;  %4455 = vpow2.f32 %v6580_v51  ;;  %v10113_v43 = vld [vmem:[#allocation158_spill] sm:$0xff]  ;;  %v7035_v60 = vpop.f32.mrf.mxu0  ;;  %v7043_v24 = vpop.f32.mrf.mxu1 }
 0x293   : > { %v3059_v8 = vadd.f32 %v6905_v44, %v3058_v27  ;;  %v2097_v36 = vmax.f32 %v2096_v30, %v10113_v43  ;;  %4457 = vpow2.f32 %v6826_v47  ;;  %v3117_v58 = vadd.f32 %v7025_v56, %v3116_v53  ;;  %v10115_v37 = vld [vmem:[#allocation146_spill] sm:$0xff]  ;;  %10116 = vst [vmem:[#allocation158_spill] sm:$0xff] %v7035_v60  ;;  %v7037_v41 = vpop.eup %4439  ;;  %v10119_v44 = vld [vmem:[#allocation135_spill] sm:$0xff] }
 0x294   : > { %v2203_v9 = vmax.f32 %v2202_v16, %v10112_v57  ;;  %v2169_v12 = vmax.f32 %v2168_v61, %v10114_v17  ;;  %v2132_v3 = vmax.f32 %v2131_v13, %v10115_v37  ;;  %10117 = vst [vmem:[#allocation207_spill] sm:$0xff] %v7037_v41  ;;  %v10118_v20 = vld [vmem:[#allocation58_spill] sm:$0xff]  ;;  %v10120_v57 = vld [vmem:[#allocation23_spill] sm:$0xff]  ;;  %4459 = vpow2.f32 %v6831_v39  ;;  %v7073_v63 = vpop.f32.mrf.mxu1 }
 0x295   : > { %v3102_v51 = vadd.f32 %v10118_v20, %v3101_v35  ;;  %v3060_v27 = vadd.f32 %v6951_v10, %v3059_v8  ;;  %v2098_v30 = vmax.f32 %v2097_v36, %v10120_v57  ;;  %v3118_v47 = vadd.f32 %v7037_v41, %v3117_v58  ;;  %v10121_v53 = vld [vmem:[#allocation151_spill] sm:$0xff]  ;;  %v10122_v61 = vld [vmem:[#allocation154_spill] sm:$0xff] }
 0x296   : > { %v2204_v16 = vmax.f32 %v2203_v9, %v10119_v44  ;;  %v2170_v13 = vmax.f32 %v2169_v12, %v10121_v53  ;;  %v2133_v56 = vmax.f32 %v2132_v3, %v10122_v61  ;;  %v7049_v37 = vpop.eup %4441  ;;  %v10124_v20 = vld [vmem:[#allocation78_spill] sm:$0xff]  ;;  %v10126_v36 = vld [vmem:[#allocation139_spill] sm:$0xff]  ;;  %4461 = vpow2.f32 %v6836_v55  ;;  %v10134_v53 = vld [vmem:[#allocation68_spill] sm:$0xff] }
 0x297   : > { %10123 = vst [vmem:[#allocation23_spill] sm:$0xff] %v7049_v37  ;;  %v3061_v35 = vadd.f32 %v6967_v21, %v3060_v27  ;;  %v10125_v8 = vsub.f32 %v10124_v20, %v6202_v54  ;;  %v10127_v44 = vld [vmem:[#allocation47_spill] sm:$0xff]  ;;  %v7059_v39 = vpop.eup %4443  ;;  %v3119_v58 = vadd.f32 %v7049_v37, %v3118_v47  ;;  %v10130_v41 = vld [vmem:[#allocation10_spill] sm:$0xff]  ;;  %v7065_v27 = vpop.f32.mrf.mxu0  ;;  %v10132_v20 = vld [vmem:[#allocation65_spill] sm:$0xff]  ;;  %4463 = vpow2.f32 %v6853_v45 }
 0x298   : > { %v2205_v10 = vmax.f32 %v2204_v16, %v10126_v36  ;;  %v2099_v17 = vmax.f32 %v2098_v30, %v10127_v44  ;;  %10128 = vst [vmem:[#allocation78_spill] sm:$0xff] %v7059_v39  ;;  %v10129_v12 = vld [vmem:[#allocation159_spill] sm:$0xff]  ;;  %v2134_v61 = vmax.f32 %v2133_v56, %v10130_v41  ;;  %v7067_v21 = vpop.eup %4445  ;;  %10135 = vst [vmem:[#allocation68_spill] sm:$0xff] %v7073_v63  ;;  %v10136_v47 = vld [vmem:[#allocation26_spill] sm:$0xff]  ;;  %4465 = vpow2.f32 %v6870_v40 }
 0x299   : > { %v7055_v9 = vmul.f32 1.442695, %v10125_v8  ;;  %v2171_v3 = vmax.f32 %v2170_v13, %v10129_v12  ;;  %10131 = vst [vmem:[#allocation47_spill] sm:$0xff] %v7067_v21  ;;  %v3103_v8 = vadd.f32 %v10132_v20, %v3102_v51  ;;  %v3062_v16 = vadd.f32 %v6979_v2, %v3061_v35  ;;  %v10133_v36 = vld [vmem:[#allocation147_spill] sm:$0xff]  ;;  %v10139_v20 = vld [vmem:[#allocation80_spill] sm:$0xff] }
 0x29a   : > { %v2206_v30 = vmax.f32 %v2205_v10, %v10133_v36  ;;  %v2100_v26 = vmax.f32 %v2099_v17, %v10134_v53  ;;  %v3120_v55 = vadd.f32 %v7067_v21, %v3119_v58  ;;  %v10137_v13 = vld [vmem:[#allocation35_spill] sm:$0xff]  ;;  %v7079_v41 = vpop.eup %4447  ;;  %v10140_v35 = vsub.f32 %v10139_v20, %v6202_v54  ;;  %v10142_v36 = vld [vmem:[#allocation82_spill] sm:$0xff]  ;;  %v10145_v21 = vld [vmem:[#allocation60_spill] sm:$0xff] }
 0x29b   : > { %v2172_v56 = vmax.f32 %v2171_v3, %v10136_v47  ;;  %v2135_v37 = vmax.f32 %v2134_v61, %v10137_v13  ;;  %10138 = vst [vmem:[#allocation208_spill] sm:$0xff] %v7079_v41  ;;  %v3063_v51 = vadd.f32 %v7005_v49, %v3062_v16  ;;  %v10141_v17 = vld [vmem:[#allocation155_spill] sm:$0xff]  ;;  %v7089_v45 = vpop.eup %4449  ;;  %v10144_v61 = vld [vmem:[#allocation50_spill] sm:$0xff]  ;;  %v7095_v16 = vpop.f32.mrf.mxu0  ;;  %v3104_v20 = vrot.slane %v3103_v8, 4 }
 0x29c   : > { %v7085_v10 = vmul.f32 1.442695, %v10140_v35  ;;  %v2207_v2 = vmax.f32 %v2206_v30, %v10141_v17  ;;  %v2101_v12 = vmax.f32 %v2100_v26, %v10142_v36  ;;  %10143 = vst [vmem:[#allocation80_spill] sm:$0xff] %v7089_v45  ;;  %v3121_v58 = vadd.f32 %v7079_v41, %v3120_v55  ;;  %10146 = vst [vmem:[#allocation209_spill] sm:$0xff] %v7095_v16  ;;  %v7097_v49 = vpop.eup %4451  ;;  %v10148_v30 = vld [vmem:[#allocation14_spill] sm:$0xff]  ;;  %v7102_v36 = vpop.f32.mrf.mxu1 }
 0x29d   : > { %v2173_v3 = vmax.f32 %v2172_v56, %v10144_v61  ;;  %v2136_v13 = vmax.f32 %v2135_v37, %v10145_v21  ;;  %10147 = vst [vmem:[#allocation210_spill] sm:$0xff] %v7097_v49  ;;  %v3064_v35 = vadd.f32 %v7059_v39, %v3063_v51  ;;  %v10149_v26 = vld [vmem:[#allocation166_spill] sm:$0xff]  ;;  %4467 = vpow2.f32 %v6878_v6  ;;  %v10151_v37 = vld [vmem:[#allocation75_spill] sm:$0xff] }
 0x29e   : > { %v2208_v17 = vmax.f32 %v2207_v2, %v10148_v30  ;;  %v2102_v47 = vmax.f32 %v2101_v12, %v10149_v26  ;;  %v3122_v40 = vadd.f32 %v7097_v49, %v3121_v58  ;;  %v10150_v55 = vld [vmem:[#allocation70_spill] sm:$0xff]  ;;  %v7108_v21 = vpop.eup %4453  ;;  %v10153_v51 = vsub.f32 %v9994_v59, %v6202_v54 }
 0x29f   : > { %v2174_v56 = vmax.f32 %v2173_v3, %v10150_v55  ;;  %v2137_v41 = vmax.f32 %v2136_v13, %v10151_v37  ;;  %10152 = vst [vmem:[#allocation211_spill] sm:$0xff] %v7108_v21  ;;  %v3065_v61 = vadd.f32 %v7089_v45, %v3064_v35  ;;  %v10154_v12 = vld [vmem:[#allocation38_spill] sm:$0xff]  ;;  %v7118_v6 = vpop.eup %4455  ;;  %4469 = vpow2.f32 %v6891_v34  ;;  %v10158_v37 = vld [vmem:[#allocation91_spill] sm:$0xff]  ;;  %v7124_v35 = vpop.f32.mrf.mxu0 }
 0x2a0   : > { %v7114_v2 = vmul.f32 1.442695, %v10153_v51  ;;  %v2209_v39 = vmax.f32 %v2208_v17, %v10154_v12  ;;  %v10155_v30 = vld [vmem:[#allocation178_spill] sm:$0xff]  ;;  %10156 = vst [vmem:[#allocation212_spill] sm:$0xff] %v7118_v6  ;;  %v3123_v58 = vadd.f32 %v7108_v21, %v3122_v40  ;;  %v7126_v45 = vpop.eup %4457  ;;  %v3105_v59 = vadd.f32 %v3104_v20, %v3103_v8 }
 0x2a1   : > { %v2103_v26 = vmax.f32 %v2102_v47, %v10155_v30  ;;  %v10157_v13 = vld [vmem:[#allocation162_spill] sm:$0xff]  ;;  %v2138_v49 = vmax.f32 %v2137_v41, %v10158_v37  ;;  %10159 = vst [vmem:[#allocation213_spill] sm:$0xff] %v7126_v45  ;;  %v3066_v51 = vadd.f32 %v7118_v6, %v3065_v61  ;;  %v10161_v47 = vld [vmem:[#allocation27_spill] sm:$0xff]  ;;  %v7131_v30 = vpop.f32.mrf.mxu1  ;;  %4471 = vpow2.f32 %v6901_v11  ;;  %v10164_v41 = vld [vmem:[#allocation172_spill] sm:$0xff] }
 0x2a2   : > { %v2175_v3 = vmax.f32 %v2174_v56, %v10157_v13  ;;  %v10160_v17 = vld [vmem:[#allocation62_spill] sm:$0xff]  ;;  %10162 = vst [vmem:[#allocation214_spill] sm:$0xff] %v7131_v30  ;;  %v3124_v34 = vadd.f32 %v7126_v45, %v3123_v58  ;;  %v7137_v13 = vpop.eup %4459  ;;  %v10166_v8 = vsub.f32 %v9995_v38, %v6202_v54  ;;  %4473 = vpow2.f32 %v6920_v31  ;;  %v10169_v58 = vld [vmem:[#allocation19_spill] sm:$0xff]  ;;  %v10173_v38 = vld [vmem:[#allocation168_spill] sm:$0xff] }
 0x2a3   : > { %v2210_v12 = vmax.f32 %v2209_v39, %v10160_v17  ;;  %v2104_v55 = vmax.f32 %v2103_v26, %v10161_v47  ;;  %v10163_v40 = vld [vmem:[#allocation174_spill] sm:$0xff]  ;;  %v2139_v37 = vmax.f32 %v2138_v49, %v10164_v41  ;;  %10165 = vst [vmem:[#allocation215_spill] sm:$0xff] %v7137_v13  ;;  %v3067_v21 = vrot.slane %v3066_v51, 4  ;;  %v10167_v39 = vld [vmem:[#allocation77_spill] sm:$0xff]  ;;  %v10168_v26 = vld [vmem:[#allocation63_spill] sm:$0xff]  ;;  %v7148_v49 = vpop.f32.mrf.mxu0  ;;  %v7150_v41 = vpop.eup %4461 }
 0x2a4   : > { %v2176_v56 = vmax.f32 %v2175_v3, %v10163_v40  ;;  %v2729_v61 = vmul.f32 1.442695, %v10166_v8  ;;  %v3125_v11 = vadd.f32 %v7137_v13, %v3124_v34  ;;  %v10170_v3 = vld [vmem:[#allocation11_spill] sm:$0xff]  ;;  %10171 = vst [vmem:[#allocation63_spill] sm:$0xff] %v7148_v49  ;;  %10172 = vst [vmem:[#allocation19_spill] sm:$0xff] %v7150_v41  ;;  %v3106_v45 = vrot.slane %v3105_v59, 2  ;;  %v7160_v13 = vpop.eup %4463 }
 0x2a5   : > { %v2211_v20 = vmax.f32 %v2210_v12, %v10167_v39  ;;  %v2105_v6 = vmax.f32 %v2104_v55, %v10168_v26  ;;  %v2140_v40 = vmax.f32 %v2139_v37, %v10170_v3  ;;  %v3068_v47 = vadd.f32 %v3067_v21, %v3066_v51  ;;  %v7154_v39 = vpop.f32.mrf.mxu1  ;;  %v10174_v55 = vld [vmem:[#allocation51_spill] sm:$0xff]  ;;  %10176 = vst [vmem:[#allocation216_spill] sm:$0xff] %v7160_v13 }
 0x2a6   : > { %v2177_v17 = vmax.f32 %v2176_v56, %v10169_v58  ;;  %4475 = vpow2.f32 %v6947_v22  ;;  %v3126_v31 = vadd.f32 %v7150_v41, %v3125_v11  ;;  %v10175_v56 = vld [vmem:[#allocation45_spill] sm:$0xff]  ;;  %v10177_v21 = vsub.f32 %v9996_v33, %v6202_v54  ;;  %v7173_v41 = vpop.eup %4465 }
 0x2a7   : > { %v2212_v8 = vmax.f32 %v2211_v20, %v10173_v38  ;;  %v2106_v12 = vmax.f32 %v2105_v6, %v6782_v14  ;;  %v2141_v37 = vmax.f32 %v2140_v40, %v10175_v56  ;;  %v3069_v3 = vrot.slane %v3068_v47, 2  ;;  %v10178_v20 = vld [vmem:[#allocation180_spill] sm:$0xff]  ;;  %v7171_v40 = vpop.f32.mrf.mxu0  ;;  %10179 = vst [vmem:[#allocation217_spill] sm:$0xff] %v7173_v41  ;;  %v10180_v33 = vld [vmem:[#allocation33_spill] sm:$0xff] }
 0x2a8   : > { %v2178_v34 = vmax.f32 %v2177_v17, %v10174_v55  ;;  %v2733_v51 = vmul.f32 1.442695, %v10177_v21  ;;  %4477 = vpow2.f32 %v7055_v9  ;;  %v3127_v22 = vadd.f32 %v7160_v13, %v3126_v31  ;;  %v10183_v13 = vld [vmem:[#allocation92_spill] sm:$0xff] }
 0x2a9   : > { %v2213_v38 = vmax.f32 %v2212_v8, %v10178_v20  ;;  %v2107_v6 = vmax.f32 %v2106_v12, %v6882_v7  ;;  %v2142_v17 = vmax.f32 %v2141_v37, %v6733_v19  ;;  %v3107_v56 = vadd.f32 %v3106_v45, %v3105_v59  ;;  %v7177_v20 = vpop.f32.mrf.mxu1 }
 0x2aa   : > { %v2179_v11 = vmax.f32 %v2178_v34, %v6740_v15  ;;  %v3070_v55 = vadd.f32 %v3069_v3, %v3068_v47  ;;  %10181 = vst [vmem:[#allocation218_spill] sm:$0xff] %v7177_v20  ;;  %4479 = vpow2.f32 %v7085_v10  ;;  %v3128_v9 = vadd.f32 %v7173_v41, %v3127_v22  ;;  %v7183_v34 = vpop.eup %4467  ;;  %v10185_v47 = vld [vmem:[#allocation67_spill] sm:$0xff] }
 0x2ab   : > { %v2214_v21 = vmax.f32 %v2213_v38, %v10180_v33  ;;  %v2108_v8 = vmax.f32 %v2107_v6, %v6957_v48  ;;  %v2143_v31 = vmax.f32 %v2142_v17, %v6838_v18  ;;  %10182 = vst [vmem:[#allocation219_spill] sm:$0xff] %v7183_v34  ;;  %v10184_v45 = vsub.f32 %v10183_v13, %v6202_v54  ;;  %v10188_v13 = vld [vmem:[#allocation89_spill] sm:$0xff] }
 0x2ac   : > { %v2180_v12 = vmax.f32 %v2179_v11, %v6846_v1  ;;  %v3071_v37 = vrot.slane %v3070_v55, 1  ;;  %4481 = vpow2.f32 %v7114_v2  ;;  %v3129_v10 = vadd.f32 %v7183_v34, %v3128_v9  ;;  %v7194_v11 = vpop.f32.mrf.mxu0  ;;  %v7196_v17 = vpop.eup %4469 }
 0x2ad   : > { %v2737_v59 = vmul.f32 1.442695, %v10184_v45  ;;  %v2215_v3 = vmax.f32 %v2214_v21, %v10185_v47  ;;  %v2109_v38 = vmax.f32 %v2108_v8, %v7011_v23  ;;  %v2144_v22 = vmax.f32 %v2143_v31, %v6924_v28  ;;  %10186 = vst [vmem:[#allocation92_spill] sm:$0xff] %v7194_v11  ;;  %10187 = vst [vmem:[#allocation220_spill] sm:$0xff] %v7196_v17  ;;  %v7200_v47 = vpop.f32.mrf.mxu1  ;;  %v10190_v31 = vld [vmem:[#allocation95_spill] sm:$0xff] }
 0x2ae   : > { %v2181_v6 = vmax.f32 %v2180_v12, %v6932_v32  ;;  %v3108_v41 = vrot.slane %v3107_v56, 1  ;;  %v3072_v33 = vadd.f32 %v3071_v37, %v3070_v55  ;;  %4483 = vpow2.f32 %v2729_v61  ;;  %v7205_v12 = vpop.eup %4471  ;;  %v10192_v37 = vld [vmem:[#allocation193_spill] sm:$0xff] }
 0x2af   : > { %v2216_v45 = vmax.f32 %v2215_v3, %v10188_v13  ;;  %v2110_v21 = vmax.f32 %v2109_v38, %v7065_v27  ;;  %v3130_v2 = vadd.f32 %v7196_v17, %v3129_v10  ;;  %v2145_v9 = vmax.f32 %v2144_v22, %v6985_v0  ;;  %10189 = vst [vmem:[#allocation221_spill] sm:$0xff] %v7205_v12  ;;  %v7215_v17 = vpop.f32.mrf.mxu0  ;;  %v7217_v22 = vpop.eup %4473 }
 0x2b0   : > { %v2182_v8 = vmax.f32 %v2181_v6, %v6993_v42  ;;  %4485 = vrcp.f32 %v3072_v33  ;;  %v10191_v34 = vsub.f32 %v10190_v31, %v6202_v54  ;;  %10193 = vst [vmem:[#allocation95_spill] sm:$0xff] %v7217_v22  ;;  %v3109_v33 = vadd.f32 %v3108_v41, %v3107_v56 }
 0x2b1   : > { %v2217_v3 = vmax.f32 %v2216_v45, %v10192_v37  ;;  %v2111_v38 = vmax.f32 %v2110_v21, %v7124_v35  ;;  %4487 = vpow2.f32 %v2733_v51  ;;  %v3131_v61 = vadd.f32 %v7205_v12, %v3130_v2  ;;  %v10220_v37 = vld [vmem:[#allocation134_spill] sm:$0xff] }
 0x2b2   : > { %v2741_v55 = vmul.f32 1.442695, %v10191_v34  ;;  %v2183_v10 = vmax.f32 %v2182_v8, %v7043_v24  ;;  %v2146_v6 = vmax.f32 %v2145_v9, %v7035_v60  ;;  %v7221_v34 = vpop.f32.mrf.mxu1  ;;  %4489 = vpow2.f32 %v2737_v59 }
 0x2b3   : > { %v2218_v13 = vmax.f32 %v2217_v3, %v6965_v5  ;;  %v2112_v54 = vmax.f32 %v2111_v38, %v7171_v40  ;;  %10194 = vst [vmem:[#allocation222_spill] sm:$0xff] %v7221_v34  ;;  %v3132_v51 = vadd.f32 %v7217_v22, %v3131_v61  ;;  %v7226_v2 = vpop.eup %4475  ;;  %v10219_v5 = vld [vmem:[#allocation100_spill] sm:$0xff] }
 0x2b4   : > { %v2184_v45 = vmax.f32 %v2183_v10, %v7102_v36  ;;  %v2147_v21 = vmax.f32 %v2146_v6, %v7095_v16  ;;  %10195 = vst [vmem:[#allocation223_spill] sm:$0xff] %v7226_v2  ;;  %4491 = vpow2.f32 %v2741_v55  ;;  %v7236_v61 = vpop.f32.mrf.mxu1  ;;  %v7238_v10 = vpop.f32.mrf.mxu0  ;;  %v10227_v16 = vld [vmem:[#allocation94_spill] sm:$0xff] }
 0x2b5   : > { %v2219_v8 = vmax.f32 %v2218_v13, %v7019_v50  ;;  %v2113_v9 = vmax.f32 %v2112_v54, %v7215_v17  ;;  %v3133_v41 = vadd.f32 %v7226_v2, %v3132_v51  ;;  %v7233_v59 = vpop.eup %4477  ;;  %4493 = vrcp.f32 %v3109_v33  ;;  %10197 = vst [vmem:[#allocation225_spill] sm:$0xff] %v7238_v10 }
 0x2b6   : > { %v2185_v56 = vmax.f32 %v2184_v45, %v7154_v39  ;;  %v2148_v31 = vmax.f32 %v2147_v21, %v7148_v49  ;;  %10196 = vst [vmem:[#allocation224_spill] sm:$0xff] %v7233_v59  ;;  %v7253_v2 = vpop.f32.mrf.mxu1 }
 0x2b7   : > { %v2220_v3 = vmax.f32 %v2219_v8, %v7073_v63  ;;  %v2114_v38 = vrot.slane %v2113_v9, 4  ;;  %v3134_v13 = vadd.f32 %v7233_v59, %v3133_v41  ;;  %v7243_v54 = vpop.eup %4479  ;;  %10200 = vst [vmem:[#allocation228_spill] sm:$0xff] %v7253_v2  ;;  %v10208_v63 = vld [vmem:[#allocation93_spill] sm:$0xff] }
 0x2b8   : > { %v2186_v55 = vmax.f32 %v2185_v56, %v7200_v47  ;;  %v2149_v6 = vmax.f32 %v2148_v31, %v7194_v11  ;;  %10198 = vst [vmem:[#allocation226_spill] sm:$0xff] %v7243_v54  ;;  %v10222_v11 = vld [vmem:[#allocation164_spill] sm:$0xff] }
 0x2b9   : > { %v2221_v51 = vmax.f32 %v2220_v3, %v7131_v30  ;;  %v2115_v45 = vmax.f32 %v2113_v9, %v2114_v38  ;;  %v3135_v33 = vadd.f32 %v7243_v54, %v3134_v13  ;;  %v7249_v12 = vpop.eup %4481  ;;  %v10204_v54 = vld [vmem:[#allocation185_spill] sm:$0xff] }
 0x2ba   : > { %v2187_v21 = vmax.f32 %v2186_v55, %v7236_v61  ;;  %v2150_v8 = vmax.f32 %v2149_v6, %v7238_v10  ;;  %10199 = vst [vmem:[#allocation227_spill] sm:$0xff] %v7249_v12  ;;  %v10221_v10 = vld [vmem:[#allocation104_spill] sm:$0xff] }
 0x2bb   : > { %v2222_v22 = vmax.f32 %v2221_v51, %v7177_v20  ;;  %v2116_v41 = vrot.slane %v2115_v45, 2  ;;  %v3136_v56 = vadd.f32 %v7249_v12, %v3135_v33  ;;  %v7255_v31 = vpop.eup %4483  ;;  %v10205_v20 = vld [vmem:[#allocation137_spill] sm:$0xff] }
 0x2bc   : > { %10201 = vst [vmem:[#allocation229_spill] sm:$0xff] %v7255_v31  ;;  %v2188_v55 = vrot.slane %v2187_v21, 4  ;;  %v2151_v6 = vrot.slane %v2150_v8, 4  ;;  %v3333_v30 = vmul.f32 %v6934_v52, %v10205_v20 }
 0x2bd   : > { %v2223_v3 = vmax.f32 %v2222_v22, %v7221_v34  ;;  %v2117_v9 = vmax.f32 %v2115_v45, %v2116_v41  ;;  %v7258_v38 = vpop.eup %4485  ;;  %v3137_v13 = vadd.f32 %v7255_v31, %v3136_v56  ;;  %v10207_v41 = vld [vmem:[#allocation86_spill] sm:$0xff] }
 0x2be   : > { %10202 = vst [vmem:[#allocation230_spill] sm:$0xff] %v7258_v38  ;;  %v7261_v59 = vpop.eup %4487  ;;  %v3334_v51 = vmul.f32 %v7258_v38, %v10204_v54  ;;  %v3332_v56 = vmul.f32 %v7258_v38, %v10207_v41  ;;  %v2189_v34 = vmax.f32 %v2187_v21, %v2188_v55  ;;  %v3331_v54 = vmul.f32 %v6934_v52, %v10208_v63  ;;  %v10213_v63 = vld [vmem:[#allocation76_spill] sm:$0xff] }
 0x2bf   : > { %10203 = vst [vmem:[#allocation231_spill] sm:$0xff] %v7261_v59  ;;  %v2224_v33 = vmax.f32 %v2223_v3, %v7253_v2  ;;  %v3138_v12 = vadd.f32 %v7261_v59, %v3137_v13  ;;  %v2118_v22 = vrot.slane %v2117_v9, 1  ;;  %v7269_v45 = vpop.eup %4489  ;;  %v2152_v3 = vmax.f32 %v2150_v8, %v2151_v6  ;;  %v10210_v13 = vld [vmem:[#allocation83_spill] sm:$0xff] }
 0x2c0   : > { %10206 = vst [vmem:[#allocation185_spill] sm:$0xff] %v7269_v45  ;;  %3559 = vmatprep.subr.mxu0 %v3334_v51  ;;  %v3330_v20 = vmul.f32 %v7258_v38, %v10210_v13  ;;  %v3328_v21 = vmul.f32 %v7258_v38, %v10213_v63  ;;  %v2190_v55 = vrot.slane %v2189_v34, 2 }
 0x2c1   : > { %v3139_v31 = vadd.f32 %v7269_v45, %v3138_v12  ;;  %3560 = vmatpush1.msra.mxu0 %v3333_v30  ;;  %v7276_v2 = vpop.eup %4491  ;;  %v2225_v59 = vrot.slane %v2224_v33, 4  ;;  %v7283_v41 = vmax.f32 %v2117_v9, %v2118_v22  ;;  %v10212_v30 = vld [vmem:[#allocation84_spill] sm:$0xff]  ;;  %v2153_v6 = vrot.slane %v2152_v3, 2  ;;  %v10215_v45 = vld [vmem:[#allocation167_spill] sm:$0xff]  ;;  %v10216_v9 = vld [vmem:[#allocation165_spill] sm:$0xff] }
 0x2c2   : > { %10209 = vst [vmem:[#allocation137_spill] sm:$0xff] %v7276_v2  ;;  %3561 = vmatprep.subr.mxu0 %v3332_v56  ;;  %v7280_v50 = vpop.eup %4493  ;;  %v3329_v12 = vmul.f32 %v6934_v52, %v10212_v30  ;;  %v10214_v56 = vld [vmem:[#allocation136_spill] sm:$0xff] }
 0x2c3   : > { %10211 = vst [vmem:[#allocation86_spill] sm:$0xff] %v7280_v50  ;;  %v3140_v51 = vadd.f32 %v7276_v2, %v3139_v31  ;;  %3562 = vmatpush1.msra.mxu0 %v3331_v54  ;;  %v3327_v13 = vmul.f32 %v6934_v52, %v10214_v56  ;;  %v7293_v31 = vmul.f32 %v7280_v50, %v10215_v45  ;;  %v10218_v2 = vld [vmem:[#allocation96_spill] sm:$0xff] }
 0x2c4   : > { %3563 = vmatprep.subr.mxu0 %v3330_v20  ;;  %v7297_v22 = vmul.f32 %v7280_v50, %v10216_v9  ;;  %v2226_v54 = vmax.f32 %v2224_v33, %v2225_v59  ;;  %v10217_v20 = vld [vmem:[#allocation74_spill] sm:$0xff]  ;;  %v2361_v56 = vsub.f32 %v10219_v5, %v7283_v41  ;;  %v3325_v45 = vmul.f32 %v6934_v52, %v10220_v37  ;;  %v10223_v33 = vld [vmem:[#allocation163_spill] sm:$0xff]  ;;  %v10225_v37 = vld [vmem:[#allocation133_spill] sm:$0xff] }
 0x2c5   : > { %v3141_v8 = vrot.slane %v3140_v51, 4  ;;  %3564 = vmatpush1.msra.mxu0 %v3329_v12  ;;  %v3326_v30 = vmul.f32 %v7258_v38, %v10217_v20  ;;  %v2359_v12 = vsub.f32 %v10218_v2, %v7283_v41  ;;  %v2363_v9 = vsub.f32 %v10221_v10, %v7283_v41  ;;  %v10224_v2 = vld [vmem:[#allocation73_spill] sm:$0xff]  ;;  %v10226_v10 = vld [vmem:[#allocation16_spill] sm:$0xff] }
 0x2c6   : > { %3565 = vmatprep.subr.mxu0 %v3328_v21  ;;  %v7311_v59 = vmul.f32 %v7280_v50, %v10222_v11  ;;  %v3324_v21 = vmul.f32 %v7258_v38, %v10224_v2  ;;  %v3323_v20 = vmul.f32 %v6934_v52, %v10225_v37  ;;  %v2365_v49 = vsub.f32 %v10226_v10, %v7283_v41  ;;  %v10233_v38 = vld [vmem:[#allocation85_spill] sm:$0xff] }
 0x2c7   : > { %v3142_v63 = vadd.f32 %v3141_v8, %v3140_v51  ;;  %3566 = vmatpush1.msra.mxu0 %v3327_v13  ;;  %v7315_v51 = vmul.f32 %v7280_v50, %v10223_v33  ;;  %v2191_v8 = vmax.f32 %v2189_v34, %v2190_v55  ;;  %v2154_v13 = vmax.f32 %v2152_v3, %v2153_v6  ;;  %v10230_v55 = vld [vmem:[#allocation56_spill] sm:$0xff] }
 0x2c8   : > { %3567 = vmatprep.subr.mxu0 %v3326_v30  ;;  %v2227_v11 = vrot.slane %v2226_v54, 2  ;;  %v7325_v60 = vmul.f32 %v7280_v50, %v10227_v16  ;;  %v10228_v30 = vld [vmem:[#allocation88_spill] sm:$0xff]  ;;  %v2743_v34 = vmul.f32 1.442695, %v2359_v12  ;;  %v2747_v3 = vmul.f32 1.442695, %v2361_v56 }
 0x2c9   : > { %v3143_v5 = vrot.slane %v3142_v63, 2  ;;  %3568 = vmatpush1.msra.mxu0 %v3325_v45  ;;  %v7329_v33 = vmul.f32 %v7280_v50, %v10228_v30  ;;  %v7333_v6 = vmul.f32 %v6934_v52, %v10230_v55  ;;  %v10232_v45 = vld [vmem:[#allocation109_spill] sm:$0xff]  ;;  %v2751_v10 = vmul.f32 1.442695, %v2363_v9 }
 0x2ca   : > { %3569 = vmatprep.subr.mxu0 %v3324_v21  ;;  %v2367_v37 = vsub.f32 %v10232_v45, %v7283_v41  ;;  %v7339_v16 = vmul.f32 %v7280_v50, %v10233_v38  ;;  %v10235_v21 = vld [vmem:[#allocation52_spill] sm:$0xff]  ;;  %4495 = vpow2.f32 %v2743_v34  ;;  %v2192_v12 = vrot.slane %v2191_v8, 1  ;;  %v10238_v45 = vld [vmem:[#allocation79_spill] sm:$0xff] }
 0x2cb   : > { %10229 = vst [vmem:[#allocation93_spill] sm:$0xff] %v7329_v33  ;;  %v3144_v2 = vadd.f32 %v3143_v5, %v3142_v63  ;;  %3570 = vmatpush1.msra.mxu0 %v3323_v20  ;;  %10231 = vst [vmem:[#allocation83_spill] sm:$0xff] %v7333_v6  ;;  %v7343_v30 = vmul.f32 %v6934_v52, %v10235_v21  ;;  %v2155_v56 = vrot.slane %v2154_v13, 1  ;;  %v10237_v5 = vld [vmem:[#allocation113_spill] sm:$0xff]  ;;  %4497 = vpow2.f32 %v2747_v3 }
 0x2cc   : > { %10234 = vst [vmem:[#allocation84_spill] sm:$0xff] %v7339_v16  ;;  %v2369_v20 = vsub.f32 %v10237_v5, %v7283_v41  ;;  %v2755_v55 = vmul.f32 1.442695, %v2365_v49  ;;  %v7347_v6 = vmax.f32 %v2226_v54, %v2227_v11  ;;  %v7351_v38 = vmul.f32 %v7280_v50, %v10238_v45  ;;  %v10240_v16 = vld [vmem:[#allocation43_spill] sm:$0xff]  ;;  %v10244_v33 = vld [vmem:[#allocation117_spill] sm:$0xff]  ;;  %v10245_v54 = vld [vmem:[#allocation34_spill] sm:$0xff] }
 0x2cd   : > { %10236 = vst [vmem:[#allocation76_spill] sm:$0xff] %v7343_v30  ;;  %v3145_v63 = vrot.slane %v3144_v2, 1  ;;  %v7355_v21 = vmul.f32 %v6934_v52, %v10240_v16  ;;  %v10242_v30 = vld [vmem:[#allocation55_spill] sm:$0xff]  ;;  %v2371_v5 = vsub.f32 %v10244_v33, %v7283_v41  ;;  %4499 = vpow2.f32 %v2751_v10  ;;  %v10247_v16 = vld [vmem:[#allocation66_spill] sm:$0xff] }
 0x2ce   : > { %10239 = vst [vmem:[#allocation136_spill] sm:$0xff] %v7351_v38  ;;  %v7359_v34 = vmul.f32 %v7280_v50, %v10242_v30  ;;  %v2759_v49 = vmul.f32 1.442695, %v2367_v37  ;;  %v7365_v11 = vmul.f32 %v6934_v52, %v10245_v54  ;;  %v7369_v3 = vmax.f32 %v2154_v13, %v2155_v56  ;;  %v10249_v30 = vld [vmem:[#allocation9_spill] sm:$0xff]  ;;  %v10250_v10 = vld [vmem:[#allocation126_spill] sm:$0xff]  ;;  %v10255_v37 = vld [vmem:[#allocation27_spill] sm:$0xff] }
 0x2cf   : > { %v3146_v9 = vadd.f32 %v3145_v63, %v3144_v2  ;;  %10241 = vst [vmem:[#allocation167_spill] sm:$0xff] %v7355_v21  ;;  %v7367_v2 = vmax.f32 %v2191_v8, %v2192_v12  ;;  %v7373_v63 = vmul.f32 %v7280_v50, %v10247_v16  ;;  %v2373_v45 = vsub.f32 %v10249_v30, %v7283_v41  ;;  %v10358_v38 = vld [vmem:[#allocation172_spill] sm:$0xff] }
 0x2d0   : > { %10243 = vst [vmem:[#allocation165_spill] sm:$0xff] %v7359_v34  ;;  %10246 = vst [vmem:[#allocation74_spill] sm:$0xff] %v7365_v11  ;;  %v2763_v33 = vmul.f32 1.442695, %v2369_v20  ;;  %v2375_v54 = vsub.f32 %v10250_v10, %v7283_v41  ;;  %v2379_v13 = vsub.f32 %v10083_v46, %v7283_v41  ;;  %v2381_v12 = vsub.f32 %v10090_v4, %v7283_v41  ;;  %v10252_v10 = vld [vmem:[#allocation82_spill] sm:$0xff] }
 0x2d1   : > { %4501 = vrcp.f32 %v3146_v9  ;;  %10248 = vst [vmem:[#allocation96_spill] sm:$0xff] %v7373_v63  ;;  %v10251_v9 = vld [vmem:[#allocation17_spill] sm:$0xff]  ;;  %v2383_v56 = vsub.f32 %v10096_v29, %v7283_v41  ;;  %v2385_v20 = vsub.f32 %v10101_v62, %v7283_v41  ;;  %v2387_v16 = vsub.f32 %v10107_v25, %v7283_v41 }
 0x2d2   : > { %4503 = vpow2.f32 %v2755_v55  ;;  %v2377_v8 = vsub.f32 %v10251_v9, %v7283_v41  ;;  %v2767_v55 = vmul.f32 1.442695, %v2371_v5  ;;  %v2389_v30 = vsub.f32 %v10113_v43, %v7283_v41  ;;  %v10254_v9 = vld [vmem:[#allocation178_spill] sm:$0xff] }
 0x2d3   : > { %4505 = vpow2.f32 %v2759_v49  ;;  %v2391_v46 = vsub.f32 %v10120_v57, %v7283_v41  ;;  %v2393_v4 = vsub.f32 %v10127_v44, %v7283_v41  ;;  %v2395_v29 = vsub.f32 %v10134_v53, %v7283_v41  ;;  %v10253_v49 = vld [vmem:[#allocation166_spill] sm:$0xff] }
 0x2d4   : > { %v2397_v62 = vsub.f32 %v10252_v10, %v7283_v41  ;;  %4507 = vpow2.f32 %v2763_v33  ;;  %v2771_v5 = vmul.f32 1.442695, %v2373_v45  ;;  %v2399_v25 = vsub.f32 %v10253_v49, %v7283_v41 }
 0x2d5   : > { %v2401_v43 = vsub.f32 %v10254_v9, %v7283_v41  ;;  %v2403_v57 = vsub.f32 %v10255_v37, %v7283_v41  ;;  %v2405_v44 = vsub.f32 %v10168_v26, %v7283_v41  ;;  %v2407_v53 = vsub.f32 %v6782_v14, %v7283_v41 }
 0x2d6   : > { %v2409_v10 = vsub.f32 %v6882_v7, %v7283_v41  ;;  %4509 = vpow2.f32 %v2767_v55  ;;  %v2775_v45 = vmul.f32 1.442695, %v2375_v54  ;;  %v2411_v33 = vsub.f32 %v6957_v48, %v7283_v41 }
 0x2d7   : > { %v2413_v49 = vsub.f32 %v7011_v23, %v7283_v41  ;;  %v2415_v37 = vsub.f32 %v7065_v27, %v7283_v41  ;;  %v2779_v9 = vmul.f32 1.442695, %v2377_v8  ;;  %v7420_v50 = vpop.eup %4495  ;;  %v2417_v14 = vsub.f32 %v7124_v35, %v7283_v41  ;;  %v10258_v27 = vld [vmem:[#allocation97_spill] sm:$0xff] }
 0x2d8   : > { %10256 = vst [vmem:[#allocation100_spill] sm:$0xff] %v7420_v50  ;;  %v2419_v7 = vsub.f32 %v7171_v40, %v7283_v41  ;;  %4511 = vpow2.f32 %v2771_v5  ;;  %v2783_v26 = vmul.f32 1.442695, %v2379_v13  ;;  %v7426_v54 = vpop.eup %4497  ;;  %v2421_v48 = vsub.f32 %v7215_v17, %v7283_v41 }
 0x2d9   : > { %10257 = vst [vmem:[#allocation134_spill] sm:$0xff] %v7426_v54  ;;  %v2787_v23 = vmul.f32 1.442695, %v2381_v12  ;;  %v2791_v55 = vmul.f32 1.442695, %v2383_v56  ;;  %4513 = vpow2.f32 %v2775_v45  ;;  %v3147_v35 = vadd.f32 %v7426_v54, %v7420_v50  ;;  %v10286_v50 = vld [vmem:[#allocation26_spill] sm:$0xff] }
 0x2da   : > { %v2795_v63 = vmul.f32 1.442695, %v2385_v20  ;;  %v2799_v52 = vmul.f32 1.442695, %v2387_v16  ;;  %v7434_v11 = vpop.eup %4499  ;;  %4515 = vpow2.f32 %v2779_v9  ;;  %v2803_v40 = vmul.f32 1.442695, %v2389_v30 }
 0x2db   : > { %10259 = vst [vmem:[#allocation104_spill] sm:$0xff] %v7434_v11  ;;  %v2807_v13 = vmul.f32 1.442695, %v2391_v46  ;;  %v2811_v5 = vmul.f32 1.442695, %v2393_v4  ;;  %4517 = vpow2.f32 %v2783_v26  ;;  %v3148_v12 = vadd.f32 %v7434_v11, %v3147_v35  ;;  %v10261_v20 = vld [vmem:[#allocation213_spill] sm:$0xff] }
 0x2dc   : > { %v2815_v17 = vmul.f32 1.442695, %v2395_v29  ;;  %v2819_v41 = vmul.f32 1.442695, %v2397_v62  ;;  %4519 = vpow2.f32 %v2787_v23  ;;  %v2823_v45 = vmul.f32 1.442695, %v2399_v25 }
 0x2dd   : > { %v2827_v8 = vmul.f32 1.442695, %v2401_v43  ;;  %4521 = vpow2.f32 %v2791_v55  ;;  %v2831_v9 = vmul.f32 1.442695, %v2403_v57  ;;  %v2835_v30 = vmul.f32 1.442695, %v2405_v44 }
 0x2de   : > { %v7436_v34 = vpop.eup %4501  ;;  %v10263_v29 = vld [vmem:[#allocation211_spill] sm:$0xff]  ;;  %4523 = vpow2.f32 %v2795_v63  ;;  %v2839_v26 = vmul.f32 1.442695, %v2407_v53  ;;  %v2843_v35 = vmul.f32 1.442695, %v2409_v10 }
 0x2df   : > { %v7439_v56 = vpop.eup %4503  ;;  %v3398_v16 = vmul.f32 %v7436_v34, %v10261_v20  ;;  %v3396_v62 = vmul.f32 %v7436_v34, %v10263_v29  ;;  %4525 = vpow2.f32 %v2799_v52  ;;  %v7449_v23 = vmul.f32 1.442695, %v2411_v33 }
 0x2e0   : > { %10260 = vst [vmem:[#allocation164_spill] sm:$0xff] %v7439_v56  ;;  %v3149_v46 = vadd.f32 %v7439_v56, %v3148_v12  ;;  %v7444_v4 = vpop.eup %4505  ;;  %v7451_v25 = vmul.f32 1.442695, %v2413_v49  ;;  %4527 = vpow2.f32 %v2803_v40  ;;  %v7456_v44 = vmul.f32 1.442695, %v2415_v37  ;;  %v10267_v49 = vld [vmem:[#allocation105_spill] sm:$0xff] }
 0x2e1   : > { %10262 = vst [vmem:[#allocation163_spill] sm:$0xff] %v7444_v4  ;;  %3648 = vmatprep.subr.mxu1 %v3398_v16  ;;  %v7454_v57 = vpop.eup %4507  ;;  %v7458_v55 = vmul.f32 1.442695, %v2417_v14  ;;  %v7460_v63 = vmul.f32 1.442695, %v2419_v7  ;;  %4529 = vpow2.f32 %v2807_v13  ;;  %v2427_v37 = vsub.f32 %v10267_v49, %v7367_v2  ;;  %v10268_v14 = vld [vmem:[#allocation106_spill] sm:$0xff] }
 0x2e2   : > { %3649 = vmatpush1.msra.mxu1 %v7293_v31  ;;  %v3150_v43 = vadd.f32 %v7444_v4, %v3149_v46  ;;  %10264 = vst [vmem:[#allocation73_spill] sm:$0xff] %v7454_v57  ;;  %v7462_v53 = vmul.f32 1.442695, %v2421_v48  ;;  %v10265_v31 = vld [vmem:[#allocation101_spill] sm:$0xff]  ;;  %4531 = vpow2.f32 %v2811_v5  ;;  %v2429_v7 = vsub.f32 %v10268_v14, %v7367_v2  ;;  %v10269_v40 = vld [vmem:[#allocation110_spill] sm:$0xff]  ;;  %v10276_v49 = vld [vmem:[#allocation40_spill] sm:$0xff] }
 0x2e3   : > { %3650 = vmatprep.subr.mxu1 %v3396_v62  ;;  %v2425_v10 = vsub.f32 %v10265_v31, %v7367_v2  ;;  %v7468_v33 = vpop.eup %4509  ;;  %v2431_v48 = vsub.f32 %v10269_v40, %v7367_v2  ;;  %4533 = vpow2.f32 %v2815_v17  ;;  %v10270_v12 = vld [vmem:[#allocation114_spill] sm:$0xff]  ;;  %v10273_v5 = vld [vmem:[#allocation13_spill] sm:$0xff]  ;;  %v10274_v62 = vld [vmem:[#allocation127_spill] sm:$0xff]  ;;  %v2879_v4 = vmul.f32 1.442695, %v2427_v37 }
 0x2e4   : > { %v3151_v52 = vadd.f32 %v7454_v57, %v3150_v43  ;;  %3651 = vmatpush1.msra.mxu1 %v7297_v22  ;;  %10266 = vst [vmem:[#allocation133_spill] sm:$0xff] %v7468_v33  ;;  %v10271_v22 = vld [vmem:[#allocation118_spill] sm:$0xff]  ;;  %4535 = vpow2.f32 %v2819_v41  ;;  %v10275_v31 = vld [vmem:[#allocation20_spill] sm:$0xff]  ;;  %v10280_v43 = vld [vmem:[#allocation143_spill] sm:$0xff] }
 0x2e5   : > { %v7481_v46 = vpop.eup %4511  ;;  %4537 = vpow2.f32 %v2823_v45  ;;  %v10277_v40 = vld [vmem:[#allocation132_spill] sm:$0xff]  ;;  %v10279_v41 = vld [vmem:[#allocation90_spill] sm:$0xff]  ;;  %v10281_v17 = vld [vmem:[#allocation151_spill] sm:$0xff]  ;;  %v2875_v57 = vmul.f32 1.442695, %v2425_v10  ;;  %v2465_v10 = vsub.f32 %v10169_v58, %v7367_v2 }
 0x2e6   : > { %v3152_v13 = vadd.f32 %v7468_v33, %v3151_v52  ;;  %10272 = vst [vmem:[#allocation16_spill] sm:$0xff] %v7481_v46  ;;  %v7494_v20 = vpop.eup %4513  ;;  %4539 = vpow2.f32 %v2827_v8  ;;  %v10283_v14 = vld [vmem:[#allocation159_spill] sm:$0xff]  ;;  %v10284_v8 = vsub.f32 %v10258_v27, %v7367_v2  ;;  %v10287_v45 = vld [vmem:[#allocation50_spill] sm:$0xff] }
 0x2e7   : > { %10278 = vst [vmem:[#allocation94_spill] sm:$0xff] %v7494_v20  ;;  %v7502_v54 = vpop.eup %4515  ;;  %4541 = vpow2.f32 %v2831_v9  ;;  %v10289_v16 = vld [vmem:[#allocation70_spill] sm:$0xff] }
 0x2e8   : > { %v3153_v52 = vadd.f32 %v7481_v46, %v3152_v13  ;;  %10282 = vst [vmem:[#allocation88_spill] sm:$0xff] %v7502_v54  ;;  %v2871_v11 = vmul.f32 1.442695, %v10284_v8  ;;  %v7510_v56 = vpop.eup %4517  ;;  %4543 = vpow2.f32 %v2835_v30  ;;  %v2459_v33 = vsub.f32 %v10289_v16, %v7367_v2  ;;  %v10290_v27 = vld [vmem:[#allocation162_spill] sm:$0xff] }
 0x2e9   : > { %10285 = vst [vmem:[#allocation56_spill] sm:$0xff] %v7510_v56  ;;  %v7516_v9 = vpop.eup %4519  ;;  %4545 = vpow2.f32 %v2839_v26  ;;  %v10292_v30 = vld [vmem:[#allocation174_spill] sm:$0xff]  ;;  %v2469_v8 = vsub.f32 %v6740_v15, %v7367_v2  ;;  %v2473_v15 = vsub.f32 %v6932_v32, %v7367_v2 }
 0x2ea   : > { %v3154_v13 = vadd.f32 %v7494_v20, %v3153_v52  ;;  %10288 = vst [vmem:[#allocation109_spill] sm:$0xff] %v7516_v9  ;;  %v7523_v46 = vpop.eup %4521  ;;  %4547 = vpow2.f32 %v2843_v35  ;;  %v2463_v29 = vsub.f32 %v10292_v30, %v7367_v2  ;;  %v2471_v35 = vsub.f32 %v6846_v1, %v7367_v2  ;;  %v10296_v58 = vld [vmem:[#allocation210_spill] sm:$0xff] }
 0x2eb   : > { %10291 = vst [vmem:[#allocation85_spill] sm:$0xff] %v7523_v46  ;;  %v7529_v20 = vpop.eup %4523  ;;  %4549 = vpow2.f32 %v2871_v11  ;;  %v2883_v30 = vmul.f32 1.442695, %v2429_v7  ;;  %v3394_v37 = vmul.f32 %v7436_v34, %v10296_v58  ;;  %v2475_v11 = vsub.f32 %v6993_v42, %v7367_v2 }
 0x2ec   : > { %v3155_v52 = vadd.f32 %v7502_v54, %v3154_v13  ;;  %10293 = vst [vmem:[#allocation52_spill] sm:$0xff] %v7529_v20  ;;  %v10294_v13 = vld [vmem:[#allocation51_spill] sm:$0xff]  ;;  %v7536_v54 = vpop.eup %4525  ;;  %4551 = vpow2.f32 %v2875_v57  ;;  %v2477_v1 = vsub.f32 %v7043_v24, %v7367_v2  ;;  %v2479_v57 = vsub.f32 %v7102_v36, %v7367_v2 }
 0x2ed   : > { %10295 = vst [vmem:[#allocation113_spill] sm:$0xff] %v7536_v54  ;;  %v7542_v21 = vpop.eup %4527  ;;  %4553 = vpow2.f32 %v7449_v23  ;;  %v2887_v7 = vmul.f32 1.442695, %v2431_v48  ;;  %3652 = vmatprep.subr.mxu1 %v3394_v37  ;;  %v2481_v42 = vsub.f32 %v7154_v39, %v7367_v2  ;;  %v2485_v36 = vsub.f32 %v7236_v61, %v7367_v2 }
 0x2ee   : > { %v3156_v26 = vadd.f32 %v7510_v56, %v3155_v52  ;;  %10297 = vst [vmem:[#allocation79_spill] sm:$0xff] %v7542_v21  ;;  %v7550_v16 = vpop.eup %4529  ;;  %4555 = vpow2.f32 %v2879_v4  ;;  %3653 = vmatpush1.msra.mxu1 %v7311_v59  ;;  %v10301_v4 = vsub.f32 %v10270_v12, %v7367_v2  ;;  %v10302_v48 = vsub.f32 %v10271_v22, %v7367_v2  ;;  %v10343_v56 = vld [vmem:[#allocation46_spill] sm:$0xff] }
 0x2ef   : > { %10298 = vst [vmem:[#allocation43_spill] sm:$0xff] %v7550_v16  ;;  %v7556_v23 = vpop.eup %4531  ;;  %4557 = vpow2.f32 %v7451_v25  ;;  %v10304_v59 = vsub.f32 %v10273_v5, %v7367_v2  ;;  %v10305_v61 = vsub.f32 %v10274_v62, %v7367_v2  ;;  %v10307_v22 = vsub.f32 %v10275_v31, %v7367_v2 }
 0x2f0   : > { %v3157_v52 = vadd.f32 %v7516_v9, %v3156_v26  ;;  %10299 = vst [vmem:[#allocation55_spill] sm:$0xff] %v7556_v23  ;;  %v2483_v26 = vsub.f32 %v7200_v47, %v7367_v2  ;;  %v7565_v24 = vpop.eup %4533  ;;  %4559 = vpow2.f32 %v2883_v30  ;;  %v2891_v25 = vmul.f32 1.442695, %v10301_v4  ;;  %v10346_v9 = vld [vmem:[#allocation138_spill] sm:$0xff] }
 0x2f1   : > { %10300 = vst [vmem:[#allocation117_spill] sm:$0xff] %v7565_v24  ;;  %v2895_v58 = vmul.f32 1.442695, %v10302_v48  ;;  %v7575_v39 = vpop.eup %4535  ;;  %4561 = vpow2.f32 %v7456_v44  ;;  %v2899_v37 = vmul.f32 1.442695, %v10304_v59  ;;  %v10308_v44 = vsub.f32 %v10276_v49, %v7367_v2 }
 0x2f2   : > { %v3158_v32 = vadd.f32 %v7523_v46, %v3157_v52  ;;  %10303 = vst [vmem:[#allocation34_spill] sm:$0xff] %v7575_v39  ;;  %v2903_v30 = vmul.f32 1.442695, %v10305_v61  ;;  %v7585_v12 = vpop.eup %4537  ;;  %4563 = vpow2.f32 %v2887_v7  ;;  %v2907_v52 = vmul.f32 1.442695, %v10307_v22 }
 0x2f3   : > { %10306 = vst [vmem:[#allocation66_spill] sm:$0xff] %v7585_v12  ;;  %v2911_v4 = vmul.f32 1.442695, %v10308_v44  ;;  %v7596_v48 = vpop.eup %4539  ;;  %4565 = vpow2.f32 %v7458_v55  ;;  %v10311_v7 = vsub.f32 %v10279_v41, %v7367_v2  ;;  %v10312_v31 = vsub.f32 %v10280_v43, %v7367_v2 }
 0x2f4   : > { %v3159_v47 = vadd.f32 %v7529_v20, %v3158_v32  ;;  %v10309_v32 = vsub.f32 %v10277_v40, %v7367_v2  ;;  %10310 = vst [vmem:[#allocation9_spill] sm:$0xff] %v7596_v48  ;;  %v7606_v49 = vpop.eup %4541  ;;  %4567 = vpow2.f32 %v2891_v25  ;;  %v10314_v40 = vsub.f32 %v10281_v17, %v7367_v2  ;;  %v10351_v20 = vld [vmem:[#allocation10_spill] sm:$0xff] }
 0x2f5   : > { %v2919_v59 = vmul.f32 1.442695, %v10311_v7  ;;  %v2923_v61 = vmul.f32 1.442695, %v10312_v31  ;;  %10313 = vst [vmem:[#allocation126_spill] sm:$0xff] %v7606_v49  ;;  %v10315_v55 = vsub.f32 %v10283_v14, %v7367_v2  ;;  %v10316_v41 = vsub.f32 %v10286_v50, %v7367_v2  ;;  %v7623_v43 = vpop.eup %4543 }
 0x2f6   : > { %v2915_v5 = vmul.f32 1.442695, %v10309_v32  ;;  %v3160_v62 = vadd.f32 %v7536_v54, %v3159_v47  ;;  %v7611_v22 = vmul.f32 1.442695, %v10314_v40  ;;  %10317 = vst [vmem:[#allocation17_spill] sm:$0xff] %v7623_v43  ;;  %4569 = vpow2.f32 %v7460_v63  ;;  %v7634_v14 = vpop.eup %4545 }
 0x2f7   : > { %v7616_v47 = vmul.f32 1.442695, %v10315_v55  ;;  %v7621_v44 = vmul.f32 1.442695, %v10316_v41  ;;  %v10318_v17 = vsub.f32 %v10287_v45, %v7367_v2  ;;  %v7632_v7 = vmul.f32 1.442695, %v2459_v33 }
 0x2f8   : > { %v3161_v25 = vadd.f32 %v7542_v21, %v3160_v62  ;;  %10319 = vst [vmem:[#allocation82_spill] sm:$0xff] %v7634_v14  ;;  %4571 = vpow2.f32 %v2895_v58  ;;  %v10320_v50 = vsub.f32 %v10290_v27, %v7367_v2  ;;  %v7641_v40 = vmul.f32 1.442695, %v2463_v29  ;;  %v7645_v62 = vpop.eup %4547 }
 0x2f9   : > { %v7630_v32 = vmul.f32 1.442695, %v10318_v17  ;;  %v7643_v63 = vmul.f32 1.442695, %v2465_v10  ;;  %10321 = vst [vmem:[#allocation166_spill] sm:$0xff] %v7645_v62  ;;  %4573 = vpow2.f32 %v7462_v53  ;;  %v10322_v33 = vsub.f32 %v10294_v13, %v7367_v2  ;;  %v7656_v27 = vpop.eup %4549 }
 0x2fa   : > { %v7639_v31 = vmul.f32 1.442695, %v10320_v50  ;;  %v3162_v45 = vadd.f32 %v7550_v16, %v3161_v25  ;;  %v7654_v58 = vmul.f32 1.442695, %v2469_v8  ;;  %10323 = vst [vmem:[#allocation178_spill] sm:$0xff] %v7656_v27  ;;  %4575 = vpow2.f32 %v2899_v37  ;;  %v7664_v17 = vpop.eup %4551  ;;  %v10333_v16 = vld [vmem:[#allocation107_spill] sm:$0xff] }
 0x2fb   : > { %v7652_v55 = vmul.f32 1.442695, %v10322_v33  ;;  %v7658_v29 = vmul.f32 1.442695, %v2471_v35  ;;  %v7660_v10 = vmul.f32 1.442695, %v2473_v15  ;;  %v7673_v8 = vpop.eup %4553  ;;  %4577 = vpow2.f32 %v2903_v30 }
 0x2fc   : > { %v7662_v41 = vmul.f32 1.442695, %v2475_v11  ;;  %10324 = vst [vmem:[#allocation27_spill] sm:$0xff] %v7664_v17  ;;  %v3163_v53 = vadd.f32 %v7556_v23, %v3162_v45  ;;  %v7667_v25 = vmul.f32 1.442695, %v2477_v1  ;;  %10325 = vst [vmem:[#allocation97_spill] sm:$0xff] %v7673_v8  ;;  %v3221_v15 = vadd.f32 %v7664_v17, %v7656_v27  ;;  %v7681_v11 = vpop.eup %4555 }
 0x2fd   : > { %v7669_v2 = vmul.f32 1.442695, %v2479_v57  ;;  %v7671_v13 = vmul.f32 1.442695, %v2481_v42  ;;  %v7675_v37 = vmul.f32 1.442695, %v2483_v26  ;;  %v7690_v26 = vpop.eup %4557  ;;  %4579 = vpow2.f32 %v2907_v52 }
 0x2fe   : > { %v7677_v35 = vmul.f32 1.442695, %v2485_v36  ;;  %10328 = vst [vmem:[#allocation101_spill] sm:$0xff] %v7681_v11  ;;  %v3164_v50 = vadd.f32 %v7565_v24, %v3163_v53  ;;  %v10329_v1 = vld [vmem:[#allocation98_spill] sm:$0xff]  ;;  %v10331_v33 = vld [vmem:[#allocation8_spill] sm:$0xff]  ;;  %10332 = vst [vmem:[#allocation105_spill] sm:$0xff] %v7690_v26  ;;  %v3222_v36 = vadd.f32 %v7681_v11, %v3221_v15  ;;  %v7697_v17 = vpop.eup %4559  ;;  %4581 = vpow2.f32 %v2911_v4 }
 0x2ff   : > { %10326 = vst [vmem:[#allocation213_spill] sm:$0xff] %v7675_v37  ;;  %v10330_v42 = vld [vmem:[#allocation102_spill] sm:$0xff]  ;;  %v10334_v23 = vld [vmem:[#allocation111_spill] sm:$0xff]  ;;  %10335 = vst [vmem:[#allocation106_spill] sm:$0xff] %v7697_v17  ;;  %v7704_v52 = vpop.eup %4561  ;;  %4583 = vpow2.f32 %v2915_v5 }
 0x300   : > { %10327 = vst [vmem:[#allocation211_spill] sm:$0xff] %v7677_v35  ;;  %v3165_v57 = vadd.f32 %v7575_v39, %v3164_v50  ;;  %v10336_v45 = vld [vmem:[#allocation115_spill] sm:$0xff]  ;;  %10338 = vst [vmem:[#allocation110_spill] sm:$0xff] %v7704_v52  ;;  %v3223_v15 = vadd.f32 %v7697_v17, %v3222_v36  ;;  %v10340_v53 = vld [vmem:[#allocation129_spill] sm:$0xff]  ;;  %v7711_v46 = vpop.eup %4563  ;;  %4585 = vpow2.f32 %v2919_v59 }
 0x301   : > { %v10337_v30 = vld [vmem:[#allocation119_spill] sm:$0xff]  ;;  %10341 = vst [vmem:[#allocation114_spill] sm:$0xff] %v7711_v46  ;;  %v10342_v50 = vld [vmem:[#allocation28_spill] sm:$0xff]  ;;  %v7718_v5 = vpop.eup %4565  ;;  %4587 = vpow2.f32 %v2923_v61  ;;  %v10345_v11 = vld [vmem:[#allocation81_spill] sm:$0xff] }
 0x302   : > { %v10339_v27 = vld [vmem:[#allocation123_spill] sm:$0xff]  ;;  %v3166_v4 = vadd.f32 %v7585_v12, %v3165_v57  ;;  %10344 = vst [vmem:[#allocation118_spill] sm:$0xff] %v7718_v5  ;;  %v3224_v36 = vadd.f32 %v7711_v46, %v3223_v15  ;;  %v7725_v54 = vpop.eup %4567  ;;  %4589 = vpow2.f32 %v7611_v22  ;;  %v10348_v57 = vld [vmem:[#allocation146_spill] sm:$0xff]  ;;  %v10354_v61 = vld [vmem:[#allocation60_spill] sm:$0xff] }
 0x303   : > { %10347 = vst [vmem:[#allocation13_spill] sm:$0xff] %v7725_v54  ;;  %v10349_v24 = vld [vmem:[#allocation154_spill] sm:$0xff]  ;;  %v7733_v12 = vpop.eup %4569  ;;  %4591 = vpow2.f32 %v7616_v47  ;;  %v10352_v46 = vld [vmem:[#allocation35_spill] sm:$0xff]  ;;  %v10361_v35 = vld [vmem:[#allocation45_spill] sm:$0xff] }
 0x304   : > { %v3167_v59 = vadd.f32 %v7596_v48, %v3166_v4  ;;  %10350 = vst [vmem:[#allocation127_spill] sm:$0xff] %v7733_v12  ;;  %v3225_v15 = vadd.f32 %v7725_v54, %v3224_v36  ;;  %4593 = vpow2.f32 %v7621_v44  ;;  %v10355_v47 = vld [vmem:[#allocation75_spill] sm:$0xff]  ;;  %v203_v37 = vld [vmem:[%s4967_s29 + $0x88] sm:$0xff] }
 0x305   : > { %v7741_v22 = vpop.eup %4571  ;;  %4595 = vpow2.f32 %v7630_v32  ;;  %v10357_v17 = vld [vmem:[#allocation91_spill] sm:$0xff]  ;;  %3623 = vmatprep.mubr.f32.mxu0 %v203_v37 }
 0x306   : > { %10353 = vst [vmem:[#allocation20_spill] sm:$0xff] %v7741_v22  ;;  %v3168_v39 = vadd.f32 %v7606_v49, %v3167_v59  ;;  %v7749_v54 = vpop.eup %4573  ;;  %v3226_v4 = vadd.f32 %v7741_v22, %v3225_v15  ;;  %4597 = vpow2.f32 %v7632_v7  ;;  %v10360_v36 = vld [vmem:[#allocation11_spill] sm:$0xff]  ;;  %v211_v15 = vld [vmem:[%s4967_s29 + $0x148] sm:$0xff]  ;;  %v10370_v22 = vld [vmem:[#allocation208_spill] sm:$0xff] }
 0x307   : > { %10356 = vst [vmem:[#allocation40_spill] sm:$0xff] %v7749_v54  ;;  %v7757_v49 = vpop.eup %4575  ;;  %4599 = vpow2.f32 %v7639_v31  ;;  %3712 = vmatprep.mubr.f32.mxu1 %v211_v15  ;;  %v10363_v31 = vsub.f32 %v10329_v1, %v7369_v3  ;;  %v10364_v15 = vsub.f32 %v10330_v42, %v7369_v3  ;;  %v10366_v1 = vld [vmem:[#allocation158_spill] sm:$0xff]  ;;  %v10369_v42 = vsub.f32 %v10331_v33, %v7369_v3 }
 0x308   : > { %10359 = vst [vmem:[#allocation132_spill] sm:$0xff] %v7757_v49  ;;  %v3169_v44 = vadd.f32 %v7623_v43, %v3168_v39  ;;  %v3227_v21 = vadd.f32 %v7757_v49, %v3226_v4  ;;  %v7773_v7 = vpop.eup %4577  ;;  %4601 = vpow2.f32 %v7641_v40  ;;  %v10372_v43 = vld [vmem:[#allocation63_spill] sm:$0xff]  ;;  %v10373_v49 = vld [vmem:[#allocation92_spill] sm:$0xff]  ;;  %v10375_v33 = vsub.f32 %v10333_v16, %v7369_v3 }
 0x309   : > { %10362 = vst [vmem:[#allocation90_spill] sm:$0xff] %v7773_v7  ;;  %v2745_v4 = vmul.f32 1.442695, %v10363_v31  ;;  %4603 = vpow2.f32 %v7643_v63  ;;  %v10367_v63 = vld [vmem:[#allocation209_spill] sm:$0xff] }
 0x30a   : > { %v3170_v48 = vadd.f32 %v7634_v14, %v3169_v44  ;;  %v3228_v59 = vadd.f32 %v7773_v7, %v3227_v21  ;;  %v2749_v44 = vmul.f32 1.442695, %v10364_v15  ;;  %v7789_v39 = vpop.eup %4579  ;;  %4605 = vpow2.f32 %v7652_v55 }
 0x30b   : > { %10365 = vst [vmem:[#allocation143_spill] sm:$0xff] %v7789_v39  ;;  %v7797_v21 = vpop.eup %4581  ;;  %4607 = vpow2.f32 %v7654_v58  ;;  %v2753_v15 = vmul.f32 1.442695, %v10369_v42  ;;  %v10376_v42 = vld [vmem:[#allocation47_spill] sm:$0xff] }
 0x30c   : > { %v3171_v40 = vadd.f32 %v7645_v62, %v3170_v48  ;;  %10368 = vst [vmem:[#allocation151_spill] sm:$0xff] %v7797_v21  ;;  %v3229_v37 = vadd.f32 %v7789_v39, %v3228_v59  ;;  %v3392_v48 = vmul.f32 %v7436_v34, %v10370_v22  ;;  %v7806_v55 = vpop.eup %4583  ;;  %4609 = vpow2.f32 %v2745_v4  ;;  %v10378_v4 = vld [vmem:[#allocation225_spill] sm:$0xff] }
 0x30d   : > { %10371 = vst [vmem:[#allocation159_spill] sm:$0xff] %v7806_v55  ;;  %v7813_v58 = vpop.eup %4585  ;;  %4611 = vpow2.f32 %v2749_v44  ;;  %v2757_v22 = vmul.f32 1.442695, %v10375_v33  ;;  %v10381_v33 = vsub.f32 %v10336_v45, %v7369_v3 }
 0x30e   : > { %v3172_v31 = vadd.f32 %v7673_v8, %v3171_v40  ;;  %10374 = vst [vmem:[#allocation26_spill] sm:$0xff] %v7813_v58  ;;  %v3230_v59 = vadd.f32 %v7797_v21, %v3229_v37  ;;  %3654 = vmatprep.subr.mxu1 %v3392_v48  ;;  %v3390_v40 = vmul.f32 %v7436_v34, %v10376_v42  ;;  %v7821_v7 = vpop.eup %4587  ;;  %4613 = vpow2.f32 %v7658_v29  ;;  %v10431_v8 = vld [vmem:[#allocation116_spill] sm:$0xff] }
 0x30f   : > { %10377 = vst [vmem:[#allocation50_spill] sm:$0xff] %v7821_v7  ;;  %v10379_v37 = vsub.f32 %v10334_v23, %v7369_v3  ;;  %3655 = vmatpush1.msra.mxu1 %v7315_v51  ;;  %v7831_v16 = vpop.eup %4589  ;;  %4615 = vpow2.f32 %v2753_v15  ;;  %v10382_v29 = vsub.f32 %v10337_v30, %v7369_v3  ;;  %v10384_v51 = vsub.f32 %v10339_v27, %v7369_v3 }
 0x310   : > { %v3173_v32 = vadd.f32 %v7690_v26, %v3172_v31  ;;  %10380 = vst [vmem:[#allocation70_spill] sm:$0xff] %v7831_v16  ;;  %v3231_v48 = vadd.f32 %v7806_v55, %v3230_v59  ;;  %v2765_v31 = vmul.f32 1.442695, %v10381_v33  ;;  %3656 = vmatprep.subr.mxu1 %v3390_v40  ;;  %v7840_v14 = vpop.eup %4591  ;;  %4617 = vpow2.f32 %v7660_v10  ;;  %v10435_v26 = vld [vmem:[#allocation124_spill] sm:$0xff]  ;;  %v10436_v55 = vld [vmem:[#allocation130_spill] sm:$0xff] }
 0x311   : > { %v2761_v44 = vmul.f32 1.442695, %v10379_v37  ;;  %v2769_v42 = vmul.f32 1.442695, %v10382_v29  ;;  %10383 = vst [vmem:[#allocation162_spill] sm:$0xff] %v7840_v14  ;;  %v10385_v15 = vsub.f32 %v10340_v53, %v7369_v3  ;;  %3657 = vmatpush1.msra.mxu1 %v7325_v60  ;;  %v7851_v37 = vpop.eup %4593  ;;  %4619 = vpow2.f32 %v2757_v22 }
 0x312   : > { %v3174_v23 = vadd.f32 %v7704_v52, %v3173_v32  ;;  %v2773_v59 = vmul.f32 1.442695, %v10384_v51  ;;  %10386 = vst [vmem:[#allocation174_spill] sm:$0xff] %v7851_v37  ;;  %v3232_v30 = vadd.f32 %v7813_v58, %v3231_v48  ;;  %v10387_v32 = vsub.f32 %v10342_v50, %v7369_v3  ;;  %v7862_v33 = vpop.eup %4595  ;;  %v10437_v52 = vld [vmem:[#allocation31_spill] sm:$0xff] }
 0x313   : > { %v2777_v45 = vmul.f32 1.442695, %v10385_v15  ;;  %v10388_v10 = vsub.f32 %v10343_v56, %v7369_v3  ;;  %10389 = vst [vmem:[#allocation51_spill] sm:$0xff] %v7862_v33  ;;  %4621 = vpow2.f32 %v7662_v41  ;;  %v10390_v60 = vsub.f32 %v10345_v11, %v7369_v3  ;;  %v7876_v29 = vpop.eup %4597 }
 0x314   : > { %v2781_v40 = vmul.f32 1.442695, %v10387_v32  ;;  %v3175_v53 = vadd.f32 %v7718_v5, %v3174_v23  ;;  %v10391_v50 = vsub.f32 %v10346_v9, %v7369_v3  ;;  %10392 = vst [vmem:[#allocation210_spill] sm:$0xff] %v7876_v29  ;;  %v3233_v56 = vadd.f32 %v7821_v7, %v3232_v30  ;;  %v7889_v15 = vpop.eup %4599  ;;  %v10443_v5 = vld [vmem:[#allocation147_spill] sm:$0xff]  ;;  %v10450_v7 = vld [vmem:[#allocation77_spill] sm:$0xff] }
 0x315   : > { %v7860_v27 = vmul.f32 1.442695, %v10388_v10  ;;  %v7869_v48 = vmul.f32 1.442695, %v10390_v60  ;;  %4623 = vpow2.f32 %v2761_v44  ;;  %v10393_v23 = vsub.f32 %v10348_v57, %v7369_v3  ;;  %10395 = vst [vmem:[#allocation98_spill] sm:$0xff] %v7889_v15  ;;  %v7903_v10 = vpop.eup %4601 }
 0x316   : > { %v7874_v22 = vmul.f32 1.442695, %v10391_v50  ;;  %v10394_v41 = vsub.f32 %v10349_v24, %v7369_v3  ;;  %v3176_v9 = vadd.f32 %v7733_v12, %v3175_v53  ;;  %4625 = vpow2.f32 %v7667_v25  ;;  %10398 = vst [vmem:[#allocation102_spill] sm:$0xff] %v7903_v10  ;;  %v7916_v50 = vpop.eup %4603  ;;  %v10449_v12 = vld [vmem:[#allocation62_spill] sm:$0xff] }
 0x317   : > { %v7882_v51 = vmul.f32 1.442695, %v10393_v23  ;;  %v10396_v30 = vsub.f32 %v10351_v20, %v7369_v3  ;;  %v10397_v57 = vsub.f32 %v10352_v46, %v7369_v3  ;;  %v3234_v24 = vadd.f32 %v7831_v16, %v3233_v56  ;;  %10401 = vst [vmem:[#allocation8_spill] sm:$0xff] %v7916_v50  ;;  %v10465_v16 = vld [vmem:[#allocation214_spill] sm:$0xff] }
 0x318   : > { %v7887_v11 = vmul.f32 1.442695, %v10394_v41  ;;  %4627 = vpow2.f32 %v2765_v31  ;;  %v10399_v53 = vsub.f32 %v10354_v61, %v7369_v3  ;;  %v10400_v20 = vsub.f32 %v10355_v47, %v7369_v3  ;;  %v7934_v41 = vpop.eup %4605 }
 0x319   : > { %v7896_v44 = vmul.f32 1.442695, %v10396_v30  ;;  %v7901_v32 = vmul.f32 1.442695, %v10397_v57  ;;  %4629 = vpow2.f32 %v7669_v2  ;;  %v10402_v46 = vsub.f32 %v10357_v17, %v7369_v3  ;;  %10405 = vst [vmem:[#allocation107_spill] sm:$0xff] %v7934_v41 }
 0x31a   : > { %v7909_v60 = vmul.f32 1.442695, %v10399_v53  ;;  %v7914_v25 = vmul.f32 1.442695, %v10400_v20  ;;  %v10403_v31 = vsub.f32 %v10358_v38, %v7369_v3  ;;  %v10404_v56 = vsub.f32 %v10360_v36, %v7369_v3  ;;  %v7947_v53 = vpop.eup %4607 }
 0x31b   : > { %v7922_v23 = vmul.f32 1.442695, %v10402_v46  ;;  %v3235_v30 = vadd.f32 %v7840_v14, %v3234_v24  ;;  %4631 = vpow2.f32 %v2769_v42  ;;  %v10406_v17 = vsub.f32 %v10361_v35, %v7369_v3  ;;  %10408 = vst [vmem:[#allocation111_spill] sm:$0xff] %v7947_v53  ;;  %v7961_v46 = vpop.eup %4609 }
 0x31c   : > { %v7927_v61 = vmul.f32 1.442695, %v10403_v31  ;;  %v7932_v47 = vmul.f32 1.442695, %v10404_v56  ;;  %v10407_v38 = vsub.f32 %v6733_v19, %v7369_v3  ;;  %v3177_v36 = vadd.f32 %v7749_v54, %v3176_v9  ;;  %10411 = vst [vmem:[#allocation115_spill] sm:$0xff] %v7961_v46  ;;  %v7974_v56 = vpop.eup %4611 }
 0x31d   : > { %v7940_v2 = vmul.f32 1.442695, %v10406_v17  ;;  %4633 = vpow2.f32 %v7671_v13  ;;  %v10409_v24 = vsub.f32 %v6838_v18, %v7369_v3  ;;  %v10410_v35 = vrot.slane %v7347_v6, 1  ;;  %10414 = vst [vmem:[#allocation119_spill] sm:$0xff] %v7974_v56  ;;  %v10415_v17 = vld [vmem:[#allocation213_spill] sm:$0xff] }
 0x31e   : > { %v7945_v57 = vmul.f32 1.442695, %v10407_v38  ;;  %v3236_v19 = vadd.f32 %v7851_v37, %v3235_v30  ;;  %4635 = vpow2.f32 %v2773_v59  ;;  %v10412_v9 = vsub.f32 %v6924_v28, %v7369_v3  ;;  %v10426_v37 = vld [vmem:[#allocation103_spill] sm:$0xff] }
 0x31f   : > { %v7954_v42 = vmul.f32 1.442695, %v10409_v24  ;;  %v7959_v20 = vmax.f32 %v7347_v6, %v10410_v35  ;;  %v10413_v18 = vsub.f32 %v6985_v0, %v7369_v3  ;;  %4637 = vpow2.f32 %v10415_v17  ;;  %v7992_v24 = vpop.eup %4613 }
 0x320   : > { %v7967_v31 = vmul.f32 1.442695, %v10412_v9  ;;  %v10416_v6 = vsub.f32 %v10366_v1, %v7369_v3  ;;  %v10417_v59 = vsub.f32 %v10367_v63, %v7369_v3  ;;  %v10418_v30 = vsub.f32 %v10372_v43, %v7369_v3  ;;  %10419 = vst [vmem:[#allocation123_spill] sm:$0xff] %v7992_v24 }
 0x321   : > { %v7972_v13 = vmul.f32 1.442695, %v10413_v18  ;;  %v3237_v35 = vadd.f32 %v7862_v33, %v3236_v19  ;;  %4639 = vpow2.f32 %v2777_v45  ;;  %v10420_v1 = vsub.f32 %v10373_v49, %v7369_v3  ;;  %v8002_v18 = vpop.eup %4615  ;;  %v10424_v45 = vld [vmem:[#allocation99_spill] sm:$0xff]  ;;  %v10430_v19 = vld [vmem:[#allocation112_spill] sm:$0xff] }
 0x322   : > { %v7980_v38 = vmul.f32 1.442695, %v10416_v6  ;;  %v7985_v28 = vmul.f32 1.442695, %v10417_v59  ;;  %v7990_v0 = vmul.f32 1.442695, %v10418_v30  ;;  %v3184_v63 = vadd.f32 %v7974_v56, %v7961_v46  ;;  %v8012_v30 = vpop.eup %4617 }
 0x323   : > { %v7998_v9 = vmul.f32 1.442695, %v10420_v1  ;;  %10421 = vst [vmem:[#allocation129_spill] sm:$0xff] %v8002_v18  ;;  %v3178_v17 = vrot.slane %v3177_v36, 4  ;;  %v10422_v6 = vld [vmem:[#allocation211_spill] sm:$0xff]  ;;  %v10423_v43 = vsub.f32 %v10378_v4, %v7369_v3  ;;  %10425 = vst [vmem:[#allocation28_spill] sm:$0xff] %v8012_v30  ;;  %v3238_v49 = vadd.f32 %v7876_v29, %v3237_v35  ;;  %v8018_v62 = vpop.eup %4619 }
 0x324   : > { %4641 = vpow2.f32 %v10422_v6  ;;  %v3185_v1 = vadd.f32 %v8002_v18, %v3184_v63  ;;  %10427 = vst [vmem:[#allocation46_spill] sm:$0xff] %v8018_v62  ;;  %v10428_v6 = vld [vmem:[#allocation12_spill] sm:$0xff]  ;;  %v10442_v35 = vld [vmem:[#allocation139_spill] sm:$0xff]  ;;  %v10462_v46 = vld [vmem:[#allocation150_spill] sm:$0xff] }
 0x325   : > { %v8008_v59 = vmul.f32 1.442695, %v10423_v43  ;;  %4643 = vpow2.f32 %v2781_v40  ;;  %v10429_v4 = vld [vmem:[#allocation108_spill] sm:$0xff]  ;;  %v8028_v40 = vpop.eup %4621  ;;  %v3239_v63 = vadd.f32 %v7889_v15, %v3238_v49  ;;  %v3179_v43 = vadd.f32 %v3178_v17, %v3177_v36  ;;  %v10440_v36 = vld [vmem:[#allocation135_spill] sm:$0xff]  ;;  %v10446_v17 = vld [vmem:[#allocation14_spill] sm:$0xff] }
 0x326   : > { %10432 = vst [vmem:[#allocation81_spill] sm:$0xff] %v8028_v40  ;;  %4645 = vpow2.f32 %v7860_v27  ;;  %v3186_v33 = vadd.f32 %v8018_v62, %v3185_v1  ;;  %v10433_v29 = vld [vmem:[#allocation120_spill] sm:$0xff]  ;;  %v8035_v21 = vpop.eup %4623  ;;  %v10439_v1 = vld [vmem:[#allocation49_spill] sm:$0xff] }
 0x327   : > { %10434 = vst [vmem:[#allocation138_spill] sm:$0xff] %v8035_v21  ;;  %v8043_v49 = vpop.eup %4625  ;;  %4647 = vpow2.f32 %v7869_v48  ;;  %v3240_v39 = vadd.f32 %v7903_v10, %v3239_v63  ;;  %v10444_v48 = vld [vmem:[#allocation155_spill] sm:$0xff]  ;;  %v10447_v63 = vld [vmem:[#allocation38_spill] sm:$0xff]  ;;  %v3180_v58 = vrot.slane %v3179_v43, 2  ;;  %v10451_v56 = vld [vmem:[#allocation168_spill] sm:$0xff] }
 0x328   : > { %10438 = vst [vmem:[#allocation146_spill] sm:$0xff] %v8043_v49  ;;  %v3187_v27 = vadd.f32 %v8035_v21, %v3186_v33  ;;  %v8051_v15 = vpop.eup %4627  ;;  %4649 = vpow2.f32 %v7874_v22  ;;  %v10453_v10 = vld [vmem:[#allocation180_spill] sm:$0xff]  ;;  %v10454_v62 = vld [vmem:[#allocation33_spill] sm:$0xff]  ;;  %v10456_v22 = vld [vmem:[#allocation67_spill] sm:$0xff] }
 0x329   : > { %10441 = vst [vmem:[#allocation154_spill] sm:$0xff] %v8051_v15  ;;  %v8060_v33 = vpop.eup %4629  ;;  %4651 = vpow2.f32 %v7882_v51  ;;  %v3241_v14 = vadd.f32 %v7916_v50, %v3240_v39  ;;  %v10459_v21 = vld [vmem:[#allocation193_spill] sm:$0xff]  ;;  %v10468_v49 = vld [vmem:[#allocation218_spill] sm:$0xff] }
 0x32a   : > { %10445 = vst [vmem:[#allocation10_spill] sm:$0xff] %v8060_v33  ;;  %v3188_v3 = vadd.f32 %v8051_v15, %v3187_v27  ;;  %v8068_v54 = vpop.eup %4631  ;;  %4653 = vpow2.f32 %v7887_v11  ;;  %v3181_v11 = vadd.f32 %v3180_v58, %v3179_v43  ;;  %v10466_v58 = vsub.f32 %v10424_v45, %v7959_v20  ;;  %v10470_v45 = vld [vmem:[#allocation222_spill] sm:$0xff] }
 0x32b   : > { %10448 = vst [vmem:[#allocation35_spill] sm:$0xff] %v8068_v54  ;;  %v8076_v18 = vpop.eup %4633  ;;  %4655 = vpow2.f32 %v7896_v44  ;;  %v3242_v51 = vadd.f32 %v7934_v41, %v3241_v14  ;;  %v10475_v41 = vsub.f32 %v10431_v8, %v7959_v20 }
 0x32c   : > { %10452 = vst [vmem:[#allocation60_spill] sm:$0xff] %v8076_v18  ;;  %v3189_v27 = vadd.f32 %v8068_v54, %v3188_v3  ;;  %v8084_v15 = vpop.eup %4635  ;;  %v10457_v18 = vld [vmem:[#allocation89_spill] sm:$0xff]  ;;  %4657 = vpow2.f32 %v7901_v32  ;;  %v2873_v43 = vmul.f32 1.442695, %v10466_v58  ;;  %v10474_v58 = vsub.f32 %v10430_v19, %v7959_v20 }
 0x32d   : > { %10455 = vst [vmem:[#allocation75_spill] sm:$0xff] %v8084_v15  ;;  %v8092_v33 = vpop.eup %4637  ;;  %v10460_v54 = vld [vmem:[#allocation37_spill] sm:$0xff]  ;;  %4659 = vpow2.f32 %v7909_v60  ;;  %v10469_v60 = vsub.f32 %v10426_v37, %v7959_v20 }
 0x32e   : > { %10458 = vst [vmem:[#allocation91_spill] sm:$0xff] %v8092_v33  ;;  %v3190_v3 = vadd.f32 %v8084_v15, %v3189_v27  ;;  %v8100_v50 = vpop.eup %4639  ;;  %v10463_v33 = vld [vmem:[#allocation68_spill] sm:$0xff]  ;;  %4661 = vpow2.f32 %v7914_v25  ;;  %v3182_v25 = vrot.slane %v3181_v11, 1  ;;  %v10472_v15 = vsub.f32 %v10428_v6, %v7959_v20 }
 0x32f   : > { %10461 = vst [vmem:[#allocation172_spill] sm:$0xff] %v8100_v50  ;;  %4663 = vpow2.f32 %v7922_v23  ;;  %v10473_v23 = vsub.f32 %v10429_v4, %v7959_v20  ;;  %v3243_v6 = vadd.f32 %v7947_v53, %v3242_v51  ;;  %v10515_v53 = vld [vmem:[#allocation131_spill] sm:$0xff] }
 0x330   : > { %v3191_v27 = vadd.f32 %v8100_v50, %v3190_v3  ;;  %v2877_v3 = vmul.f32 1.442695, %v10469_v60  ;;  %4665 = vpow2.f32 %v7927_v61  ;;  %v2881_v37 = vmul.f32 1.442695, %v10472_v15  ;;  %v10476_v15 = vld [vmem:[#allocation23_spill] sm:$0xff]  ;;  %v10478_v50 = vld [vmem:[#allocation230_spill] sm:$0xff] }
 0x331   : > { %v8107_v44 = vpop.eup %4641  ;;  %v2885_v60 = vmul.f32 1.442695, %v10473_v23  ;;  %4667 = vpow2.f32 %v2873_v43  ;;  %v3388_v4 = vmul.f32 %v7436_v34, %v10476_v15  ;;  %v10477_v23 = vld [vmem:[#allocation71_spill] sm:$0xff]  ;;  %v10479_v43 = vsub.f32 %v10433_v29, %v7959_v20 }
 0x332   : > { %10464 = vst [vmem:[#allocation11_spill] sm:$0xff] %v8107_v44  ;;  %v8116_v32 = vpop.eup %4643  ;;  %v2889_v44 = vmul.f32 1.442695, %v10474_v58  ;;  %4669 = vpow2.f32 %v2877_v3  ;;  %v8166_v3 = vadd.f32 %v3182_v25, %v3181_v11  ;;  %v10481_v15 = vld [vmem:[#allocation207_spill] sm:$0xff]  ;;  %v10484_v11 = vsub.f32 %v10437_v52, %v7959_v20 }
 0x333   : > { %10467 = vst [vmem:[#allocation45_spill] sm:$0xff] %v8116_v32  ;;  %v3192_v39 = vadd.f32 %v8116_v32, %v3191_v27  ;;  %v8131_v14 = vpop.eup %4645  ;;  %v2893_v32 = vmul.f32 1.442695, %v10475_v41  ;;  %4671 = vpow2.f32 %v7932_v47  ;;  %v2897_v8 = vmul.f32 1.442695, %v10479_v43  ;;  %3658 = vmatprep.subr.mxu1 %v3388_v4  ;;  %v10486_v4 = vld [vmem:[#allocation83_spill] sm:$0xff] }
 0x334   : > { %v8147_v61 = vpop.eup %4647  ;;  %v10480_v41 = vsub.f32 %v10435_v26, %v7959_v20  ;;  %4673 = vpow2.f32 %v2881_v37  ;;  %v3386_v47 = vmul.f32 %v7436_v34, %v10481_v15  ;;  %v10483_v26 = vsub.f32 %v10436_v55, %v7959_v20  ;;  %v10485_v37 = vld [vmem:[#allocation93_spill] sm:$0xff] }
 0x335   : > { %v3193_v27 = vadd.f32 %v8131_v14, %v3192_v39  ;;  %v3322_v39 = vmul.f32 %v10478_v50, %v10477_v23  ;;  %v8164_v51 = vpop.eup %4649  ;;  %4675 = vpow2.f32 %v7940_v2  ;;  %v8182_v25 = vmul.f32 1.442695, %v10484_v11  ;;  %3659 = vmatpush1.msra.mxu1 %v10485_v37 }
 0x336   : > { %v8162_v58 = vmul.f32 1.442695, %v10480_v41  ;;  %v8177_v43 = vmul.f32 1.442695, %v10483_v26  ;;  %v3244_v2 = vadd.f32 %v7992_v24, %v3243_v6  ;;  %4677 = vpow2.f32 %v2885_v60  ;;  %3660 = vmatprep.subr.mxu1 %v3386_v47  ;;  %v10488_v41 = vld [vmem:[#allocation61_spill] sm:$0xff]  ;;  %v10491_v47 = vld [vmem:[#allocation84_spill] sm:$0xff] }
 0x337   : > { %v3194_v19 = vadd.f32 %v8147_v61, %v3193_v27  ;;  %3571 = vmatprep.subr.mxu0 %v3322_v39  ;;  %v10482_v27 = vld [vmem:[#allocation69_spill] sm:$0xff]  ;;  %v8186_v39 = vpop.eup %4651  ;;  %v3318_v15 = vmul.f32 %v10478_v50, %v10488_v41  ;;  %4679 = vpow2.f32 %v7945_v57  ;;  %v10489_v26 = vsub.f32 %v10439_v1, %v7959_v20  ;;  %3661 = vmatpush1.msra.mxu1 %v10491_v47  ;;  %v10500_v47 = vld [vmem:[#allocation167_spill] sm:$0xff] }
 0x338   : > { %v3320_v23 = vmul.f32 %v10478_v50, %v10482_v27  ;;  %3572 = vmatpush1.msra.mxu0 %v10486_v4  ;;  %v8193_v52 = vpop.eup %4653  ;;  %v10490_v60 = vsub.f32 %v10440_v36, %v7959_v20  ;;  %4681 = vpow2.f32 %v2889_v44  ;;  %v10493_v57 = vsub.f32 %v10442_v35, %v7959_v20  ;;  %v10494_v1 = vld [vmem:[#allocation205_spill] sm:$0xff]  ;;  %v10495_v36 = vld [vmem:[#allocation54_spill] sm:$0xff] }
 0x339   : > { %v3195_v29 = vadd.f32 %v8164_v51, %v3194_v19  ;;  %v10487_v19 = vld [vmem:[#allocation206_spill] sm:$0xff]  ;;  %v8200_v11 = vmul.f32 1.442695, %v10489_v26  ;;  %v8209_v37 = vpop.eup %4655  ;;  %v3382_v4 = vmul.f32 %v7436_v34, %v10494_v1  ;;  %4683 = vpow2.f32 %v7954_v42 }
 0x33a   : > { %3573 = vmatprep.subr.mxu0 %v3320_v23  ;;  %v3384_v55 = vmul.f32 %v7436_v34, %v10487_v19  ;;  %v8205_v6 = vmul.f32 1.442695, %v10490_v60  ;;  %v10492_v23 = vld [vmem:[#allocation76_spill] sm:$0xff]  ;;  %v3316_v19 = vmul.f32 %v10478_v50, %v10495_v36  ;;  %v8220_v41 = vpop.eup %4657  ;;  %v10497_v44 = vsub.f32 %v10443_v5, %v7959_v20 }
 0x33b   : > { %v3196_v27 = vadd.f32 %v8186_v39, %v3195_v29  ;;  %3574 = vmatpush1.msra.mxu0 %v10492_v23  ;;  %v8214_v29 = vmul.f32 1.442695, %v10493_v57  ;;  %10496 = vst [vmem:[#allocation158_spill] sm:$0xff] %v8220_v41  ;;  %v10499_v60 = vld [vmem:[#allocation136_spill] sm:$0xff]  ;;  %v8236_v23 = vpop.eup %4659  ;;  %v3245_v42 = vadd.f32 %v8012_v30, %v3244_v2  ;;  %4685 = vpow2.f32 %v2893_v32  ;;  %v10502_v57 = vld [vmem:[#allocation42_spill] sm:$0xff]  ;;  %v10504_v32 = vld [vmem:[#allocation165_spill] sm:$0xff] }
 0x33c   : > { %3662 = vmatprep.subr.mxu1 %v3384_v55  ;;  %3575 = vmatprep.subr.mxu0 %v3318_v15  ;;  %v8227_v35 = vmul.f32 1.442695, %v10497_v44  ;;  %v10498_v55 = vsub.f32 %v10444_v48, %v7959_v20  ;;  %v3314_v1 = vmul.f32 %v10478_v50, %v10502_v57  ;;  %v8243_v48 = vpop.eup %4661  ;;  %4687 = vpow2.f32 %v7967_v31  ;;  %v10505_v2 = vld [vmem:[#allocation74_spill] sm:$0xff]  ;;  %v10510_v57 = vld [vmem:[#allocation36_spill] sm:$0xff] }
 0x33d   : > { %v3197_v26 = vadd.f32 %v8193_v52, %v3196_v27  ;;  %3663 = vmatpush1.msra.mxu1 %v10499_v60  ;;  %3576 = vmatpush1.msra.mxu0 %v10500_v47  ;;  %v10501_v27 = vld [vmem:[#allocation87_spill] sm:$0xff]  ;;  %v10503_v44 = vsub.f32 %v10446_v17, %v7959_v20  ;;  %v8256_v47 = vpop.eup %4663  ;;  %4689 = vpow2.f32 %v2897_v8  ;;  %v10508_v31 = vsub.f32 %v10447_v63, %v7959_v20  ;;  %v10509_v17 = vld [vmem:[#allocation204_spill] sm:$0xff] }
 0x33e   : > { %v8232_v15 = vmul.f32 1.442695, %v10498_v55  ;;  %3664 = vmatprep.subr.mxu1 %v3382_v4  ;;  %3577 = vmatprep.subr.mxu0 %v3316_v19  ;;  %v3380_v5 = vmul.f32 %v7436_v34, %v10501_v27  ;;  %v10506_v4 = vld [vmem:[#allocation25_spill] sm:$0xff]  ;;  %v10507_v19 = vld [vmem:[#allocation198_spill] sm:$0xff]  ;;  %v10511_v8 = vsub.f32 %v10449_v12, %v7959_v20  ;;  %v10512_v63 = vld [vmem:[#allocation96_spill] sm:$0xff]  ;;  %4691 = vpow2.f32 %v8162_v58 }
 0x33f   : > { %v3198_v36 = vadd.f32 %v8209_v37, %v3197_v26  ;;  %v8250_v55 = vmul.f32 1.442695, %v10503_v44  ;;  %3665 = vmatpush1.msra.mxu1 %v10504_v32  ;;  %3578 = vmatpush1.msra.mxu0 %v10505_v2  ;;  %v3313_v60 = vmul.f32 %v10507_v19, %v10506_v4  ;;  %v8261_v27 = vmul.f32 1.442695, %v10508_v31  ;;  %v8267_v32 = vpop.eup %4665  ;;  %v10517_v12 = vld [vmem:[#allocation203_spill] sm:$0xff]  ;;  %v10521_v58 = vld [vmem:[#allocation128_spill] sm:$0xff] }
 0x340   : > { %3666 = vmatprep.subr.mxu1 %v3380_v5  ;;  %3579 = vmatprep.subr.mxu0 %v3314_v1  ;;  %v3378_v26 = vmul.f32 %v7436_v34, %v10509_v17  ;;  %v3312_v44 = vmul.f32 %v10478_v50, %v10510_v57  ;;  %v8273_v4 = vmul.f32 1.442695, %v10511_v8  ;;  %v10513_v5 = vld [vmem:[#allocation57_spill] sm:$0xff]  ;;  %v10514_v1 = vld [vmem:[#allocation86_spill] sm:$0xff]  ;;  %v3311_v17 = vmul.f32 %v10507_v19, %v10515_v53  ;;  %v8280_v24 = vpop.eup %4667  ;;  %v10518_v8 = vld [vmem:[#allocation24_spill] sm:$0xff] }
 0x341   : > { %v3199_v2 = vadd.f32 %v8220_v41, %v3198_v36  ;;  %3667 = vmatpush1.msra.mxu1 %v10512_v63  ;;  %3580 = vmatpush1.msra.mxu0 %v3313_v60  ;;  %v3377_v31 = vmul.f32 %v10514_v1, %v10513_v5  ;;  %10516 = vst [vmem:[#allocation209_spill] sm:$0xff] %v8280_v24  ;;  %v8290_v63 = vpop.eup %4669  ;;  %4693 = vpow2.f32 %v7972_v13  ;;  %v10522_v13 = vld [vmem:[#allocation201_spill] sm:$0xff] }
 0x342   : > { %v8283_v57 = vadd.f32 %v8028_v40, %v3245_v42  ;;  %3668 = vmatprep.subr.mxu1 %v3378_v26  ;;  %3581 = vmatprep.subr.mxu0 %v3312_v44  ;;  %v3376_v36 = vmul.f32 %v7436_v34, %v10517_v12  ;;  %v3310_v60 = vmul.f32 %v10478_v50, %v10518_v8  ;;  %v10520_v42 = vld [vmem:[#allocation44_spill] sm:$0xff]  ;;  %v8298_v44 = vpop.eup %4671  ;;  %4695 = vpow2.f32 %v8177_v43 }
 0x343   : > { %10519 = vst [vmem:[#allocation208_spill] sm:$0xff] %v8290_v63  ;;  %v3200_v53 = vadd.f32 %v8236_v23, %v3199_v2  ;;  %3669 = vmatpush1.msra.mxu1 %v3377_v31  ;;  %3582 = vmatpush1.msra.mxu0 %v3311_v17  ;;  %v3375_v5 = vmul.f32 %v10514_v1, %v10520_v42  ;;  %v10523_v31 = vld [vmem:[#allocation184_spill] sm:$0xff]  ;;  %v8307_v8 = vpop.eup %4673  ;;  %4697 = vpow2.f32 %v8182_v25 }
 0x344   : > { %v3309_v26 = vmul.f32 %v10507_v19, %v10521_v58  ;;  %v3258_v12 = vadd.f32 %v8290_v63, %v8280_v24  ;;  %3670 = vmatprep.subr.mxu1 %v3376_v36  ;;  %3583 = vmatprep.subr.mxu0 %v3310_v60  ;;  %v3374_v2 = vmul.f32 %v7436_v34, %v10522_v13  ;;  %v10526_v43 = vld [vmem:[#allocation32_spill] sm:$0xff]  ;;  %v10527_v60 = vld [vmem:[#allocation125_spill] sm:$0xff]  ;;  %v8319_v40 = vpop.eup %4675  ;;  %4699 = vpow2.f32 %v7980_v38 }
 0x345   : > { %v3308_v17 = vmul.f32 %v10478_v50, %v10523_v31  ;;  %10524 = vst [vmem:[#allocation63_spill] sm:$0xff] %v8307_v8  ;;  %v3201_v42 = vadd.f32 %v8243_v48, %v3200_v53  ;;  %v10525_v58 = vsub.f32 %v10450_v7, %v7959_v20  ;;  %3671 = vmatpush1.msra.mxu1 %v3375_v5  ;;  %v10528_v53 = vld [vmem:[#allocation199_spill] sm:$0xff]  ;;  %4701 = vpow2.f32 %v8200_v11  ;;  %v10537_v11 = vld [vmem:[#allocation161_spill] sm:$0xff]  ;;  %v10567_v24 = vld [vmem:[#allocation200_spill] sm:$0xff] }
 0x346   : > { %3584 = vmatpush1.msra.mxu0 %v3309_v26  ;;  %v3373_v36 = vmul.f32 %v10514_v1, %v10526_v43  ;;  %v3307_v13 = vmul.f32 %v10507_v19, %v10527_v60  ;;  %v3259_v31 = vadd.f32 %v8307_v8, %v3258_v12  ;;  %3672 = vmatprep.subr.mxu1 %v3374_v2  ;;  %v8327_v26 = vpop.eup %4677  ;;  %v10531_v60 = vld [vmem:[#allocation21_spill] sm:$0xff]  ;;  %v10532_v12 = vld [vmem:[#allocation122_spill] sm:$0xff]  ;;  %4703 = vpow2.f32 %v8205_v6 }
 0x347   : > { %v8313_v30 = vmul.f32 1.442695, %v10525_v58  ;;  %3585 = vmatprep.subr.mxu0 %v3308_v17  ;;  %v3372_v7 = vmul.f32 %v7436_v34, %v10528_v53  ;;  %v10529_v58 = vld [vmem:[#allocation183_spill] sm:$0xff]  ;;  %10530 = vst [vmem:[#allocation92_spill] sm:$0xff] %v8327_v26  ;;  %v3202_v43 = vadd.f32 %v8256_v47, %v3201_v42  ;;  %v3371_v25 = vmul.f32 %v10514_v1, %v10531_v60  ;;  %v8335_v17 = vpop.eup %4679  ;;  %v10534_v42 = vld [vmem:[#allocation182_spill] sm:$0xff] }
 0x348   : > { %v3306_v5 = vmul.f32 %v10478_v50, %v10529_v58  ;;  %3673 = vmatpush1.msra.mxu1 %v3373_v36  ;;  %3586 = vmatpush1.msra.mxu0 %v3307_v13  ;;  %v3305_v2 = vmul.f32 %v10507_v19, %v10532_v12  ;;  %v3260_v53 = vadd.f32 %v8327_v26, %v3259_v31  ;;  %v10533_v58 = vld [vmem:[#allocation197_spill] sm:$0xff]  ;;  %v8343_v13 = vpop.eup %4681  ;;  %4705 = vpow2.f32 %v7985_v28 }
 0x349   : > { %3674 = vmatprep.subr.mxu1 %v3372_v7  ;;  %v3370_v38 = vmul.f32 %v7436_v34, %v10533_v58  ;;  %v3304_v36 = vmul.f32 %v10478_v50, %v10534_v42  ;;  %10535 = vst [vmem:[#allocation47_spill] sm:$0xff] %v8343_v13  ;;  %v3203_v60 = vadd.f32 %v8267_v32, %v3202_v43  ;;  %v10538_v7 = vld [vmem:[#allocation121_spill] sm:$0xff]  ;;  %v8355_v58 = vpop.eup %4683  ;;  %v10539_v43 = vld [vmem:[#allocation196_spill] sm:$0xff]  ;;  %4707 = vpow2.f32 %v8214_v29 }
 0x34a   : > { %3587 = vmatprep.subr.mxu0 %v3306_v5  ;;  %v10536_v12 = vsub.f32 %v10451_v56, %v7959_v20  ;;  %3675 = vmatpush1.msra.mxu1 %v3371_v25  ;;  %v3369_v31 = vmul.f32 %v10514_v1, %v10537_v11  ;;  %v3303_v5 = vmul.f32 %v10507_v19, %v10538_v7  ;;  %v10542_v7 = vld [vmem:[#allocation160_spill] sm:$0xff]  ;;  %4709 = vpow2.f32 %v7990_v0  ;;  %v10549_v0 = vld [vmem:[#allocation78_spill] sm:$0xff] }
 0x34b   : > { %3588 = vmatpush1.msra.mxu0 %v3305_v2  ;;  %v3261_v42 = vadd.f32 %v8343_v13, %v3260_v53  ;;  %3676 = vmatprep.subr.mxu1 %v3370_v38  ;;  %v3368_v56 = vmul.f32 %v7436_v34, %v10539_v43  ;;  %v8363_v2 = vpop.eup %4685  ;;  %v3204_v11 = vadd.f32 %v8298_v44, %v3203_v60  ;;  %v10543_v53 = vld [vmem:[#allocation72_spill] sm:$0xff]  ;;  %4711 = vpow2.f32 %v8227_v35  ;;  %v10592_v13 = vld [vmem:[#allocation190_spill] sm:$0xff] }
 0x34c   : > { %v8349_v41 = vmul.f32 1.442695, %v10536_v12  ;;  %3589 = vmatprep.subr.mxu0 %v3304_v36  ;;  %v10540_v12 = vld [vmem:[#allocation212_spill] sm:$0xff]  ;;  %10541 = vst [vmem:[#allocation225_spill] sm:$0xff] %v8363_v2  ;;  %3677 = vmatpush1.msra.mxu1 %v3369_v31  ;;  %v3367_v6 = vmul.f32 %v10514_v1, %v10542_v7  ;;  %v3365_v38 = vmul.f32 %v10507_v19, %v10543_v53  ;;  %v8371_v36 = vpop.eup %4687  ;;  %v10546_v53 = vld [vmem:[#allocation65_spill] sm:$0xff]  ;;  %4713 = vpow2.f32 %v7998_v9 }
 0x34d   : > { %v3366_v25 = vmul.f32 %v10478_v50, %v10540_v12  ;;  %3590 = vmatpush1.msra.mxu0 %v3303_v5  ;;  %v3262_v43 = vadd.f32 %v8363_v2, %v3261_v42  ;;  %3678 = vmatprep.subr.mxu1 %v3368_v56  ;;  %v10544_v12 = vld [vmem:[#allocation137_spill] sm:$0xff]  ;;  %v10545_v60 = vld [vmem:[#allocation80_spill] sm:$0xff]  ;;  %v8379_v5 = vpop.eup %4689  ;;  %v3205_v7 = vadd.f32 %v8319_v40, %v3204_v11  ;;  %4715 = vpow2.f32 %v8232_v15 }
 0x34e   : > { %v3430_v28 = vmul.f32 %v7436_v34, %v10544_v12  ;;  %v3364_v31 = vmul.f32 %v10478_v50, %v10545_v60  ;;  %3679 = vmatpush1.msra.mxu1 %v3367_v6  ;;  %v3429_v29 = vmul.f32 %v10514_v1, %v10546_v53  ;;  %v10547_v42 = vld [vmem:[#allocation64_spill] sm:$0xff]  ;;  %v10548_v12 = vld [vmem:[#allocation185_spill] sm:$0xff]  ;;  %v3362_v11 = vmul.f32 %v10478_v50, %v10549_v0  ;;  %v8393_v6 = vpop.eup %4691  ;;  %v10550_v53 = vld [vmem:[#allocation58_spill] sm:$0xff] }
 0x34f   : > { %3591 = vmatprep.subr.mxu0 %v3366_v25  ;;  %v3363_v56 = vmul.f32 %v10507_v19, %v10547_v42  ;;  %v3263_v25 = vadd.f32 %v8379_v5, %v3262_v43  ;;  %v3428_v60 = vmul.f32 %v7436_v34, %v10548_v12  ;;  %v3427_v35 = vmul.f32 %v10514_v1, %v10550_v53  ;;  %v10551_v43 = vld [vmem:[#allocation53_spill] sm:$0xff]  ;;  %v10552_v12 = vld [vmem:[#allocation231_spill] sm:$0xff]  ;;  %v10554_v53 = vld [vmem:[#allocation48_spill] sm:$0xff] }
 0x350   : > { %3592 = vmatpush2.msra.mxu0 %v3365_v38  ;;  %3680 = vmatprep.subr.mxu1 %v3430_v28  ;;  %v3206_v38 = vadd.f32 %v8335_v17, %v3205_v7  ;;  %v3361_v28 = vmul.f32 %v10507_v19, %v10551_v43  ;;  %v3426_v9 = vmul.f32 %v7436_v34, %v10552_v12  ;;  %v10553_v7 = vld [vmem:[#allocation142_spill] sm:$0xff]  ;;  %4717 = vpow2.f32 %v8008_v59  ;;  %v10556_v43 = vld [vmem:[#allocation229_spill] sm:$0xff]  ;;  %v10557_v59 = vld [vmem:[#allocation59_spill] sm:$0xff] }
 0x351   : > { %3593 = vmatprep.subr.mxu0 %v3364_v31  ;;  %3681 = vmatpush2.msra.mxu1 %v3429_v29  ;;  %v8401_v31 = vpop.eup %4693  ;;  %v3264_v42 = vadd.f32 %v8393_v6, %v3263_v25  ;;  %v3360_v29 = vmul.f32 %v10478_v50, %v10553_v7  ;;  %v3425_v15 = vmul.f32 %v10514_v1, %v10554_v53  ;;  %v10555_v25 = vld [vmem:[#allocation41_spill] sm:$0xff]  ;;  %4719 = vpow2.f32 %v8250_v55  ;;  %v10559_v55 = vld [vmem:[#allocation39_spill] sm:$0xff] }
 0x352   : > { %3594 = vmatpush2.msra.mxu0 %v3363_v56  ;;  %3682 = vmatprep.subr.mxu1 %v3428_v60  ;;  %v8409_v56 = vpop.eup %4695  ;;  %v3207_v0 = vadd.f32 %v8355_v58, %v3206_v38  ;;  %v3359_v60 = vmul.f32 %v10507_v19, %v10555_v25  ;;  %v3424_v12 = vmul.f32 %v7436_v34, %v10556_v43  ;;  %4721 = vpow2.f32 %v8261_v27  ;;  %v10564_v27 = vld [vmem:[#allocation30_spill] sm:$0xff]  ;;  %v10598_v2 = vld [vmem:[#allocation189_spill] sm:$0xff] }
 0x353   : > { %3595 = vmatprep.subr.mxu0 %v3362_v11  ;;  %3683 = vmatpush2.msra.mxu1 %v3427_v35  ;;  %v3265_v11 = vadd.f32 %v8409_v56, %v3264_v42  ;;  %v3358_v38 = vmul.f32 %v10478_v50, %v10557_v59  ;;  %v8423_v35 = vpop.eup %4697  ;;  %v10558_v7 = vsub.f32 %v10453_v10, %v7959_v20  ;;  %v10562_v59 = vld [vmem:[#allocation202_spill] sm:$0xff]  ;;  %4723 = vpow2.f32 %v8273_v4 }
 0x354   : > { %3596 = vmatpush2.msra.mxu0 %v3361_v28  ;;  %3684 = vmatprep.subr.mxu1 %v3426_v9  ;;  %v3208_v28 = vadd.f32 %v8371_v36, %v3207_v0  ;;  %v3423_v42 = vmul.f32 %v10514_v1, %v10559_v55  ;;  %v10560_v9 = vld [vmem:[#allocation29_spill] sm:$0xff]  ;;  %v8433_v25 = vpop.eup %4699  ;;  %v10561_v0 = vld [vmem:[#allocation227_spill] sm:$0xff]  ;;  %v10563_v55 = vsub.f32 %v10454_v62, %v7959_v20  ;;  %v10569_v4 = vld [vmem:[#allocation22_spill] sm:$0xff]  ;;  %4725 = vpow2.f32 %v8313_v30 }
 0x355   : > { %3597 = vmatprep.subr.mxu0 %v3360_v29  ;;  %v2953_v53 = vmul.f32 1.442695, %v10558_v7  ;;  %3685 = vmatpush2.msra.mxu1 %v3425_v15  ;;  %v3357_v29 = vmul.f32 %v10507_v19, %v10560_v9  ;;  %v3266_v43 = vadd.f32 %v8423_v35, %v3265_v11  ;;  %v3422_v10 = vmul.f32 %v7436_v34, %v10561_v0  ;;  %v10574_v30 = vld [vmem:[#allocation15_spill] sm:$0xff] }
 0x356   : > { %3598 = vmatpush2.msra.mxu0 %v3359_v60  ;;  %3686 = vmatprep.subr.mxu1 %v3424_v12  ;;  %v3356_v15 = vmul.f32 %v10478_v50, %v10562_v59  ;;  %v8441_v60 = vpop.eup %4701  ;;  %v3209_v7 = vadd.f32 %v8401_v31, %v3208_v28  ;;  %v2957_v9 = vmul.f32 1.442695, %v10563_v55  ;;  %v3421_v11 = vmul.f32 %v10514_v1, %v10564_v27  ;;  %v10565_v12 = vld [vmem:[#allocation18_spill] sm:$0xff] }
 0x357   : > { %3599 = vmatprep.subr.mxu0 %v3358_v38  ;;  %3687 = vmatpush2.msra.mxu1 %v3423_v42  ;;  %v3355_v38 = vmul.f32 %v10507_v19, %v10565_v12  ;;  %v3267_v0 = vadd.f32 %v8441_v60, %v3266_v43  ;;  %v10566_v59 = vld [vmem:[#allocation226_spill] sm:$0xff]  ;;  %v3354_v62 = vmul.f32 %v10478_v50, %v10567_v24  ;;  %v8457_v42 = vpop.eup %4703  ;;  %4727 = vpow2.f32 %v8349_v41  ;;  %v10579_v41 = vld [vmem:[#allocation181_spill] sm:$0xff] }
 0x358   : > { %3600 = vmatpush2.msra.mxu0 %v3357_v29  ;;  %3688 = vmatprep.subr.mxu1 %v3422_v10  ;;  %v3420_v28 = vmul.f32 %v7436_v34, %v10566_v59  ;;  %v3210_v29 = vadd.f32 %v8433_v25, %v3209_v7  ;;  %v10568_v55 = vsub.f32 %v10456_v22, %v7959_v20  ;;  %v10570_v10 = vld [vmem:[#allocation157_spill] sm:$0xff]  ;;  %v8467_v12 = vpop.eup %4705  ;;  %v10571_v7 = vld [vmem:[#allocation224_spill] sm:$0xff]  ;;  %v10572_v59 = vld [vmem:[#allocation195_spill] sm:$0xff]  ;;  %4729 = vpow2.f32 %v2953_v53 }
 0x359   : > { %3601 = vmatprep.subr.mxu0 %v3356_v15  ;;  %3689 = vmatpush2.msra.mxu1 %v3421_v11  ;;  %v3419_v43 = vmul.f32 %v10514_v1, %v10569_v4  ;;  %v3353_v15 = vmul.f32 %v10507_v19, %v10570_v10  ;;  %v3268_v24 = vadd.f32 %v8457_v42, %v3267_v0  ;;  %v10584_v53 = vld [vmem:[#allocation179_spill] sm:$0xff]  ;;  %4731 = vpow2.f32 %v2957_v9  ;;  %v10589_v9 = vld [vmem:[#allocation177_spill] sm:$0xff] }
 0x35a   : > { %v2961_v27 = vmul.f32 1.442695, %v10568_v55  ;;  %3602 = vmatpush2.msra.mxu0 %v3355_v38  ;;  %3690 = vmatprep.subr.mxu1 %v3420_v28  ;;  %v3418_v22 = vmul.f32 %v7436_v34, %v10571_v7  ;;  %v3352_v11 = vmul.f32 %v10478_v50, %v10572_v59  ;;  %v8475_v38 = vpop.eup %4707  ;;  %v3211_v55 = vadd.f32 %v8467_v12, %v3210_v29  ;;  %v10575_v28 = vld [vmem:[#allocation156_spill] sm:$0xff]  ;;  %v10576_v29 = vld [vmem:[#allocation223_spill] sm:$0xff] }
 0x35b   : > { %3603 = vmatprep.subr.mxu0 %v3354_v62  ;;  %v10573_v4 = vsub.f32 %v10457_v18, %v7959_v20  ;;  %3691 = vmatpush2.msra.mxu1 %v3419_v43  ;;  %v3417_v0 = vmul.f32 %v10514_v1, %v10574_v30  ;;  %v3351_v62 = vmul.f32 %v10507_v19, %v10575_v28  ;;  %v8485_v7 = vpop.eup %4709 }
 0x35c   : > { %3604 = vmatpush2.msra.mxu0 %v3353_v15  ;;  %v3269_v59 = vadd.f32 %v8475_v38, %v3268_v24  ;;  %3692 = vmatprep.subr.mxu1 %v3418_v22  ;;  %v3416_v18 = vmul.f32 %v7436_v34, %v10576_v29  ;;  %v8493_v15 = vpop.eup %4711  ;;  %v3212_v30 = vadd.f32 %v8485_v7, %v3211_v55  ;;  %v10580_v22 = vld [vmem:[#allocation153_spill] sm:$0xff]  ;;  %v10581_v55 = vld [vmem:[#allocation95_spill] sm:$0xff]  ;;  %4733 = vpow2.f32 %v2961_v27 }
 0x35d   : > { %v2965_v10 = vmul.f32 1.442695, %v10573_v4  ;;  %3605 = vmatprep.subr.mxu0 %v3352_v11  ;;  %v10577_v4 = vld [vmem:[#allocation194_spill] sm:$0xff]  ;;  %v10578_v28 = vsub.f32 %v10459_v21, %v7959_v20  ;;  %3693 = vmatpush2.msra.mxu1 %v3417_v0  ;;  %v3415_v24 = vmul.f32 %v10514_v1, %v10579_v41  ;;  %v3349_v11 = vmul.f32 %v10507_v19, %v10580_v22  ;;  %v8503_v29 = vpop.eup %4713  ;;  %v10582_v21 = vld [vmem:[#allocation192_spill] sm:$0xff] }
 0x35e   : > { %v3350_v43 = vmul.f32 %v10478_v50, %v10577_v4  ;;  %3606 = vmatpush2.msra.mxu0 %v3351_v62  ;;  %v3270_v4 = vadd.f32 %v8493_v15, %v3269_v59  ;;  %3694 = vmatprep.subr.mxu1 %v3416_v18  ;;  %v3414_v8 = vmul.f32 %v7436_v34, %v10581_v55  ;;  %v8510_v62 = vpop.eup %4715  ;;  %v10585_v18 = vld [vmem:[#allocation152_spill] sm:$0xff] }
 0x35f   : > { %v2969_v63 = vmul.f32 1.442695, %v10578_v28  ;;  %v3348_v0 = vmul.f32 %v10478_v50, %v10582_v21  ;;  %v3213_v28 = vadd.f32 %v8503_v29, %v3212_v30  ;;  %v10583_v41 = vsub.f32 %v10460_v54, %v7959_v20  ;;  %3695 = vmatpush2.msra.mxu1 %v3415_v24  ;;  %v8520_v55 = vpop.eup %4717  ;;  %v10586_v30 = vld [vmem:[#allocation221_spill] sm:$0xff]  ;;  %v10587_v54 = vld [vmem:[#allocation191_spill] sm:$0xff] }
 0x360   : > { %3607 = vmatprep.subr.mxu0 %v3350_v43  ;;  %v3413_v59 = vmul.f32 %v10514_v1, %v10584_v53  ;;  %v3347_v43 = vmul.f32 %v10507_v19, %v10585_v18  ;;  %v3271_v21 = vadd.f32 %v8510_v62, %v3270_v4  ;;  %3696 = vmatprep.subr.mxu1 %v3414_v8  ;;  %v10590_v4 = vld [vmem:[#allocation149_spill] sm:$0xff]  ;;  %4735 = vpow2.f32 %v2965_v10  ;;  %v10600_v10 = vld [vmem:[#allocation175_spill] sm:$0xff] }
 0x361   : > { %v2973_v22 = vmul.f32 1.442695, %v10583_v41  ;;  %3608 = vmatpush2.msra.mxu0 %v3349_v11  ;;  %v3412_v26 = vmul.f32 %v7436_v34, %v10586_v30  ;;  %v3346_v24 = vmul.f32 %v10478_v50, %v10587_v54  ;;  %v8527_v11 = vpop.eup %4719  ;;  %v3214_v41 = vadd.f32 %v8520_v55, %v3213_v28  ;;  %v10591_v54 = vld [vmem:[#allocation220_spill] sm:$0xff] }
 0x362   : > { %3609 = vmatprep.subr.mxu0 %v3348_v0  ;;  %v10588_v53 = vsub.f32 %v10462_v46, %v7959_v20  ;;  %3697 = vmatpush2.msra.mxu1 %v3413_v59  ;;  %v3411_v8 = vmul.f32 %v10514_v1, %v10589_v9  ;;  %v3345_v0 = vmul.f32 %v10507_v19, %v10590_v4  ;;  %v10594_v59 = vld [vmem:[#allocation146_spill] sm:$0xff]  ;;  %v10595_v4 = vld [vmem:[#allocation176_spill] sm:$0xff]  ;;  %4737 = vpow2.f32 %v2969_v63 }
 0x363   : > { %3610 = vmatpush2.msra.mxu0 %v3347_v43  ;;  %v3272_v30 = vadd.f32 %v8527_v11, %v3271_v21  ;;  %3698 = vmatprep.subr.mxu1 %v3412_v26  ;;  %v3410_v28 = vmul.f32 %v7436_v34, %v10591_v54  ;;  %v3344_v46 = vmul.f32 %v10478_v50, %v10592_v13  ;;  %v3215_v9 = vrot.slane %v3214_v41, 4  ;;  %v10596_v21 = vld [vmem:[#allocation148_spill] sm:$0xff]  ;;  %v10597_v13 = vld [vmem:[#allocation219_spill] sm:$0xff] }
 0x364   : > { %v2977_v18 = vmul.f32 1.442695, %v10588_v53  ;;  %3611 = vmatprep.subr.mxu0 %v3346_v24  ;;  %v8542_v53 = vpop.eup %4721  ;;  %v3247_v43 = vadd.f32 %v10594_v59, %v8283_v57  ;;  %3699 = vmatpush2.msra.mxu1 %v3411_v8  ;;  %v3409_v27 = vmul.f32 %v10514_v1, %v10595_v4  ;;  %v3343_v26 = vmul.f32 %v10507_v19, %v10596_v21 }
 0x365   : > { %10593 = vst [vmem:[#allocation213_spill] sm:$0xff] %v8542_v53  ;;  %3612 = vmatpush2.msra.mxu0 %v3345_v0  ;;  %v3273_v24 = vadd.f32 %v8542_v53, %v3272_v30  ;;  %3700 = vmatprep.subr.mxu1 %v3410_v28  ;;  %v3408_v54 = vmul.f32 %v7436_v34, %v10597_v13  ;;  %v8555_v59 = vpop.eup %4723  ;;  %v10601_v28 = vld [vmem:[#allocation145_spill] sm:$0xff]  ;;  %4739 = vpow2.f32 %v2973_v22  ;;  %v10610_v22 = vld [vmem:[#allocation171_spill] sm:$0xff] }
 0x366   : > { %3613 = vmatprep.subr.mxu0 %v3344_v46  ;;  %v3342_v57 = vmul.f32 %v10478_v50, %v10598_v2  ;;  %v3216_v8 = vadd.f32 %v3215_v9, %v3214_v41  ;;  %v10599_v0 = vsub.f32 %v10463_v33, %v7959_v20  ;;  %3701 = vmatpush2.msra.mxu1 %v3409_v27  ;;  %v10602_v2 = vld [vmem:[#allocation217_spill] sm:$0xff]  ;;  %v10603_v9 = vld [vmem:[#allocation188_spill] sm:$0xff]  ;;  %v8569_v13 = vpop.eup %4725  ;;  %v10604_v27 = vld [vmem:[#allocation10_spill] sm:$0xff]  ;;  %4741 = vpow2.f32 %v2977_v18 }
 0x367   : > { %3614 = vmatpush2.msra.mxu0 %v3343_v26  ;;  %v3407_v30 = vmul.f32 %v10514_v1, %v10600_v10  ;;  %v3341_v46 = vmul.f32 %v10507_v19, %v10601_v28  ;;  %v3274_v21 = vadd.f32 %v8555_v59, %v3273_v24  ;;  %3702 = vmatprep.subr.mxu1 %v3408_v54  ;;  %v10605_v10 = vld [vmem:[#allocation173_spill] sm:$0xff]  ;;  %v10606_v28 = vld [vmem:[#allocation144_spill] sm:$0xff]  ;;  %v8581_v53 = vpop.eup %4727 }
 0x368   : > { %v2981_v4 = vmul.f32 1.442695, %v10599_v0  ;;  %3615 = vmatprep.subr.mxu0 %v3342_v57  ;;  %v3406_v41 = vmul.f32 %v7436_v34, %v10602_v2  ;;  %v3340_v33 = vmul.f32 %v10478_v50, %v10603_v9  ;;  %v3248_v26 = vadd.f32 %v10604_v27, %v3247_v43  ;;  %v10607_v57 = vld [vmem:[#allocation216_spill] sm:$0xff]  ;;  %v10608_v9 = vld [vmem:[#allocation187_spill] sm:$0xff] }
 0x369   : > { %v3217_v0 = vrot.slane %v3216_v8, 2  ;;  %3703 = vmatpush2.msra.mxu1 %v3407_v30  ;;  %3616 = vmatpush2.msra.mxu0 %v3341_v46  ;;  %v3405_v63 = vmul.f32 %v10514_v1, %v10605_v10  ;;  %v3339_v24 = vmul.f32 %v10507_v19, %v10606_v28  ;;  %v3275_v54 = vadd.f32 %v8569_v13, %v3274_v21 }
 0x36a   : > { %3704 = vmatprep.subr.mxu1 %v3406_v41  ;;  %3617 = vmatprep.subr.mxu0 %v3340_v33  ;;  %v3404_v2 = vmul.f32 %v7436_v34, %v10607_v57  ;;  %v3338_v43 = vmul.f32 %v10478_v50, %v10608_v9  ;;  %v10609_v46 = vsub.f32 %v10465_v16, %v7959_v20  ;;  %v10611_v41 = vld [vmem:[#allocation141_spill] sm:$0xff]  ;;  %v10612_v57 = vld [vmem:[#allocation19_spill] sm:$0xff]  ;;  %4743 = vpow2.f32 %v2981_v4 }
 0x36b   : > { %v3218_v30 = vadd.f32 %v3217_v0, %v3216_v8  ;;  %3705 = vmatpush2.msra.mxu1 %v3405_v63  ;;  %3618 = vmatpush2.msra.mxu0 %v3339_v24  ;;  %v3403_v21 = vmul.f32 %v10514_v1, %v10610_v22  ;;  %v3337_v33 = vmul.f32 %v10507_v19, %v10611_v41  ;;  %v10613_v0 = vld [vmem:[#allocation186_spill] sm:$0xff]  ;;  %v8595_v63 = vpop.eup %4729  ;;  %v10614_v24 = vld [vmem:[#allocation60_spill] sm:$0xff]  ;;  %4745 = vrcp.f32 %v8166_v3  ;;  %v10619_v4 = vld [vmem:[#allocation169_spill] sm:$0xff] }
 0x36c   : > { %v2985_v10 = vmul.f32 1.442695, %v10609_v46  ;;  %v3276_v28 = vadd.f32 %v8581_v53, %v3275_v54  ;;  %3706 = vmatprep.subr.mxu1 %v3404_v2  ;;  %3619 = vmatprep.subr.mxu0 %v3338_v43  ;;  %v3402_v8 = vmul.f32 %v7436_v34, %v10612_v57  ;;  %v3336_v16 = vmul.f32 %v10478_v50, %v10613_v0  ;;  %v10615_v22 = vld [vmem:[#allocation170_spill] sm:$0xff]  ;;  %v10616_v54 = vld [vmem:[#allocation140_spill] sm:$0xff]  ;;  %v8610_v0 = vpop.eup %4731  ;;  %v213_v3 = vld [vmem:[%s4967_s29 + $0x158] sm:$0xff] }
 0x36d   : > { %v3249_v9 = vadd.f32 %v10614_v24, %v3248_v26  ;;  %v3219_v46 = vrot.slane %v3218_v30, 1  ;;  %3707 = vmatpush2.msra.mxu1 %v3403_v21  ;;  %3620 = vmatpush2.msra.mxu0 %v3337_v33  ;;  %v3401_v18 = vmul.f32 %v10514_v1, %v10615_v22  ;;  %v3335_v2 = vmul.f32 %v10507_v19, %v10616_v54  ;;  %v202_v43 = vld [vmem:[%s4967_s29 + $0x80] sm:$0xff]  ;;  %v10618_v26 = vld [vmem:[#allocation215_spill] sm:$0xff] }
 0x36e   : > { %v10617_v41 = vsub.f32 %v10468_v49, %v7959_v20  ;;  %v3277_v57 = vadd.f32 %v8595_v63, %v3276_v28  ;;  %3708 = vmatprep.subr.mxu1 %v3402_v8  ;;  %3621 = vmatprep.subr.mxu0 %v3336_v16  ;;  %v3400_v21 = vmul.f32 %v7436_v34, %v10618_v26  ;;  %v205_v33 = vld [vmem:[%s4967_s29 + $0x98] sm:$0xff]  ;;  %v210_v22 = vld [vmem:[%s4967_s29 + $0x140] sm:$0xff]  ;;  %4747 = vpow2.f32 %v2985_v10 }
 0x36f   : > { %v3220_v19 = vadd.f32 %v3219_v46, %v3218_v30  ;;  %3709 = vmatpush2.msra.mxu1 %v3401_v18  ;;  %3622 = vmatpush2.msra.mxu0 %v3335_v2  ;;  %v3399_v49 = vmul.f32 %v10514_v1, %v10619_v4  ;;  %v10620_v28 = vsub.f32 %v10470_v45, %v7959_v20  ;;  %v8621_v30 = vpop.eup %4733  ;;  %v10621_v16 = vld [vmem:[#allocation91_spill] sm:$0xff]  ;;  %v204_v1 = vld [vmem:[%s4967_s29 + $0x90] sm:$0xff]  ;;  %v10622_v45 = vld [vmem:[#allocation228_spill] sm:$0xff] }
 0x370   : > { %v2989_v50 = vmul.f32 1.442695, %v10617_v41  ;;  %v3278_v34 = vadd.f32 %v8610_v0, %v3277_v57  ;;  %3710 = vmatprep.subr.mxu1 %v3400_v21  ;;  %3624 = vmatmul.mubr.f32.vlgmr.msra.gmra.mxu0 %v202_v43  ;;  %v3250_v46 = vadd.f32 %v10621_v16, %v3249_v9  ;;  %v10623_v10 = vsub.f32 %v10622_v45, %v7959_v20  ;;  %v207_v2 = vld [vmem:[%s4967_s29 + $0xa8] sm:$0xff]  ;;  %v8630_v43 = vpop.eup %4735  ;;  %v212_v9 = vld [vmem:[%s4967_s29 + $0x150] sm:$0xff]  ;;  %v10624_v20 = vld [vmem:[#allocation11_spill] sm:$0xff] }
 0x371   : > { %v2993_v8 = vmul.f32 1.442695, %v10620_v28  ;;  %4749 = vrcp.f32 %v3220_v19  ;;  %3711 = vmatpush2.msra.mxu1 %v3399_v49  ;;  %3629 = vmatprep.mubr.f32.mxu0 %v205_v33  ;;  %v8635_v57 = vpop.eup %4737  ;;  %v206_v21 = vld [vmem:[%s4967_s29 + $0xa0] sm:$0xff]  ;;  %v209_v19 = vld [vmem:[%s4967_s29 + $0xb8] sm:$0xff] }
 0x372   : > { %4751 = vpow2.f32 %v2989_v50  ;;  %v2997_v18 = vmul.f32 1.442695, %v10623_v10  ;;  %v3279_v54 = vadd.f32 %v8621_v30, %v3278_v34  ;;  %3713 = vmatmul.mubr.f32.vlgmr.msra.gmra.mxu1 %v210_v22  ;;  %v215_v50 = vld [vmem:[%s4967_s29 + $0x168] sm:$0xff]  ;;  %v3251_v26 = vadd.f32 %v10624_v20, %v3250_v46  ;;  %v8641_v4 = vpop.eup %4739  ;;  %v214_v49 = vld [vmem:[%s4967_s29 + $0x160] sm:$0xff]  ;;  %v217_v28 = vld [vmem:[%s4967_s29 + $0x178] sm:$0xff] }
 0x373   : > { %3718 = vmatprep.mubr.f32.mxu1 %v213_v3  ;;  %4753 = vpow2.f32 %v2993_v8  ;;  %v8646_v8 = vpop.eup %4741  ;;  %v208_v3 = vld [vmem:[%s4967_s29 + $0xb0] sm:$0xff] }
 0x374   : > { %v3280_v41 = vadd.f32 %v8630_v43, %v3279_v54  ;;  %3630 = vmatmul.mubr.f32.gmra.mxu0 %v204_v1  ;;  %4755 = vpow2.f32 %v2997_v18  ;;  %v3252_v34 = vrot.slane %v3251_v26, 4  ;;  %v219_v1 = vld [vmem:[%s4967_s29 + $0x208] sm:$0xff]  ;;  %v216_v10 = vld [vmem:[%s4967_s29 + $0x170] sm:$0xff] }
 0x375   : > { %3635 = vmatprep.mubr.f32.mxu0 %v207_v2  ;;  %v227_v2 = vld [vmem:[%s4967_s29 + $0x2c8] sm:$0xff] }
 0x376   : > { %v3281_v33 = vadd.f32 %v8635_v57, %v3280_v41  ;;  %3719 = vmatmul.mubr.f32.gmra.mxu1 %v212_v9  ;;  %v3253_v41 = vadd.f32 %v3252_v34, %v3251_v26 }
 0x377   : > { %3724 = vmatprep.mubr.f32.mxu1 %v215_v50  ;;  %v8651_v45 = vpop.eup %4743 }
 0x378   : > { %v3282_v22 = vadd.f32 %v8641_v4, %v3281_v33  ;;  %3636 = vmatmul.mubr.f32.gmra.mxu0 %v206_v21  ;;  %v8654_v18 = vpop.eup %4745  ;;  %v3254_v26 = vrot.slane %v3253_v41, 2 }
 0x379   : > { %3641 = vmatprep.mubr.f32.mxu0 %v209_v19 }
 0x37a   : > { %v3283_v46 = vadd.f32 %v8646_v8, %v3282_v22  ;;  %3725 = vmatmul.mubr.f32.gmra.mxu1 %v214_v49  ;;  %v10625_v22 = vld [vmem:[#allocation79_spill] sm:$0xff] }
 0x37b   : > { %3730 = vmatprep.mubr.f32.mxu1 %v217_v28  ;;  %v8658_v9 = vpop.eup %4747  ;;  %v3461_v28 = vmul.f32 %v8654_v18, %v10625_v22  ;;  %v3255_v22 = vadd.f32 %v3254_v26, %v3253_v41 }
 0x37c   : > { %v3284_v54 = vadd.f32 %v8651_v45, %v3283_v46  ;;  %3642 = vmatmul.mubr.f32.gmra.mxu0 %v208_v3 }
 0x37d   : > { %3801 = vmatprep.mubr.f32.mxu0 %v219_v1  ;;  %v10626_v1 = vld [vmem:[#allocation113_spill] sm:$0xff] }
 0x37e   : > { %v8660_v50 = vpop.eup %4749  ;;  %v3285_v21 = vadd.f32 %v8658_v9, %v3284_v54  ;;  %3731 = vmatmul.mubr.f32.gmra.mxu1 %v216_v10  ;;  %v3459_v10 = vmul.f32 %v8654_v18, %v10626_v1 }
 0x37f   : > { %v8663_v33 = vpop.eup %4751  ;;  %v3462_v19 = vmul.f32 %v8660_v50, %v8209_v37  ;;  %3890 = vmatprep.mubr.f32.mxu1 %v227_v2  ;;  %v3460_v34 = vmul.f32 %v8660_v50, %v8193_v52  ;;  %v3458_v54 = vmul.f32 %v8660_v50, %v8186_v39  ;;  %v3456_v52 = vmul.f32 %v8660_v50, %v8164_v51 }
 0x380   : > { %v3286_v49 = vadd.f32 %v8663_v33, %v3285_v21  ;;  %v8670_v3 = vpop.eup %4753  ;;  %v10627_v21 = vld [vmem:[#allocation52_spill] sm:$0xff]  ;;  %v8694_v39 = vmul.f32 %v8660_v50, %v8298_v44  ;;  %v8698_v41 = vmul.f32 %v8660_v50, %v8267_v32  ;;  %v3454_v51 = vmul.f32 %v8660_v50, %v8147_v61  ;;  %v10629_v32 = vld [vmem:[#allocation109_spill] sm:$0xff] }
 0x381   : > { %3737 = vmatprep.subr.mxu0 %v3462_v19  ;;  %v8677_v37 = vpop.eup %4755  ;;  %v3457_v19 = vmul.f32 %v8654_v18, %v10627_v21  ;;  %v8704_v26 = vmul.f32 %v8660_v50, %v8256_v47  ;;  %v8712_v44 = vmul.f32 %v8660_v50, %v8236_v23  ;;  %v3452_v61 = vmul.f32 %v8660_v50, %v8131_v14  ;;  %v10630_v21 = vld [vmem:[#allocation56_spill] sm:$0xff] }
 0x382   : > { %v3287_v46 = vadd.f32 %v8670_v3, %v3286_v49  ;;  %3738 = vmatpush1.msra.mxu0 %v3461_v28  ;;  %v10628_v49 = vld [vmem:[#allocation85_spill] sm:$0xff] }
 0x383   : > { %3739 = vmatprep.subr.mxu0 %v3460_v34  ;;  %v3455_v28 = vmul.f32 %v8654_v18, %v10628_v49  ;;  %v8690_v34 = vmul.f32 %v8660_v50, %v8319_v40  ;;  %v8708_v40 = vmul.f32 %v8660_v50, %v8243_v48  ;;  %v3451_v48 = vmul.f32 %v8654_v18, %v10630_v21 }
 0x384   : > { %v3288_v2 = vadd.f32 %v8677_v37, %v3287_v46  ;;  %3740 = vmatpush1.msra.mxu0 %v3459_v10  ;;  %v3453_v10 = vmul.f32 %v8654_v18, %v10629_v32  ;;  %v10634_v32 = vld [vmem:[#allocation94_spill] sm:$0xff] }
 0x385   : > { %3741 = vmatprep.subr.mxu0 %v3458_v54  ;;  %v3256_v54 = vrot.slane %v3255_v22, 1 }
 0x386   : > { %v3289_v1 = vrot.slane %v3288_v2, 4  ;;  %3742 = vmatpush1.msra.mxu0 %v3457_v19  ;;  %v10631_v19 = vld [vmem:[#allocation45_spill] sm:$0xff] }
 0x387   : > { %3743 = vmatprep.subr.mxu0 %v3456_v52  ;;  %v3450_v23 = vmul.f32 %v8660_v50, %v10631_v19 }
 0x388   : > { %v3290_v46 = vadd.f32 %v3289_v1, %v3288_v2  ;;  %3744 = vmatpush1.msra.mxu0 %v3455_v28  ;;  %v10632_v2 = vld [vmem:[#allocation88_spill] sm:$0xff]  ;;  %v3257_v28 = vadd.f32 %v3256_v54, %v3255_v22  ;;  %v10637_v22 = vld [vmem:[#allocation35_spill] sm:$0xff] }
 0x389   : > { %3745 = vmatprep.subr.mxu0 %v3454_v51  ;;  %v3449_v49 = vmul.f32 %v8654_v18, %v10632_v2  ;;  %v10633_v1 = vld [vmem:[#allocation172_spill] sm:$0xff]  ;;  %v3444_v54 = vmul.f32 %v8660_v50, %v10637_v22  ;;  %v10639_v2 = vld [vmem:[#allocation154_spill] sm:$0xff] }
 0x38a   : > { %v3291_v47 = vrot.slane %v3290_v46, 2  ;;  %3746 = vmatpush1.msra.mxu0 %v3453_v10  ;;  %v3448_v51 = vmul.f32 %v8660_v50, %v10633_v1  ;;  %v3447_v10 = vmul.f32 %v8654_v18, %v10634_v32  ;;  %4757 = vrcp.f32 %v3257_v28  ;;  %v10646_v22 = vld [vmem:[#allocation104_spill] sm:$0xff] }
 0x38b   : > { %3747 = vmatprep.subr.mxu0 %v3452_v61  ;;  %v10635_v61 = vld [vmem:[#allocation75_spill] sm:$0xff] }
 0x38c   : > { %v3292_v52 = vadd.f32 %v3291_v47, %v3290_v46  ;;  %3748 = vmatpush1.msra.mxu0 %v3451_v48  ;;  %v3446_v21 = vmul.f32 %v8660_v50, %v10635_v61  ;;  %v10636_v46 = vld [vmem:[#allocation16_spill] sm:$0xff]  ;;  %v10638_v48 = vld [vmem:[#allocation133_spill] sm:$0xff] }
 0x38d   : > { %3749 = vmatprep.subr.mxu0 %v3450_v23  ;;  %v3445_v47 = vmul.f32 %v8654_v18, %v10636_v46  ;;  %v3443_v23 = vmul.f32 %v8654_v18, %v10638_v48  ;;  %v10645_v46 = vld [vmem:[#allocation129_spill] sm:$0xff]  ;;  %v10647_v48 = vld [vmem:[#allocation119_spill] sm:$0xff] }
 0x38e   : > { %v3293_v14 = vrot.slane %v3292_v52, 1  ;;  %3750 = vmatpush1.msra.mxu0 %v3449_v49  ;;  %v3442_v49 = vmul.f32 %v8660_v50, %v10639_v2  ;;  %v10648_v2 = vld [vmem:[#allocation134_spill] sm:$0xff] }
 0x38f   : > { %3751 = vmatprep.subr.mxu0 %v3448_v51  ;;  %v10641_v51 = vld [vmem:[#allocation138_spill] sm:$0xff] }
 0x390   : > { %v3294_v19 = vadd.f32 %v3293_v14, %v3292_v52  ;;  %3752 = vmatpush1.msra.mxu0 %v3447_v10  ;;  %v10640_v52 = vld [vmem:[#allocation73_spill] sm:$0xff]  ;;  %v3440_v28 = vmul.f32 %v8660_v50, %v10641_v51  ;;  %v10642_v14 = vld [vmem:[#allocation163_spill] sm:$0xff]  ;;  %v10643_v10 = vld [vmem:[#allocation46_spill] sm:$0xff] }
 0x391   : > { %3753 = vmatprep.subr.mxu0 %v3446_v21  ;;  %v3441_v1 = vmul.f32 %v8654_v18, %v10640_v52  ;;  %v3439_v32 = vmul.f32 %v8654_v18, %v10642_v14  ;;  %v3438_v61 = vmul.f32 %v8660_v50, %v10643_v10  ;;  %v10644_v21 = vld [vmem:[#allocation164_spill] sm:$0xff]  ;;  %v10649_v52 = vld [vmem:[#allocation115_spill] sm:$0xff]  ;;  %v3494_v10 = vmul.f32 %v8660_v50, %v8520_v55 }
 0x392   : > { %4759 = vrcp.f32 %v3294_v19  ;;  %3754 = vmatpush1.msra.mxu0 %v3445_v47  ;;  %v3437_v19 = vmul.f32 %v8654_v18, %v10644_v21  ;;  %v3436_v47 = vmul.f32 %v8660_v50, %v10645_v46  ;;  %v10651_v21 = vld [vmem:[#allocation162_spill] sm:$0xff]  ;;  %v3492_v55 = vmul.f32 %v8660_v50, %v8503_v29 }
 0x393   : > { %3755 = vmatprep.subr.mxu0 %v3444_v54  ;;  %v3435_v54 = vmul.f32 %v8654_v18, %v10646_v22  ;;  %v10657_v29 = vld [vmem:[#allocation118_spill] sm:$0xff] }
 0x394   : > { %3756 = vmatpush1.msra.mxu0 %v3443_v23  ;;  %v3434_v23 = vmul.f32 %v8660_v50, %v10647_v48 }
 0x395   : > { %3757 = vmatprep.subr.mxu0 %v3442_v49  ;;  %v3433_v49 = vmul.f32 %v8654_v18, %v10648_v2 }
 0x396   : > { %3758 = vmatpush1.msra.mxu0 %v3441_v1  ;;  %v3432_v1 = vmul.f32 %v8660_v50, %v10649_v52  ;;  %v10656_v52 = vld [vmem:[#allocation26_spill] sm:$0xff] }
 0x397   : > { %3759 = vmatprep.subr.mxu0 %v3440_v28  ;;  %v8758_v51 = vpop.eup %4757  ;;  %v10650_v28 = vld [vmem:[#allocation100_spill] sm:$0xff] }
 0x398   : > { %3760 = vmatpush1.msra.mxu0 %v3439_v32  ;;  %v3431_v14 = vmul.f32 %v8654_v18, %v10650_v28  ;;  %v3490_v28 = vmul.f32 %v8660_v50, %v8485_v7 }
 0x399   : > { %3761 = vmatprep.subr.mxu0 %v3438_v61 }
 0x39a   : > { %3762 = vmatpush1.msra.mxu0 %v3437_v19  ;;  %v3525_v19 = vmul.f32 %v8758_v51, %v10651_v21 }
 0x39b   : > { %3763 = vmatprep.subr.mxu0 %v3436_v47  ;;  %v10652_v47 = vld [vmem:[#allocation40_spill] sm:$0xff] }
 0x39c   : > { %3764 = vmatpush1.msra.mxu0 %v3435_v54  ;;  %v3493_v22 = vmul.f32 %v8654_v18, %v10652_v47  ;;  %v10653_v54 = vld [vmem:[#allocation70_spill] sm:$0xff] }
 0x39d   : > { %3765 = vmatprep.subr.mxu0 %v3434_v23  ;;  %v3523_v48 = vmul.f32 %v8758_v51, %v10653_v54  ;;  %v10654_v23 = vld [vmem:[#allocation50_spill] sm:$0xff]  ;;  %v10661_v54 = vld [vmem:[#allocation151_spill] sm:$0xff] }
 0x39e   : > { %3766 = vmatpush1.msra.mxu0 %v3433_v49  ;;  %v3521_v2 = vmul.f32 %v8758_v51, %v10654_v23  ;;  %v10655_v49 = vld [vmem:[#allocation127_spill] sm:$0xff] }
 0x39f   : > { %v8762_v32 = vpop.eup %4759  ;;  %3767 = vmatprep.subr.mxu0 %v3432_v1  ;;  %v3519_v1 = vmul.f32 %v8758_v51, %v10656_v52 }
 0x3a0   : > { %v3526_v61 = vmul.f32 %v8762_v32, %v8527_v11  ;;  %3768 = vmatpush1.msra.mxu0 %v3431_v14  ;;  %v3524_v46 = vmul.f32 %v8762_v32, %v8510_v62  ;;  %v3522_v11 = vmul.f32 %v8762_v32, %v8493_v15  ;;  %v3491_v62 = vmul.f32 %v8654_v18, %v10655_v49  ;;  %v10664_v49 = vld [vmem:[#allocation166_spill] sm:$0xff] }
 0x3a1   : > { %3769 = vmatprep.subr.mxu0 %v3494_v10  ;;  %v3489_v14 = vmul.f32 %v8654_v18, %v10657_v29  ;;  %v3520_v15 = vmul.f32 %v8762_v32, %v8475_v38  ;;  %v3488_v10 = vmul.f32 %v8660_v50, %v8467_v12  ;;  %v8800_v7 = vmul.f32 %v8762_v32, %v8610_v0  ;;  %v10659_v0 = vld [vmem:[#allocation159_spill] sm:$0xff]  ;;  %v10667_v29 = vld [vmem:[#allocation132_spill] sm:$0xff] }
 0x3a2   : > { %3826 = vmatprep.subr.mxu1 %v3526_v61  ;;  %3770 = vmatpush2.msra.mxu0 %v3493_v22  ;;  %v10658_v61 = vld [vmem:[#allocation110_spill] sm:$0xff]  ;;  %v8808_v12 = vmul.f32 %v8762_v32, %v8581_v53  ;;  %v8812_v38 = vmul.f32 %v8762_v32, %v8569_v13  ;;  %v3517_v47 = vmul.f32 %v8758_v51, %v10659_v0  ;;  %v10660_v22 = vld [vmem:[#allocation105_spill] sm:$0xff] }
 0x3a3   : > { %3827 = vmatpush1.msra.mxu1 %v3525_v19  ;;  %3771 = vmatprep.subr.mxu0 %v3492_v55  ;;  %v3487_v21 = vmul.f32 %v8654_v18, %v10658_v61  ;;  %v3518_v19 = vmul.f32 %v8762_v32, %v8457_v42  ;;  %v8816_v42 = vmul.f32 %v8762_v32, %v8555_v59  ;;  %v10662_v55 = vld [vmem:[#allocation97_spill] sm:$0xff]  ;;  %v10669_v61 = vld [vmem:[#allocation20_spill] sm:$0xff] }
 0x3a4   : > { %3828 = vmatprep.subr.mxu1 %v3524_v46  ;;  %3772 = vmatpush2.msra.mxu0 %v3491_v62  ;;  %v8804_v46 = vmul.f32 %v8762_v32, %v8595_v63  ;;  %v3486_v63 = vmul.f32 %v8660_v50, %v8433_v25  ;;  %v3516_v53 = vmul.f32 %v8762_v32, %v8441_v60  ;;  %v10665_v62 = vld [vmem:[#allocation90_spill] sm:$0xff] }
 0x3a5   : > { %3829 = vmatpush1.msra.mxu1 %v3523_v48  ;;  %3773 = vmatprep.subr.mxu0 %v3490_v28  ;;  %v3485_v13 = vmul.f32 %v8654_v18, %v10660_v22  ;;  %v3515_v59 = vmul.f32 %v8758_v51, %v10661_v54  ;;  %v3484_v48 = vmul.f32 %v8660_v50, %v8401_v31  ;;  %v10666_v28 = vld [vmem:[#allocation82_spill] sm:$0xff] }
 0x3a6   : > { %3830 = vmatprep.subr.mxu1 %v3522_v11  ;;  %3774 = vmatpush2.msra.mxu0 %v3489_v14  ;;  %v3514_v25 = vmul.f32 %v8762_v32, %v8423_v35  ;;  %v3483_v60 = vmul.f32 %v8654_v18, %v10662_v55  ;;  %v10663_v11 = vld [vmem:[#allocation143_spill] sm:$0xff]  ;;  %v3512_v31 = vmul.f32 %v8762_v32, %v8409_v56 }
 0x3a7   : > { %3831 = vmatpush1.msra.mxu1 %v3521_v2  ;;  %3775 = vmatprep.subr.mxu0 %v3488_v10  ;;  %v3513_v23 = vmul.f32 %v8758_v51, %v10663_v11  ;;  %v3482_v2 = vmul.f32 %v8660_v50, %v8371_v36  ;;  %v3481_v35 = vmul.f32 %v8654_v18, %v10664_v49  ;;  %v10668_v10 = vld [vmem:[#allocation17_spill] sm:$0xff]  ;;  %v10678_v11 = vld [vmem:[#allocation106_spill] sm:$0xff] }
 0x3a8   : > { %3832 = vmatprep.subr.mxu1 %v3520_v15  ;;  %3776 = vmatpush2.msra.mxu0 %v3487_v21  ;;  %v3511_v52 = vmul.f32 %v8758_v51, %v10665_v62  ;;  %v3510_v36 = vmul.f32 %v8762_v32, %v8393_v6  ;;  %v3479_v56 = vmul.f32 %v8654_v18, %v10666_v28  ;;  %v10684_v28 = vld [vmem:[#allocation27_spill] sm:$0xff] }
 0x3a9   : > { %3833 = vmatpush1.msra.mxu1 %v3519_v1  ;;  %3777 = vmatprep.subr.mxu0 %v3486_v63  ;;  %v3480_v1 = vmul.f32 %v8660_v50, %v8355_v58  ;;  %v3509_v14 = vmul.f32 %v8758_v51, %v10667_v29  ;;  %v3478_v15 = vmul.f32 %v8660_v50, %v8335_v17  ;;  %v10672_v63 = vld [vmem:[#allocation13_spill] sm:$0xff] }
 0x3aa   : > { %3834 = vmatprep.subr.mxu1 %v3518_v19  ;;  %3778 = vmatpush2.msra.mxu0 %v3485_v13  ;;  %v3508_v58 = vmul.f32 %v8762_v32, %v8379_v5  ;;  %v3477_v6 = vmul.f32 %v8654_v18, %v10668_v10  ;;  %v3507_v21 = vmul.f32 %v8758_v51, %v10669_v61  ;;  %v10670_v19 = vld [vmem:[#allocation225_spill] sm:$0xff] }
 0x3ab   : > { %3835 = vmatpush1.msra.mxu1 %v3517_v47  ;;  %3779 = vmatprep.subr.mxu0 %v3484_v48  ;;  %v3506_v0 = vmul.f32 %v8762_v32, %v10670_v19  ;;  %v10671_v47 = vld [vmem:[#allocation126_spill] sm:$0xff]  ;;  %v3505_v5 = vmul.f32 %v8758_v51, %v10672_v63  ;;  %v10674_v13 = vld [vmem:[#allocation9_spill] sm:$0xff] }
 0x3ac   : > { %3836 = vmatprep.subr.mxu1 %v3516_v53  ;;  %3780 = vmatpush2.msra.mxu0 %v3483_v60  ;;  %v3475_v17 = vmul.f32 %v8654_v18, %v10671_v47  ;;  %v10673_v53 = vld [vmem:[#allocation47_spill] sm:$0xff]  ;;  %v3473_v54 = vmul.f32 %v8654_v18, %v10674_v13  ;;  %v10685_v29 = vld [vmem:[#allocation209_spill] sm:$0xff]  ;;  %v3557_v47 = vmul.f32 %v8758_v51, %v10624_v20  ;;  %v220_v20 = vld [vmem:[%s4967_s29 + $0x210] sm:$0xff] }
 0x3ad   : > { %3837 = vmatpush1.msra.mxu1 %v3515_v59  ;;  %3781 = vmatprep.subr.mxu0 %v3482_v2  ;;  %v3504_v22 = vmul.f32 %v8762_v32, %v10673_v53  ;;  %v10675_v59 = vld [vmem:[#allocation114_spill] sm:$0xff]  ;;  %v10679_v2 = vld [vmem:[#allocation63_spill] sm:$0xff]  ;;  %v223_v63 = vld [vmem:[%s4967_s29 + $0x228] sm:$0xff] }
 0x3ae   : > { %3838 = vmatprep.subr.mxu1 %v3514_v25  ;;  %3782 = vmatpush2.msra.mxu0 %v3481_v35  ;;  %v3503_v48 = vmul.f32 %v8758_v51, %v10675_v59  ;;  %v10676_v25 = vld [vmem:[#allocation92_spill] sm:$0xff]  ;;  %v10681_v35 = vld [vmem:[#allocation101_spill] sm:$0xff]  ;;  %v10690_v53 = vld [vmem:[#allocation146_spill] sm:$0xff] }
 0x3af   : > { %3839 = vmatpush1.msra.mxu1 %v3513_v23  ;;  %3783 = vmatprep.subr.mxu0 %v3480_v1  ;;  %v3502_v55 = vmul.f32 %v8762_v32, %v10676_v25  ;;  %v3501_v23 = vmul.f32 %v8758_v51, %v10678_v11  ;;  %v3499_v62 = vmul.f32 %v8758_v51, %v10681_v35  ;;  %v10691_v13 = vld [vmem:[#allocation81_spill] sm:$0xff]  ;;  %v10692_v59 = vld [vmem:[#allocation28_spill] sm:$0xff]  ;;  %v10699_v35 = vld [vmem:[#allocation210_spill] sm:$0xff] }
 0x3b0   : > { %3840 = vmatprep.subr.mxu1 %v3512_v31  ;;  %3784 = vmatpush2.msra.mxu0 %v3479_v56  ;;  %v3500_v31 = vmul.f32 %v8762_v32, %v10679_v2  ;;  %v3497_v56 = vmul.f32 %v8758_v51, %v10684_v28  ;;  %v3544_v25 = vmul.f32 %v8762_v32, %v8635_v57  ;;  %v10696_v2 = vld [vmem:[#allocation8_spill] sm:$0xff]  ;;  %v228_v28 = vld [vmem:[%s4967_s29 + $0x2d0] sm:$0xff] }
 0x3b1   : > { %3841 = vmatpush1.msra.mxu1 %v3511_v52  ;;  %3785 = vmatprep.subr.mxu0 %v3478_v15  ;;  %v10682_v52 = vld [vmem:[#allocation208_spill] sm:$0xff]  ;;  %v3540_v11 = vmul.f32 %v8762_v32, %v8621_v30  ;;  %v10698_v30 = vld [vmem:[#allocation98_spill] sm:$0xff] }
 0x3b2   : > { %3842 = vmatprep.subr.mxu1 %v3510_v36  ;;  %3786 = vmatpush2.msra.mxu0 %v3477_v6  ;;  %v3498_v1 = vmul.f32 %v8762_v32, %v10682_v52  ;;  %v10688_v6 = vld [vmem:[#allocation158_spill] sm:$0xff] }
 0x3b3   : > { %3843 = vmatpush1.msra.mxu1 %v3509_v14  ;;  %3787 = vmatprep.subr.mxu0 %v8690_v34  ;;  %v10677_v34 = vld [vmem:[#allocation66_spill] sm:$0xff]  ;;  %v10686_v14 = vld [vmem:[#allocation55_spill] sm:$0xff]  ;;  %v3464_v61 = vmul.f32 %v8660_v50, %v10688_v6  ;;  %v3556_v50 = vmul.f32 %v8762_v32, %v8670_v3  ;;  %v3552_v3 = vmul.f32 %v8762_v32, %v8658_v9 }
 0x3b4   : > { %3844 = vmatprep.subr.mxu1 %v3508_v58  ;;  %3788 = vmatpush2.msra.mxu0 %v3475_v17  ;;  %v3471_v60 = vmul.f32 %v8654_v18, %v10677_v34  ;;  %v3465_v15 = vmul.f32 %v8654_v18, %v10686_v14  ;;  %v10687_v58 = vld [vmem:[#allocation178_spill] sm:$0xff]  ;;  %v3553_v17 = vmul.f32 %v8758_v51, %v10614_v24 }
 0x3b5   : > { %3845 = vmatpush1.msra.mxu1 %v3507_v21  ;;  %3789 = vmatprep.subr.mxu0 %v8694_v39  ;;  %v10680_v39 = vld [vmem:[#allocation34_spill] sm:$0xff]  ;;  %v3495_v10 = vmul.f32 %v8758_v51, %v10687_v58  ;;  %v10689_v21 = vld [vmem:[#allocation43_spill] sm:$0xff]  ;;  %v3549_v24 = vmul.f32 %v8758_v51, %v10690_v53  ;;  %v3548_v9 = vmul.f32 %v8762_v32, %v8646_v8 }
 0x3b6   : > { %3846 = vmatprep.subr.mxu1 %v3506_v0  ;;  %3790 = vmatpush2.msra.mxu0 %v3473_v54  ;;  %v3469_v49 = vmul.f32 %v8654_v18, %v10680_v39  ;;  %v3463_v19 = vmul.f32 %v8654_v18, %v10689_v21  ;;  %v218_v0 = vld [vmem:[%s4967_s29 + $0x200] sm:$0xff]  ;;  %v224_v54 = vld [vmem:[%s4967_s29 + $0x230] sm:$0xff]  ;;  %v10693_v8 = vld [vmem:[#allocation123_spill] sm:$0xff]  ;;  %v3542_v34 = vmul.f32 %v8762_v32, %v8630_v43 }
 0x3b7   : > { %3847 = vmatpush1.msra.mxu1 %v3505_v5  ;;  %3791 = vmatprep.subr.mxu0 %v8698_v41  ;;  %v10683_v41 = vld [vmem:[#allocation117_spill] sm:$0xff]  ;;  %v222_v5 = vld [vmem:[%s4967_s29 + $0x220] sm:$0xff]  ;;  %v10697_v43 = vld [vmem:[#allocation102_spill] sm:$0xff] }
 0x3b8   : > { %3848 = vmatprep.subr.mxu1 %v3504_v22  ;;  %3792 = vmatpush2.msra.mxu0 %v3471_v60  ;;  %v3467_v36 = vmul.f32 %v8654_v18, %v10683_v41  ;;  %v3554_v18 = vmul.f32 %v8762_v32, %v8663_v33  ;;  %v3550_v33 = vmul.f32 %v8762_v32, %v8651_v45  ;;  %v225_v22 = vld [vmem:[%s4967_s29 + $0x238] sm:$0xff] }
 0x3b9   : > { %3849 = vmatpush1.msra.mxu1 %v3503_v48  ;;  %3793 = vmatprep.subr.mxu0 %v8704_v26  ;;  %v3496_v26 = vmul.f32 %v8762_v32, %v10685_v29  ;;  %v3546_v45 = vmul.f32 %v8762_v32, %v8641_v4  ;;  %v3545_v48 = vmul.f32 %v8758_v51, %v10692_v59  ;;  %v10694_v4 = vld [vmem:[#allocation111_spill] sm:$0xff] }
 0x3ba   : > { %3850 = vmatprep.subr.mxu1 %v3502_v55  ;;  %3794 = vmatpush2.msra.mxu0 %v3469_v49  ;;  %v3543_v55 = vmul.f32 %v8758_v51, %v10693_v8  ;;  %v3541_v60 = vmul.f32 %v8758_v51, %v10694_v4  ;;  %v3535_v39 = vmul.f32 %v8758_v51, %v10697_v43  ;;  %v233_v29 = vld [vmem:[%s4967_s29 + $0x2f8] sm:$0xff] }
 0x3bb   : > { %3851 = vmatpush1.msra.mxu1 %v3501_v23  ;;  %3795 = vmatprep.subr.mxu0 %v8708_v40  ;;  %v3558_v40 = vmul.f32 %v8762_v32, %v8677_v37  ;;  %v3555_v37 = vmul.f32 %v8758_v51, %v10621_v16  ;;  %v3551_v16 = vmul.f32 %v8758_v51, %v10604_v27  ;;  %v10695_v23 = vld [vmem:[#allocation107_spill] sm:$0xff] }
 0x3bc   : > { %3852 = vmatprep.subr.mxu1 %v3500_v31  ;;  %3796 = vmatpush2.msra.mxu0 %v3467_v36  ;;  %v3547_v27 = vmul.f32 %v8758_v51, %v10691_v13  ;;  %v3539_v57 = vmul.f32 %v8758_v51, %v10695_v23  ;;  %v3537_v31 = vmul.f32 %v8758_v51, %v10696_v2  ;;  %v226_v36 = vld [vmem:[%s4967_s29 + $0x2c0] sm:$0xff] }
 0x3bd   : > { %3853 = vmatpush1.msra.mxu1 %v3499_v62  ;;  %3797 = vmatprep.subr.mxu0 %v8712_v44  ;;  %v221_v44 = vld [vmem:[%s4967_s29 + $0x218] sm:$0xff]  ;;  %v3533_v49 = vmul.f32 %v8758_v51, %v10698_v30 }
 0x3be   : > { %3854 = vmatprep.subr.mxu1 %v3498_v1  ;;  %3798 = vmatpush2.msra.mxu0 %v3465_v15  ;;  %v10700_v62 = vld [vmem:[#allocation51_spill] sm:$0xff] }
 0x3bf   : > { %3855 = vmatpush1.msra.mxu1 %v3497_v56  ;;  %3799 = vmatprep.subr.mxu0 %v3464_v61  ;;  %v3529_v52 = vmul.f32 %v8758_v51, %v10700_v62  ;;  %v231_v56 = vld [vmem:[%s4967_s29 + $0x2e8] sm:$0xff] }
 0x3c0   : > { %3856 = vmatprep.subr.mxu1 %v3496_v26  ;;  %3800 = vmatpush2.msra.mxu0 %v3463_v19 }
 0x3c1   : > { %3857 = vmatpush1.msra.mxu1 %v3495_v10  ;;  %3802 = vmatmul.mubr.f32.vlgmr.msra.gmra.mxu0 %v218_v0 }
 0x3c2   : > { %3858 = vmatprep.subr.mxu1 %v3558_v40  ;;  %3807 = vmatprep.mubr.f32.mxu0 %v221_v44 }
 0x3c3   : > { %3859 = vmatpush2.msra.mxu1 %v3557_v47 }
 0x3c4   : > { %3860 = vmatprep.subr.mxu1 %v3556_v50 }
 0x3c5   : > { %3861 = vmatpush2.msra.mxu1 %v3555_v37  ;;  %3808 = vmatmul.mubr.f32.gmra.mxu0 %v220_v20 }
 0x3c6   : > { %3862 = vmatprep.subr.mxu1 %v3554_v18  ;;  %3813 = vmatprep.mubr.f32.mxu0 %v223_v63 }
 0x3c7   : > { %3863 = vmatpush2.msra.mxu1 %v3553_v17 }
 0x3c8   : > { %3864 = vmatprep.subr.mxu1 %v3552_v3 }
 0x3c9   : > { %3865 = vmatpush2.msra.mxu1 %v3551_v16  ;;  %3814 = vmatmul.mubr.f32.gmra.mxu0 %v222_v5 }
 0x3ca   : > { %3866 = vmatprep.subr.mxu1 %v3550_v33  ;;  %3819 = vmatprep.mubr.f32.mxu0 %v225_v22 }
 0x3cb   : > { %3867 = vmatpush2.msra.mxu1 %v3549_v24 }
 0x3cc   : > { %3868 = vmatprep.subr.mxu1 %v3548_v9 }
 0x3cd   : > { %3869 = vmatpush2.msra.mxu1 %v3547_v27  ;;  %3820 = vmatmul.mubr.f32.gmra.mxu0 %v224_v54 }
 0x3ce   : > { %3870 = vmatprep.subr.mxu1 %v3546_v45 }
 0x3cf   : > { %3871 = vmatpush2.msra.mxu1 %v3545_v48 }
 0x3d0   : > { %3872 = vmatprep.subr.mxu1 %v3544_v25 }
 0x3d1   : > { %3873 = vmatpush2.msra.mxu1 %v3543_v55 }
 0x3d2   : > { %3874 = vmatprep.subr.mxu1 %v3542_v34 }
 0x3d3   : > { %3875 = vmatpush2.msra.mxu1 %v3541_v60 }
 0x3d4   : > { %3876 = vmatprep.subr.mxu1 %v3540_v11 }
 0x3d5   : > { %3877 = vmatpush2.msra.mxu1 %v3539_v57 }
 0x3d6   : > { %3878 = vmatprep.subr.mxu1 %v8800_v7  ;;  %v3531_v7 = vmul.f32 %v8758_v51, %v10699_v35 }
 0x3d7   : > { %3879 = vmatpush2.msra.mxu1 %v3537_v31 }
 0x3d8   : > { %3880 = vmatprep.subr.mxu1 %v8804_v46  ;;  %v10701_v46 = vld [vmem:[#allocation213_spill] sm:$0xff] }
 0x3d9   : > { %3881 = vmatpush2.msra.mxu1 %v3535_v39  ;;  %v3528_v1 = vmul.f32 %v8762_v32, %v10701_v46  ;;  %v232_v32 = vld [vmem:[%s4967_s29 + $0x2f0] sm:$0xff] }
 0x3da   : > { %3882 = vmatprep.subr.mxu1 %v8808_v12  ;;  %v10702_v12 = vld [vmem:[#allocation174_spill] sm:$0xff] }
 0x3db   : > { %3883 = vmatpush2.msra.mxu1 %v3533_v49  ;;  %v3527_v41 = vmul.f32 %v8758_v51, %v10702_v12 }
 0x3dc   : > { %3884 = vmatprep.subr.mxu1 %v8812_v38  ;;  %v229_v38 = vld [vmem:[%s4967_s29 + $0x2d8] sm:$0xff] }
 0x3dd   : > { %3885 = vmatpush2.msra.mxu1 %v3531_v7 }
 0x3de   : > { %3886 = vmatprep.subr.mxu1 %v8816_v42  ;;  %v230_v42 = vld [vmem:[%s4967_s29 + $0x2e0] sm:$0xff] }
 0x3df   : > { %3887 = vmatpush2.msra.mxu1 %v3529_v52 }
 0x3e0   : > { %3888 = vmatprep.subr.mxu1 %v3528_v1 }
 0x3e1   : > { %3889 = vmatpush2.msra.mxu1 %v3527_v41 }
 0x3e2   : > { %3891 = vmatmul.mubr.f32.vlgmr.msra.gmra.mxu1 %v226_v36 }
 0x3e3   : > { %3896 = vmatprep.mubr.f32.mxu1 %v229_v38 }
 0x3e6   : > { %3897 = vmatmul.mubr.f32.gmra.mxu1 %v228_v28 }
 0x3e7   : > { %3902 = vmatprep.mubr.f32.mxu1 %v231_v56 }
 0x3ea   : > { %3903 = vmatmul.mubr.f32.gmra.mxu1 %v230_v42 }
 0x3eb   : > { %3908 = vmatprep.mubr.f32.mxu1 %v233_v29 }
 0x3ee   : > { %3909 = vmatmul.mubr.f32.gmra.mxu1 %v232_v32 }
 0x430   : > { %v3625_v26 = vpop.f32.mrf.mxu0 }
 0x431   : > { %3915 = vst [vmem:[%s8980_s24] sm:$0xff] %v3625_v26 }
 0x432   : > { %v3714_v51 = vpop.f32.mrf.mxu1  ;;  %v3627_v14 = vpop.f32.mrf.mxu0 }
 0x433   : > { %3923 = vst [vmem:[%s8980_s24 + $0x40] sm:$0xff] %v3714_v51  ;;  %3916 = vst [vmem:[%s8980_s24 + $0x8] sm:$0xff] %v3627_v14 }
 0x434   : > { %v3716_v15 = vpop.f32.mrf.mxu1  ;;  %v3631_v58 = vpop.f32.mrf.mxu0 }
 0x435   : > { %3924 = vst [vmem:[%s8980_s24 + $0x48] sm:$0xff] %v3716_v15  ;;  %3917 = vst [vmem:[%s8980_s24 + $0x10] sm:$0xff] %v3631_v58 }
 0x436   : > { %v3720_v10 = vpop.f32.mrf.mxu1  ;;  %v3633_v6 = vpop.f32.mrf.mxu0 }
 0x437   : > { %3925 = vst [vmem:[%s8980_s24 + $0x50] sm:$0xff] %v3720_v10  ;;  %3918 = vst [vmem:[%s8980_s24 + $0x18] sm:$0xff] %v3633_v6 }
 0x438   : > { %v3722_v61 = vpop.f32.mrf.mxu1  ;;  %v3637_v40 = vpop.f32.mrf.mxu0 }
 0x439   : > { %3926 = vst [vmem:[%s8980_s24 + $0x58] sm:$0xff] %v3722_v61  ;;  %3919 = vst [vmem:[%s8980_s24 + $0x20] sm:$0xff] %v3637_v40 }
 0x43a   : > { %v3726_v21 = vpop.f32.mrf.mxu1  ;;  %v3639_v19 = vpop.f32.mrf.mxu0 }
 0x43b   : > { %3927 = vst [vmem:[%s8980_s24 + $0x60] sm:$0xff] %v3726_v21  ;;  %3920 = vst [vmem:[%s8980_s24 + $0x28] sm:$0xff] %v3639_v19 }
 0x43c   : > { %v3728_v0 = vpop.f32.mrf.mxu1  ;;  %v3643_v47 = vpop.f32.mrf.mxu0 }
 0x43d   : > { %3928 = vst [vmem:[%s8980_s24 + $0x68] sm:$0xff] %v3728_v0  ;;  %3921 = vst [vmem:[%s8980_s24 + $0x30] sm:$0xff] %v3643_v47 }
 0x43e   : > { %v3732_v44 = vpop.f32.mrf.mxu1  ;;  %v3645_v50 = vpop.f32.mrf.mxu0 }
 0x43f   : > { %3929 = vst [vmem:[%s8980_s24 + $0x70] sm:$0xff] %v3732_v44  ;;  %3922 = vst [vmem:[%s8980_s24 + $0x38] sm:$0xff] %v3645_v50 }
 0x440   : > { %v3734_v37 = vpop.f32.mrf.mxu1 }
 0x441   : > { %3930 = vst [vmem:[%s8980_s24 + $0x78] sm:$0xff] %v3734_v37 }
 0x481   : > { %v3803_v18 = vpop.f32.mrf.mxu0 }
 0x482   : > { %3931 = vst [vmem:[%s8980_s24 + $0x80] sm:$0xff] %v3803_v18 }
 0x483   : > { %v3805_v20 = vpop.f32.mrf.mxu0 }
 0x484   : > { %3932 = vst [vmem:[%s8980_s24 + $0x88] sm:$0xff] %v3805_v20 }
 0x485   : > { %v3809_v17 = vpop.f32.mrf.mxu0 }
 0x486   : > { %3933 = vst [vmem:[%s8980_s24 + $0x90] sm:$0xff] %v3809_v17 }
 0x487   : > { %v3811_v63 = vpop.f32.mrf.mxu0 }
 0x488   : > { %3934 = vst [vmem:[%s8980_s24 + $0x98] sm:$0xff] %v3811_v63 }
 0x489   : > { %v3815_v3 = vpop.f32.mrf.mxu0 }
 0x48a   : > { %3935 = vst [vmem:[%s8980_s24 + $0xa0] sm:$0xff] %v3815_v3 }
 0x48b   : > { %v3817_v16 = vpop.f32.mrf.mxu0 }
 0x48c   : > { %3936 = vst [vmem:[%s8980_s24 + $0xa8] sm:$0xff] %v3817_v16 }
 0x48d   : > { %v3821_v33 = vpop.f32.mrf.mxu0 }
 0x48e   : > { %3937 = vst [vmem:[%s8980_s24 + $0xb0] sm:$0xff] %v3821_v33 }
 0x48f   : > { %v3823_v5 = vpop.f32.mrf.mxu0 }
 0x490   : > { %3938 = vst [vmem:[%s8980_s24 + $0xb8] sm:$0xff] %v3823_v5 }
 0x4a2   : > { %v3892_v53 = vpop.f32.mrf.mxu1 }
 0x4a3   : > { %3939 = vst [vmem:[%s8980_s24 + $0xc0] sm:$0xff] %v3892_v53 }
 0x4a4   : > { %v3894_v24 = vpop.f32.mrf.mxu1 }
 0x4a5   : > { %3940 = vst [vmem:[%s8980_s24 + $0xc8] sm:$0xff] %v3894_v24 }
 0x4a6   : > { %v3898_v22 = vpop.f32.mrf.mxu1 }
 0x4a7   : > { %3941 = vst [vmem:[%s8980_s24 + $0xd0] sm:$0xff] %v3898_v22 }
 0x4a8   : > { %v3900_v9 = vpop.f32.mrf.mxu1 }
 0x4a9   : > { %3942 = vst [vmem:[%s8980_s24 + $0xd8] sm:$0xff] %v3900_v9 }
 0x4aa   : > { %v3904_v13 = vpop.f32.mrf.mxu1 }
 0x4ab   : > { %3943 = vst [vmem:[%s8980_s24 + $0xe0] sm:$0xff] %v3904_v13 }
 0x4ac   : > { %v3906_v27 = vpop.f32.mrf.mxu1 }
 0x4ad   : > { %3944 = vst [vmem:[%s8980_s24 + $0xe8] sm:$0xff] %v3906_v27 }
 0x4ae   : > { %v3910_v45 = vpop.f32.mrf.mxu1 }
 0x4af   : > { %3945 = vst [vmem:[%s8980_s24 + $0xf0] sm:$0xff] %v3910_v45 }
 0x4b0   : > { %v3912_v54 = vpop.f32.mrf.mxu1 }
 0x4b1   : > { %3946 = vst [vmem:[%s8980_s24 + $0xf8] sm:$0xff] %v3912_v54 }
 0x4b2   : > { %4802 = shalt.err (!%p4799_p10)
}
 0x4b3   : > { %s4803_s13 = scalar_lea.hbm %s9017_s2, 4096  ;;  %s4807_s20 = scalar_lea.hbm %s9065_s1, 8192 }
 0x4b4   : > { %p4804_p0 = scmp.ne.s32.totalorder %s9017_s2, %s4803_s13  ;;  %p4808_p1 = scmp.lt.s32.totalorder %s9017_s2, %s9065_s1 }
 0x4b5   : > { %p4809_p3 = scmp.lt.s32.totalorder %s4807_s20, %s4803_s13 }
 0x4b6   : > { %p4805_p2 = pnand %p4804_p0, %p10703_p12 }
 0x4b7   : > { %p4810_p6 = por %p4809_p3, %p4808_p1 }
 0x4b8   : > { %p4806_p9 = pneg %p4805_p2 }
 0x4ba   : > { %p4811_p11 = pnand %p4810_p6, %p4806_p9 }
 0x4bc   : > { %4814 = shalt.err (!%p4811_p11)
}
 0x4bd   : > { %s4860_s26 = smov 256   ;;  %s4861_s29 = smov 16  }
 0x4be   : > { %4184 = dma.vmem_to_hbm [thread:$0]  (%p10703_p12), %s9019_s27, 4096, %s9017_s2, %s3948_s3, %s4860_s26, %s4860_s26, %s4861_s29  }
 0x4bf PF: > { %s3977_s16 = sand.u32 1, %s4841_s6   ;;  %p10704_p13 = scmp.ne.s32.totalorder %s9571_s18, 0 }
 0x4c0   : > { %p10705_p4 = scmp.ge.s32.totalorder %s4853_s9, 2  ;;  %s3978_s24 = scalar_lea.sflag [#allocation4], %s3977_s16 }
 0x4c2   : > { %p4191_p5 = pnand %p10705_p4, %p10704_p13 }
 0x4c4   : > { %p4192_p7 = pneg %p4191_p5 }
 0x4c6   : > { %4836 = dma.done.wait (%p4192_p7), %s3978_s24, 4096  }
 0x4c7   : > { %4838 = vsyncadd (%p4192_p7), %s3978_s24, 4294963200  ;;  %p14_p8 = scmp.ge.s32.totalorder %s4897_s12, 4   ;;  %s10706_s6 = smov %s4845_s7 }
 0x4c8   : > { %s10707_s7 = smov %s4849_s8  ;;  %s10708_s8 = smov %s4909_s15 }
 0x4c9   : > { %s10709_s9 = smov %s4897_s12  ;;  %16 = sbr.rel (!%p14_p8) target bundleno = 5 (0x5), region = 69 }
 0x4ce   :  { %3983 = vsyncpa [#allocation3], 1 }
 0x4cf   :  { %3985 = vsyncpa [#allocation3 + $0x1], 1 }
 0x4d0   :  { %3986 = vsyncpa [#allocation4], 1 }
 0x4d1   :  { %3988 = vsyncpa [#allocation4 + $0x1], 1 }

</bundles_post_ra>
